<compile_context>
chip_gen: v6e
topology: v6e:2x2x1
jax: 0.10.0
libtpu: 0.0.40
codegen_flags: <defaults>
</compile_context>

<pallas_src>
import math

import numpy as np
import jax
import jax.numpy as jnp
from jax import lax
from jax.experimental import pallas as pl
from jax.experimental.pallas import tpu as pltpu

_BIG = 1e30  # finite "infinity" sentinel (real d2 must stay well below this)


def _pow_small_int(base, p):
    """base ** p, using exact repeated multiplication for small integer p."""
    if isinstance(p, (int, np.integer)) and 0 <= int(p) <= 16:
        p = int(p)
        if p == 0:
            return jnp.ones_like(base)
        r = base
        for _ in range(p - 1):
            r = r * base
        return r
    return base ** jnp.float32(p)


def _vmem_capacity_bytes():
    try:
        info = pltpu.get_tpu_info()
        cap = int(getattr(info, "vmem_capacity_bytes", 0))
        if cap > 0:
            return cap
    except Exception:
        pass
    return 64 << 20  # conservative fallback (v7x per-TensorCore VMEM)


def _make_topo_kernel(n, d, n_pad, d_pad):
    """Kernel for `n` real d-dim points padded to (n_pad, d_pad).

    Emits the (1, n_pad) vector of dim-0 persistence deaths (MST edge lengths);
    lanes n-1 .. n_pad-1 are zero.
    """
    full_unroll = n <= 64
    chunk = min(n_pad, 512)
    idx_bits = max(1, (n_pad - 1).bit_length())   # bits needed for a lane index
    idx_mask = (1 << idx_bits) - 1
    clear_mask = np.int32(~idx_mask)              # clears the low idx_bits bits
    use_vpu_d2 = d_pad <= 8                       # exact diff^2 path (no MXU Gram)

    def kernel(x_ref, xt_ref, deaths_ref, d2_ref):
        lane = lax.broadcasted_iota(jnp.int32, (1, n_pad), 1)   # (1, n_pad)
        valid_lane = lane < n

        x = x_ref[...]                                          # (n_pad, d_pad)
        xt = xt_ref[...]                                        # (d_pad, n_pad)

        # ---- pairwise squared distances, streamed into d2_ref in row chunks
        row0 = None
        for c in range(0, n_pad, chunk):
            rows = min(chunk, n_pad - c)
            if use_vpu_d2:
                # Exact sum_k (x[i,k]-x[j,k])^2 on the VPU. K is tiny (<=8) so
                # the MXU Gram would run at ~3-6% utilization and its
                # |x|^2+|y|^2-2x.y form loses exact zeros for duplicate points.
                acc = jnp.zeros((rows, n_pad), jnp.float32)
                for k in range(d):                 # real coordinates only
                    diff = x[c:c + rows, k:k + 1] - xt[k:k + 1, :]
                    acc = acc + diff * diff
                d2c = acc
            else:
                g = lax.dot_general(x[c:c + rows, :], xt, (((1,), (0,)), ((), ())),
                                    preferred_element_type=jnp.float32)
                sq_c = jnp.sum(x[c:c + rows, :] * x[c:c + rows, :],
                               axis=1, keepdims=True)
                sq_r = jnp.sum(xt * xt, axis=0, keepdims=True)
                d2c = jnp.maximum(sq_c + sq_r - 2.0 * g, 0.0)
            d2c = jnp.where(valid_lane, d2c, _BIG)
            d2_ref[pl.ds(c, rows), :] = d2c
            if c == 0:
                row0 = d2c[0:1, :]                 # keep row 0 in registers

        # ---- Prim's MST == dim-0 persistence deaths (births are all 0) ----
        visited0 = (lane == 0) | (lane >= n)
        mind0 = jnp.where(visited0, _BIG, row0)
        deaths0 = jnp.zeros((1, n_pad), jnp.float32)

        def step(k, mind, vis, d_row):
            # Fused min+argmin: mind >= 0 so IEEE-f32 bit order == int order.
            # Pack the lane index into the low idx_bits bits and do a single
            # cross-lane reduction on the critical path; the exact min value
            # (for the death) is an independent reduction that overlaps with
            # the dynamic row load.
            bits = pltpu.bitcast(mind, jnp.int32)
            packed = (bits & clear_mask) | lane
            pmin = jnp.min(packed)
            j_idx = pmin & idx_mask
            dmin = jnp.min(mind)                    # exact value, off crit path
            death = jnp.sqrt(jnp.maximum(dmin, 0.0))
            d_row = d_row + jnp.where(lane == (k - 1), death, 0.0)
            vis = vis | (lane == j_idx)
            # O(n_pad) dynamic sublane row load from the VMEM scratch.
            row_j = d2_ref[pl.ds(j_idx, 1), :]
            mind = jnp.where(vis, _BIG, jnp.minimum(mind, row_j))
            return mind, vis, d_row

        if full_unroll:
            mind, vis, d_row = mind0, visited0, deaths0
            for k in range(1, n):
                mind, vis, d_row = step(k, mind, vis, d_row)
        else:
            def body(k, carry):
                return step(k, *carry)
            _, _, d_row = lax.fori_loop(1, n, body, (mind0, visited0, deaths0),
                                        unroll=8)

        deaths_ref[...] = d_row                     # lane-dense (1, n_pad) output

    return kernel


def topological_loss(Y, *, dim=0, i=1, j=np.inf, weight=1.0, exponent=1, decay=0):
    """JAX/Pallas equivalent of TopologicalLoss(dim=0,...)(Y) for a point cloud Y."""
    if dim != 0:
        # TODO(synk): dim > 0 requires an alpha-complex boundary-matrix reduction.
        raise NotImplementedError("Only dim=0 (connected components) is supported.")
    Y = jnp.asarray(Y, jnp.float32)
    n, d = Y.shape
    if weight == 0 or n < 2:
        return jnp.float32(0.0)

    n_pad = max(128, ((n + 127) // 128) * 128)   # lane axis of the deaths row / d2
    d_pad = max(8, ((d + 7) // 8) * 8)           # pad D to 8 only (not 128)

    xp = jnp.zeros((n_pad, d_pad), jnp.float32).at[:n, :d].set(Y)
    xt = xp.T                                    # (d_pad, n_pad)

    kernel = _make_topo_kernel(n, d, n_pad, d_pad)

    # VMEM budget: d2 scratch + one construction chunk + double-buffered inputs,
    # clamped to ~80% of this generation's physical VMEM (generation-aware).
    chunk = min(n_pad, 512)
    need = (n_pad * n_pad * 4 + 3 * chunk * n_pad * 4 +
            4 * (n_pad * d_pad * 4) + (4 << 20))
    cap = _vmem_capacity_bytes()
    vmem_limit = int(max(32 << 20, min(need, int(cap * 0.8))))
    # TODO(synk): if n_pad*n_pad*4 > vmem_limit, use a d2-free recompute path.

    deaths_row = pl.pallas_call(
        kernel,
        out_shape=jax.ShapeDtypeStruct((1, n_pad), jnp.float32),
        grid=(1,),
        in_specs=[pl.BlockSpec((n_pad, d_pad), lambda g: (0, 0)),
                  pl.BlockSpec((d_pad, n_pad), lambda g: (0, 0))],
        out_specs=pl.BlockSpec((1, n_pad), lambda g: (0, 0)),
        scratch_shapes=[pltpu.VMEM((n_pad, n_pad), jnp.float32)],
        compiler_params=pltpu.CompilerParams(
            dimension_semantics=("arbitrary",),
            vmem_limit_bytes=vmem_limit),
    )(xp, xt)

    # ---- DiagramLoss epilogue in plain JAX (O(n log n) on a length-(n-1) vector)
    deaths = deaths_row[0, : n - 1]                 # births are all 0 for H0
    valid = deaths > 0.0                            # remove_zero_bars
    num_valid = jnp.sum(valid.astype(jnp.int32))
    key = jnp.where(valid, -deaths, jnp.inf)        # invalid bars sort last
    order = jnp.argsort(key)                        # stable: ties keep index order
    d_sorted = deaths[order]
    pos = jnp.arange(n - 1, dtype=jnp.int32)
    if math.isinf(float(j)):
        upper = num_valid
    else:
        upper = jnp.minimum(num_valid, jnp.int32(int(j)))
    selected = (pos >= jnp.int32(i - 1)) & (pos < upper)
    base = jnp.where(selected, d_sorted, 1.0)       # safe base for pow
    g = _pow_small_int(base, exponent)
    if decay != 0:
        g = g * _pow_small_int(0.5 * base, decay)   # midpoint = 0.5 * death
    return jnp.float32(weight) * jnp.sum(jnp.where(selected, g, 0.0))


def _reference_loss(Y, *, i=1, j=np.inf, weight=1.0, exponent=1, decay=0):
    """Pure NumPy reference mirroring TopologicalLoss/DiagramLoss semantics (dim=0)."""
    Y = np.asarray(Y, dtype=np.float64)
    n = Y.shape[0]
    if weight == 0 or n < 2:
        return 0.0
    diff = Y[:, None, :] - Y[None, :, :]
    d2 = (diff * diff).sum(-1)
    INF = 1e30
    visited = np.zeros(n, bool)
    visited[0] = True
    mind = d2[0].copy()
    mind[visited] = INF
    deaths = []
    for _ in range(n - 1):
        v = int(np.argmin(mind))
        deaths.append(np.sqrt(mind[v]))
        visited[v] = True
        mind = np.minimum(mind, d2[v])
        mind[visited] = INF
    deaths = np.array(deaths)
    births = np.zeros_like(deaths)
    keep = deaths != births                      # remove_zero_bars
    b, dth = births[keep], deaths[keep]
    lengths = dth - b
    order = np.argsort(-lengths, kind="stable")  # descending
    start = i - 1
    stop = int(min(len(lengths), j))
    sel = order[start:stop]
    if sel.size == 0:
        return 0.0
    g = (dth[sel] - b[sel]) ** exponent * (0.5 * (b[sel] + dth[sel])) ** decay
    return float(weight * g.sum())


if __name__ == "__main__":
    key = jax.random.PRNGKey(0)
    Y = jax.random.normal(key, (32, 3), dtype=jnp.float32)   # N=32 points in R^3

    # default TopologicalLoss(): dim=0, i=1, j=inf, weight=1, exponent=1, decay=0
    loss = topological_loss(Y, dim=0, i=1, j=np.inf, weight=1.0, exponent=1, decay=0)
    loss = jax.block_until_ready(loss)
    ref = _reference_loss(np.asarray(Y), i=1, j=np.inf, weight=1.0, exponent=1, decay=0)
    assert np.allclose(float(loss), ref, rtol=1e-3, atol=1e-3), (float(loss), ref)

    # non-default configuration exercising the [i, j) rank slice, exponent,
    # decay and weight (rank now runs in the plain-JAX epilogue)
    loss2 = topological_loss(Y, dim=0, i=2, j=10, weight=0.5, exponent=2, decay=1)
    loss2 = jax.block_until_ready(loss2)
    ref2 = _reference_loss(np.asarray(Y), i=2, j=10, weight=0.5, exponent=2, decay=1)
    assert np.allclose(float(loss2), ref2, rtol=1e-3, atol=1e-3), (float(loss2), ref2)

    # duplicate points: exact VPU diff^2 keeps remove_zero_bars faithful
    Y3 = jnp.concatenate([Y[:16], Y[:5]], axis=0)            # 21 points, 5 duplicates
    loss3 = topological_loss(Y3, dim=0, i=1, j=np.inf, weight=1.0, exponent=1, decay=0)
    loss3 = jax.block_until_ready(loss3)
    ref3 = _reference_loss(np.asarray(Y3), i=1, j=np.inf, weight=1.0, exponent=1, decay=0)
    assert np.allclose(float(loss3), ref3, rtol=1e-3, atol=1e-3), (float(loss3), ref3)

    print("KERNEL_OK")
</pallas_src>

<mosaic_0001>
module attributes {stable_mosaic.version = 11 : i64} {
  func.func @kernel(%arg0: i32, %arg1: memref<128x8xf32, #tpu.memory_space<vmem>>, %arg2: memref<8x128xf32, #tpu.memory_space<vmem>>, %arg3: memref<1x128xf32, #tpu.memory_space<vmem>>, %arg4: memref<128x128xf32, #tpu.memory_space<vmem>>) attributes {dimension_semantics = [#tpu.dimension_semantics<arbitrary>], iteration_bounds = array<i64: 1>, scalar_prefetch = 0 : i64, scratch_operands = 1 : i64, tpu.core_type = #tpu.core_type<tc>, window_params = [{pipeline_mode = #tpu.pipeline_mode<synchronous>, transform_indices = @transform_0, window_bounds = array<i64: 128, 8>}, {pipeline_mode = #tpu.pipeline_mode<synchronous>, transform_indices = @transform_1, window_bounds = array<i64: 8, 128>}, {pipeline_mode = #tpu.pipeline_mode<synchronous>, transform_indices = @transform_2, window_bounds = array<i64: 1, 128>}]} {
    %0 = tpu.iota {dimensions = array<i32: 1>} : vector<1x128xi32>
    %c32_i32 = arith.constant 32 : i32
    %1 = vector.broadcast %c32_i32 : i32 to vector<1x128xi32>
    %2 = arith.cmpi slt, %0, %1 : vector<1x128xi32>
    %c0 = arith.constant 0 : index
    %c0_0 = arith.constant 0 : index
    %3 = vector.load %arg1[%c0, %c0_0] : memref<128x8xf32, #tpu.memory_space<vmem>>, vector<128x8xf32>
    %c0_1 = arith.constant 0 : index
    %c0_2 = arith.constant 0 : index
    %4 = vector.load %arg2[%c0_1, %c0_2] : memref<8x128xf32, #tpu.memory_space<vmem>>, vector<8x128xf32>
    %cst = arith.constant 0.000000e+00 : f32
    %5 = vector.broadcast %cst : f32 to vector<128x128xf32>
    %6 = vector.extract_strided_slice %3 {offsets = [0, 0], sizes = [128, 1], strides = [1, 1]} : vector<128x8xf32> to vector<128x1xf32>
    %7 = vector.extract_strided_slice %4 {offsets = [0, 0], sizes = [1, 128], strides = [1, 1]} : vector<8x128xf32> to vector<1x128xf32>
    %8 = vector.broadcast %6 : vector<128x1xf32> to vector<128x128xf32>
    %9 = vector.broadcast %7 : vector<1x128xf32> to vector<128x128xf32>
    %10 = arith.subf %8, %9 : vector<128x128xf32>
    %11 = arith.mulf %10, %10 : vector<128x128xf32>
    %12 = arith.addf %5, %11 : vector<128x128xf32>
    %13 = vector.extract_strided_slice %3 {offsets = [0, 1], sizes = [128, 1], strides = [1, 1]} : vector<128x8xf32> to vector<128x1xf32>
    %14 = vector.extract_strided_slice %4 {offsets = [1, 0], sizes = [1, 128], strides = [1, 1]} : vector<8x128xf32> to vector<1x128xf32>
    %15 = vector.broadcast %13 : vector<128x1xf32> to vector<128x128xf32>
    %16 = vector.broadcast %14 : vector<1x128xf32> to vector<128x128xf32>
    %17 = arith.subf %15, %16 : vector<128x128xf32>
    %18 = arith.mulf %17, %17 : vector<128x128xf32>
    %19 = arith.addf %12, %18 : vector<128x128xf32>
    %20 = vector.extract_strided_slice %3 {offsets = [0, 2], sizes = [128, 1], strides = [1, 1]} : vector<128x8xf32> to vector<128x1xf32>
    %21 = vector.extract_strided_slice %4 {offsets = [2, 0], sizes = [1, 128], strides = [1, 1]} : vector<8x128xf32> to vector<1x128xf32>
    %22 = vector.broadcast %20 : vector<128x1xf32> to vector<128x128xf32>
    %23 = vector.broadcast %21 : vector<1x128xf32> to vector<128x128xf32>
    %24 = arith.subf %22, %23 : vector<128x128xf32>
    %25 = arith.mulf %24, %24 : vector<128x128xf32>
    %26 = arith.addf %19, %25 : vector<128x128xf32>
    %cst_3 = arith.constant 1.000000e+30 : f32
    %27 = vector.shape_cast %2 : vector<1x128xi1> to vector<1x128xi1>
    %28 = vector.broadcast %27 : vector<1x128xi1> to vector<128x128xi1>
    %29 = vector.broadcast %cst_3 : f32 to vector<128x128xf32>
    %30 = arith.select %28, %26, %29 : vector<128x128xi1>, vector<128x128xf32>
    %c0_4 = arith.constant 0 : index
    %c0_5 = arith.constant 0 : index
    %31 = vector.load %arg4[%c0_4, %c0_5] : memref<128x128xf32, #tpu.memory_space<vmem>>, vector<128x128xf32>
    tpu.vector_store %arg4[%c0_4, %c0_5], %30 {strides = array<i32>} : memref<128x128xf32, #tpu.memory_space<vmem>>, vector<128x128xf32>,
    %32 = vector.extract_strided_slice %30 {offsets = [0, 0], sizes = [1, 128], strides = [1, 1]} : vector<128x128xf32> to vector<1x128xf32>
    %c0_i32 = arith.constant 0 : i32
    %33 = vector.broadcast %c0_i32 : i32 to vector<1x128xi32>
    %34 = arith.cmpi eq, %0, %33 : vector<1x128xi32>
    %c32_i32_6 = arith.constant 32 : i32
    %35 = vector.broadcast %c32_i32_6 : i32 to vector<1x128xi32>
    %36 = arith.cmpi sge, %0, %35 : vector<1x128xi32>
    %37 = arith.ori %34, %36 : vector<1x128xi1>
    %cst_7 = arith.constant 1.000000e+30 : f32
    %38 = vector.broadcast %cst_7 : f32 to vector<1x128xf32>
    %39 = arith.select %37, %38, %32 : vector<1x128xi1>, vector<1x128xf32>
    %cst_8 = arith.constant 0.000000e+00 : f32
    %40 = vector.broadcast %cst_8 : f32 to vector<1x128xf32>
    %41 = tpu.bitcast %39 : vector<1x128xf32> -> vector<1x128xi32>
    %c-128_i32 = arith.constant -128 : i32
    %42 = vector.broadcast %c-128_i32 : i32 to vector<1x128xi32>
    %43 = arith.andi %41, %42 : vector<1x128xi32>
    %44 = arith.ori %43, %0 : vector<1x128xi32>
    %45 = vector.shape_cast %44 : vector<1x128xi32> to vector<1x1x128xi32>
    %cst_9 = arith.constant dense<2147483647> : vector<1xi32>
    %46 = vector.multi_reduction <minsi>, %45, %cst_9 [1, 2] : vector<1x1x128xi32> to vector<1xi32>
    %47 = vector.shape_cast %46 : vector<1xi32> to vector<1x1x1xi32>
    %48 = vector.extract %47[0, 0, 0] : i32 from vector<1x1x1xi32>
    %c127_i32 = arith.constant 127 : i32
    %49 = arith.andi %48, %c127_i32 : i32
    %50 = vector.shape_cast %39 : vector<1x128xf32> to vector<1x1x128xf32>
    %cst_10 = arith.constant dense<0x7F800000> : vector<1xf32>
    %51 = vector.multi_reduction <minimumf>, %50, %cst_10 [1, 2] : vector<1x1x128xf32> to vector<1xf32>
    %52 = vector.shape_cast %51 : vector<1xf32> to vector<1x1x1xf32>
    %53 = vector.extract %52[0, 0, 0] : f32 from vector<1x1x1xf32>
    %cst_11 = arith.constant 0.000000e+00 : f32
    %54 = arith.maximumf %53, %cst_11 : f32
    %55 = math.sqrt %54 : f32
    %c0_i32_12 = arith.constant 0 : i32
    %56 = vector.broadcast %c0_i32_12 : i32 to vector<1x128xi32>
    %57 = arith.cmpi eq, %0, %56 : vector<1x128xi32>
    %cst_13 = arith.constant 0.000000e+00 : f32
    %58 = vector.broadcast %55 : f32 to vector<1x128xf32>
    %59 = vector.broadcast %cst_13 : f32 to vector<1x128xf32>
    %60 = arith.select %57, %58, %59 : vector<1x128xi1>, vector<1x128xf32>
    %61 = arith.addf %40, %60 : vector<1x128xf32>
    %62 = vector.broadcast %49 : i32 to vector<1x128xi32>
    %63 = arith.cmpi eq, %0, %62 : vector<1x128xi32>
    %64 = arith.ori %37, %63 : vector<1x128xi1>
    %65 = arith.index_cast %49 : i32 to index
    %c0_14 = arith.constant 0 : index
    %66 = vector.load %arg4[%65, %c0_14] : memref<128x128xf32, #tpu.memory_space<vmem>>, vector<1x128xf32>
    %67 = arith.minimumf %39, %66 : vector<1x128xf32>
    %cst_15 = arith.constant 1.000000e+30 : f32
    %68 = vector.broadcast %cst_15 : f32 to vector<1x128xf32>
    %69 = arith.select %64, %68, %67 : vector<1x128xi1>, vector<1x128xf32>
    %70 = tpu.bitcast %69 : vector<1x128xf32> -> vector<1x128xi32>
    %c-128_i32_16 = arith.constant -128 : i32
    %71 = vector.broadcast %c-128_i32_16 : i32 to vector<1x128xi32>
    %72 = arith.andi %70, %71 : vector<1x128xi32>
    %73 = arith.ori %72, %0 : vector<1x128xi32>
    %74 = vector.shape_cast %73 : vector<1x128xi32> to vector<1x1x128xi32>
    %cst_17 = arith.constant dense<2147483647> : vector<1xi32>
    %75 = vector.multi_reduction <minsi>, %74, %cst_17 [1, 2] : vector<1x1x128xi32> to vector<1xi32>
    %76 = vector.shape_cast %75 : vector<1xi32> to vector<1x1x1xi32>
    %77 = vector.extract %76[0, 0, 0] : i32 from vector<1x1x1xi32>
    %c127_i32_18 = arith.constant 127 : i32
    %78 = arith.andi %77, %c127_i32_18 : i32
    %79 = vector.shape_cast %69 : vector<1x128xf32> to vector<1x1x128xf32>
    %cst_19 = arith.constant dense<0x7F800000> : vector<1xf32>
    %80 = vector.multi_reduction <minimumf>, %79, %cst_19 [1, 2] : vector<1x1x128xf32> to vector<1xf32>
    %81 = vector.shape_cast %80 : vector<1xf32> to vector<1x1x1xf32>
    %82 = vector.extract %81[0, 0, 0] : f32 from vector<1x1x1xf32>
    %cst_20 = arith.constant 0.000000e+00 : f32
    %83 = arith.maximumf %82, %cst_20 : f32
    %84 = math.sqrt %83 : f32
    %c1_i32 = arith.constant 1 : i32
    %85 = vector.broadcast %c1_i32 : i32 to vector<1x128xi32>
    %86 = arith.cmpi eq, %0, %85 : vector<1x128xi32>
    %cst_21 = arith.constant 0.000000e+00 : f32
    %87 = vector.broadcast %84 : f32 to vector<1x128xf32>
    %88 = vector.broadcast %cst_21 : f32 to vector<1x128xf32>
    %89 = arith.select %86, %87, %88 : vector<1x128xi1>, vector<1x128xf32>
    %90 = arith.addf %61, %89 : vector<1x128xf32>
    %91 = vector.broadcast %78 : i32 to vector<1x128xi32>
    %92 = arith.cmpi eq, %0, %91 : vector<1x128xi32>
    %93 = arith.ori %64, %92 : vector<1x128xi1>
    %94 = arith.index_cast %78 : i32 to index
    %c0_22 = arith.constant 0 : index
    %95 = vector.load %arg4[%94, %c0_22] : memref<128x128xf32, #tpu.memory_space<vmem>>, vector<1x128xf32>
    %96 = arith.minimumf %69, %95 : vector<1x128xf32>
    %cst_23 = arith.constant 1.000000e+30 : f32
    %97 = vector.broadcast %cst_23 : f32 to vector<1x128xf32>
    %98 = arith.select %93, %97, %96 : vector<1x128xi1>, vector<1x128xf32>
    %99 = tpu.bitcast %98 : vector<1x128xf32> -> vector<1x128xi32>
    %c-128_i32_24 = arith.constant -128 : i32
    %100 = vector.broadcast %c-128_i32_24 : i32 to vector<1x128xi32>
    %101 = arith.andi %99, %100 : vector<1x128xi32>
    %102 = arith.ori %101, %0 : vector<1x128xi32>
    %103 = vector.shape_cast %102 : vector<1x128xi32> to vector<1x1x128xi32>
    %cst_25 = arith.constant dense<2147483647> : vector<1xi32>
    %104 = vector.multi_reduction <minsi>, %103, %cst_25 [1, 2] : vector<1x1x128xi32> to vector<1xi32>
    %105 = vector.shape_cast %104 : vector<1xi32> to vector<1x1x1xi32>
    %106 = vector.extract %105[0, 0, 0] : i32 from vector<1x1x1xi32>
    %c127_i32_26 = arith.constant 127 : i32
    %107 = arith.andi %106, %c127_i32_26 : i32
    %108 = vector.shape_cast %98 : vector<1x128xf32> to vector<1x1x128xf32>
    %cst_27 = arith.constant dense<0x7F800000> : vector<1xf32>
    %109 = vector.multi_reduction <minimumf>, %108, %cst_27 [1, 2] : vector<1x1x128xf32> to vector<1xf32>
    %110 = vector.shape_cast %109 : vector<1xf32> to vector<1x1x1xf32>
    %111 = vector.extract %110[0, 0, 0] : f32 from vector<1x1x1xf32>
    %cst_28 = arith.constant 0.000000e+00 : f32
    %112 = arith.maximumf %111, %cst_28 : f32
    %113 = math.sqrt %112 : f32
    %c2_i32 = arith.constant 2 : i32
    %114 = vector.broadcast %c2_i32 : i32 to vector<1x128xi32>
    %115 = arith.cmpi eq, %0, %114 : vector<1x128xi32>
    %cst_29 = arith.constant 0.000000e+00 : f32
    %116 = vector.broadcast %113 : f32 to vector<1x128xf32>
    %117 = vector.broadcast %cst_29 : f32 to vector<1x128xf32>
    %118 = arith.select %115, %116, %117 : vector<1x128xi1>, vector<1x128xf32>
    %119 = arith.addf %90, %118 : vector<1x128xf32>
    %120 = vector.broadcast %107 : i32 to vector<1x128xi32>
    %121 = arith.cmpi eq, %0, %120 : vector<1x128xi32>
    %122 = arith.ori %93, %121 : vector<1x128xi1>
    %123 = arith.index_cast %107 : i32 to index
    %c0_30 = arith.constant 0 : index
    %124 = vector.load %arg4[%123, %c0_30] : memref<128x128xf32, #tpu.memory_space<vmem>>, vector<1x128xf32>
    %125 = arith.minimumf %98, %124 : vector<1x128xf32>
    %cst_31 = arith.constant 1.000000e+30 : f32
    %126 = vector.broadcast %cst_31 : f32 to vector<1x128xf32>
    %127 = arith.select %122, %126, %125 : vector<1x128xi1>, vector<1x128xf32>
    %128 = tpu.bitcast %127 : vector<1x128xf32> -> vector<1x128xi32>
    %c-128_i32_32 = arith.constant -128 : i32
    %129 = vector.broadcast %c-128_i32_32 : i32 to vector<1x128xi32>
    %130 = arith.andi %128, %129 : vector<1x128xi32>
    %131 = arith.ori %130, %0 : vector<1x128xi32>
    %132 = vector.shape_cast %131 : vector<1x128xi32> to vector<1x1x128xi32>
    %cst_33 = arith.constant dense<2147483647> : vector<1xi32>
    %133 = vector.multi_reduction <minsi>, %132, %cst_33 [1, 2] : vector<1x1x128xi32> to vector<1xi32>
    %134 = vector.shape_cast %133 : vector<1xi32> to vector<1x1x1xi32>
    %135 = vector.extract %134[0, 0, 0] : i32 from vector<1x1x1xi32>
    %c127_i32_34 = arith.constant 127 : i32
    %136 = arith.andi %135, %c127_i32_34 : i32
    %137 = vector.shape_cast %127 : vector<1x128xf32> to vector<1x1x128xf32>
    %cst_35 = arith.constant dense<0x7F800000> : vector<1xf32>
    %138 = vector.multi_reduction <minimumf>, %137, %cst_35 [1, 2] : vector<1x1x128xf32> to vector<1xf32>
    %139 = vector.shape_cast %138 : vector<1xf32> to vector<1x1x1xf32>
    %140 = vector.extract %139[0, 0, 0] : f32 from vector<1x1x1xf32>
    %cst_36 = arith.constant 0.000000e+00 : f32
    %141 = arith.maximumf %140, %cst_36 : f32
    %142 = math.sqrt %141 : f32
    %c3_i32 = arith.constant 3 : i32
    %143 = vector.broadcast %c3_i32 : i32 to vector<1x128xi32>
    %144 = arith.cmpi eq, %0, %143 : vector<1x128xi32>
    %cst_37 = arith.constant 0.000000e+00 : f32
    %145 = vector.broadcast %142 : f32 to vector<1x128xf32>
    %146 = vector.broadcast %cst_37 : f32 to vector<1x128xf32>
    %147 = arith.select %144, %145, %146 : vector<1x128xi1>, vector<1x128xf32>
    %148 = arith.addf %119, %147 : vector<1x128xf32>
    %149 = vector.broadcast %136 : i32 to vector<1x128xi32>
    %150 = arith.cmpi eq, %0, %149 : vector<1x128xi32>
    %151 = arith.ori %122, %150 : vector<1x128xi1>
    %152 = arith.index_cast %136 : i32 to index
    %c0_38 = arith.constant 0 : index
    %153 = vector.load %arg4[%152, %c0_38] : memref<128x128xf32, #tpu.memory_space<vmem>>, vector<1x128xf32>
    %154 = arith.minimumf %127, %153 : vector<1x128xf32>
    %cst_39 = arith.constant 1.000000e+30 : f32
    %155 = vector.broadcast %cst_39 : f32 to vector<1x128xf32>
    %156 = arith.select %151, %155, %154 : vector<1x128xi1>, vector<1x128xf32>
    %157 = tpu.bitcast %156 : vector<1x128xf32> -> vector<1x128xi32>
    %c-128_i32_40 = arith.constant -128 : i32
    %158 = vector.broadcast %c-128_i32_40 : i32 to vector<1x128xi32>
    %159 = arith.andi %157, %158 : vector<1x128xi32>
    %160 = arith.ori %159, %0 : vector<1x128xi32>
    %161 = vector.shape_cast %160 : vector<1x128xi32> to vector<1x1x128xi32>
    %cst_41 = arith.constant dense<2147483647> : vector<1xi32>
    %162 = vector.multi_reduction <minsi>, %161, %cst_41 [1, 2] : vector<1x1x128xi32> to vector<1xi32>
    %163 = vector.shape_cast %162 : vector<1xi32> to vector<1x1x1xi32>
    %164 = vector.extract %163[0, 0, 0] : i32 from vector<1x1x1xi32>
    %c127_i32_42 = arith.constant 127 : i32
    %165 = arith.andi %164, %c127_i32_42 : i32
    %166 = vector.shape_cast %156 : vector<1x128xf32> to vector<1x1x128xf32>
    %cst_43 = arith.constant dense<0x7F800000> : vector<1xf32>
    %167 = vector.multi_reduction <minimumf>, %166, %cst_43 [1, 2] : vector<1x1x128xf32> to vector<1xf32>
    %168 = vector.shape_cast %167 : vector<1xf32> to vector<1x1x1xf32>
    %169 = vector.extract %168[0, 0, 0] : f32 from vector<1x1x1xf32>
    %cst_44 = arith.constant 0.000000e+00 : f32
    %170 = arith.maximumf %169, %cst_44 : f32
    %171 = math.sqrt %170 : f32
    %c4_i32 = arith.constant 4 : i32
    %172 = vector.broadcast %c4_i32 : i32 to vector<1x128xi32>
    %173 = arith.cmpi eq, %0, %172 : vector<1x128xi32>
    %cst_45 = arith.constant 0.000000e+00 : f32
    %174 = vector.broadcast %171 : f32 to vector<1x128xf32>
    %175 = vector.broadcast %cst_45 : f32 to vector<1x128xf32>
    %176 = arith.select %173, %174, %175 : vector<1x128xi1>, vector<1x128xf32>
    %177 = arith.addf %148, %176 : vector<1x128xf32>
    %178 = vector.broadcast %165 : i32 to vector<1x128xi32>
    %179 = arith.cmpi eq, %0, %178 : vector<1x128xi32>
    %180 = arith.ori %151, %179 : vector<1x128xi1>
    %181 = arith.index_cast %165 : i32 to index
    %c0_46 = arith.constant 0 : index
    %182 = vector.load %arg4[%181, %c0_46] : memref<128x128xf32, #tpu.memory_space<vmem>>, vector<1x128xf32>
    %183 = arith.minimumf %156, %182 : vector<1x128xf32>
    %cst_47 = arith.constant 1.000000e+30 : f32
    %184 = vector.broadcast %cst_47 : f32 to vector<1x128xf32>
    %185 = arith.select %180, %184, %183 : vector<1x128xi1>, vector<1x128xf32>
    %186 = tpu.bitcast %185 : vector<1x128xf32> -> vector<1x128xi32>
    %c-128_i32_48 = arith.constant -128 : i32
    %187 = vector.broadcast %c-128_i32_48 : i32 to vector<1x128xi32>
    %188 = arith.andi %186, %187 : vector<1x128xi32>
    %189 = arith.ori %188, %0 : vector<1x128xi32>
    %190 = vector.shape_cast %189 : vector<1x128xi32> to vector<1x1x128xi32>
    %cst_49 = arith.constant dense<2147483647> : vector<1xi32>
    %191 = vector.multi_reduction <minsi>, %190, %cst_49 [1, 2] : vector<1x1x128xi32> to vector<1xi32>
    %192 = vector.shape_cast %191 : vector<1xi32> to vector<1x1x1xi32>
    %193 = vector.extract %192[0, 0, 0] : i32 from vector<1x1x1xi32>
    %c127_i32_50 = arith.constant 127 : i32
    %194 = arith.andi %193, %c127_i32_50 : i32
    %195 = vector.shape_cast %185 : vector<1x128xf32> to vector<1x1x128xf32>
    %cst_51 = arith.constant dense<0x7F800000> : vector<1xf32>
    %196 = vector.multi_reduction <minimumf>, %195, %cst_51 [1, 2] : vector<1x1x128xf32> to vector<1xf32>
    %197 = vector.shape_cast %196 : vector<1xf32> to vector<1x1x1xf32>
    %198 = vector.extract %197[0, 0, 0] : f32 from vector<1x1x1xf32>
    %cst_52 = arith.constant 0.000000e+00 : f32
    %199 = arith.maximumf %198, %cst_52 : f32
    %200 = math.sqrt %199 : f32
    %c5_i32 = arith.constant 5 : i32
    %201 = vector.broadcast %c5_i32 : i32 to vector<1x128xi32>
    %202 = arith.cmpi eq, %0, %201 : vector<1x128xi32>
    %cst_53 = arith.constant 0.000000e+00 : f32
    %203 = vector.broadcast %200 : f32 to vector<1x128xf32>
    %204 = vector.broadcast %cst_53 : f32 to vector<1x128xf32>
    %205 = arith.select %202, %203, %204 : vector<1x128xi1>, vector<1x128xf32>
    %206 = arith.addf %177, %205 : vector<1x128xf32>
    %207 = vector.broadcast %194 : i32 to vector<1x128xi32>
    %208 = arith.cmpi eq, %0, %207 : vector<1x128xi32>
    %209 = arith.ori %180, %208 : vector<1x128xi1>
    %210 = arith.index_cast %194 : i32 to index
    %c0_54 = arith.constant 0 : index
    %211 = vector.load %arg4[%210, %c0_54] : memref<128x128xf32, #tpu.memory_space<vmem>>, vector<1x128xf32>
    %212 = arith.minimumf %185, %211 : vector<1x128xf32>
    %cst_55 = arith.constant 1.000000e+30 : f32
    %213 = vector.broadcast %cst_55 : f32 to vector<1x128xf32>
    %214 = arith.select %209, %213, %212 : vector<1x128xi1>, vector<1x128xf32>
    %215 = tpu.bitcast %214 : vector<1x128xf32> -> vector<1x128xi32>
    %c-128_i32_56 = arith.constant -128 : i32
    %216 = vector.broadcast %c-128_i32_56 : i32 to vector<1x128xi32>
    %217 = arith.andi %215, %216 : vector<1x128xi32>
    %218 = arith.ori %217, %0 : vector<1x128xi32>
    %219 = vector.shape_cast %218 : vector<1x128xi32> to vector<1x1x128xi32>
    %cst_57 = arith.constant dense<2147483647> : vector<1xi32>
    %220 = vector.multi_reduction <minsi>, %219, %cst_57 [1, 2] : vector<1x1x128xi32> to vector<1xi32>
    %221 = vector.shape_cast %220 : vector<1xi32> to vector<1x1x1xi32>
    %222 = vector.extract %221[0, 0, 0] : i32 from vector<1x1x1xi32>
    %c127_i32_58 = arith.constant 127 : i32
    %223 = arith.andi %222, %c127_i32_58 : i32
    %224 = vector.shape_cast %214 : vector<1x128xf32> to vector<1x1x128xf32>
    %cst_59 = arith.constant dense<0x7F800000> : vector<1xf32>
    %225 = vector.multi_reduction <minimumf>, %224, %cst_59 [1, 2] : vector<1x1x128xf32> to vector<1xf32>
    %226 = vector.shape_cast %225 : vector<1xf32> to vector<1x1x1xf32>
    %227 = vector.extract %226[0, 0, 0] : f32 from vector<1x1x1xf32>
    %cst_60 = arith.constant 0.000000e+00 : f32
    %228 = arith.maximumf %227, %cst_60 : f32
    %229 = math.sqrt %228 : f32
    %c6_i32 = arith.constant 6 : i32
    %230 = vector.broadcast %c6_i32 : i32 to vector<1x128xi32>
    %231 = arith.cmpi eq, %0, %230 : vector<1x128xi32>
    %cst_61 = arith.constant 0.000000e+00 : f32
    %232 = vector.broadcast %229 : f32 to vector<1x128xf32>
    %233 = vector.broadcast %cst_61 : f32 to vector<1x128xf32>
    %234 = arith.select %231, %232, %233 : vector<1x128xi1>, vector<1x128xf32>
    %235 = arith.addf %206, %234 : vector<1x128xf32>
    %236 = vector.broadcast %223 : i32 to vector<1x128xi32>
    %237 = arith.cmpi eq, %0, %236 : vector<1x128xi32>
    %238 = arith.ori %209, %237 : vector<1x128xi1>
    %239 = arith.index_cast %223 : i32 to index
    %c0_62 = arith.constant 0 : index
    %240 = vector.load %arg4[%239, %c0_62] : memref<128x128xf32, #tpu.memory_space<vmem>>, vector<1x128xf32>
    %241 = arith.minimumf %214, %240 : vector<1x128xf32>
    %cst_63 = arith.constant 1.000000e+30 : f32
    %242 = vector.broadcast %cst_63 : f32 to vector<1x128xf32>
    %243 = arith.select %238, %242, %241 : vector<1x128xi1>, vector<1x128xf32>
    %244 = tpu.bitcast %243 : vector<1x128xf32> -> vector<1x128xi32>
    %c-128_i32_64 = arith.constant -128 : i32
    %245 = vector.broadcast %c-128_i32_64 : i32 to vector<1x128xi32>
    %246 = arith.andi %244, %245 : vector<1x128xi32>
    %247 = arith.ori %246, %0 : vector<1x128xi32>
    %248 = vector.shape_cast %247 : vector<1x128xi32> to vector<1x1x128xi32>
    %cst_65 = arith.constant dense<2147483647> : vector<1xi32>
    %249 = vector.multi_reduction <minsi>, %248, %cst_65 [1, 2] : vector<1x1x128xi32> to vector<1xi32>
    %250 = vector.shape_cast %249 : vector<1xi32> to vector<1x1x1xi32>
    %251 = vector.extract %250[0, 0, 0] : i32 from vector<1x1x1xi32>
    %c127_i32_66 = arith.constant 127 : i32
    %252 = arith.andi %251, %c127_i32_66 : i32
    %253 = vector.shape_cast %243 : vector<1x128xf32> to vector<1x1x128xf32>
    %cst_67 = arith.constant dense<0x7F800000> : vector<1xf32>
    %254 = vector.multi_reduction <minimumf>, %253, %cst_67 [1, 2] : vector<1x1x128xf32> to vector<1xf32>
    %255 = vector.shape_cast %254 : vector<1xf32> to vector<1x1x1xf32>
    %256 = vector.extract %255[0, 0, 0] : f32 from vector<1x1x1xf32>
    %cst_68 = arith.constant 0.000000e+00 : f32
    %257 = arith.maximumf %256, %cst_68 : f32
    %258 = math.sqrt %257 : f32
    %c7_i32 = arith.constant 7 : i32
    %259 = vector.broadcast %c7_i32 : i32 to vector<1x128xi32>
    %260 = arith.cmpi eq, %0, %259 : vector<1x128xi32>
    %cst_69 = arith.constant 0.000000e+00 : f32
    %261 = vector.broadcast %258 : f32 to vector<1x128xf32>
    %262 = vector.broadcast %cst_69 : f32 to vector<1x128xf32>
    %263 = arith.select %260, %261, %262 : vector<1x128xi1>, vector<1x128xf32>
    %264 = arith.addf %235, %263 : vector<1x128xf32>
    %265 = vector.broadcast %252 : i32 to vector<1x128xi32>
    %266 = arith.cmpi eq, %0, %265 : vector<1x128xi32>
    %267 = arith.ori %238, %266 : vector<1x128xi1>
    %268 = arith.index_cast %252 : i32 to index
    %c0_70 = arith.constant 0 : index
    %269 = vector.load %arg4[%268, %c0_70] : memref<128x128xf32, #tpu.memory_space<vmem>>, vector<1x128xf32>
    %270 = arith.minimumf %243, %269 : vector<1x128xf32>
    %cst_71 = arith.constant 1.000000e+30 : f32
    %271 = vector.broadcast %cst_71 : f32 to vector<1x128xf32>
    %272 = arith.select %267, %271, %270 : vector<1x128xi1>, vector<1x128xf32>
    %273 = tpu.bitcast %272 : vector<1x128xf32> -> vector<1x128xi32>
    %c-128_i32_72 = arith.constant -128 : i32
    %274 = vector.broadcast %c-128_i32_72 : i32 to vector<1x128xi32>
    %275 = arith.andi %273, %274 : vector<1x128xi32>
    %276 = arith.ori %275, %0 : vector<1x128xi32>
    %277 = vector.shape_cast %276 : vector<1x128xi32> to vector<1x1x128xi32>
    %cst_73 = arith.constant dense<2147483647> : vector<1xi32>
    %278 = vector.multi_reduction <minsi>, %277, %cst_73 [1, 2] : vector<1x1x128xi32> to vector<1xi32>
    %279 = vector.shape_cast %278 : vector<1xi32> to vector<1x1x1xi32>
    %280 = vector.extract %279[0, 0, 0] : i32 from vector<1x1x1xi32>
    %c127_i32_74 = arith.constant 127 : i32
    %281 = arith.andi %280, %c127_i32_74 : i32
    %282 = vector.shape_cast %272 : vector<1x128xf32> to vector<1x1x128xf32>
    %cst_75 = arith.constant dense<0x7F800000> : vector<1xf32>
    %283 = vector.multi_reduction <minimumf>, %282, %cst_75 [1, 2] : vector<1x1x128xf32> to vector<1xf32>
    %284 = vector.shape_cast %283 : vector<1xf32> to vector<1x1x1xf32>
    %285 = vector.extract %284[0, 0, 0] : f32 from vector<1x1x1xf32>
    %cst_76 = arith.constant 0.000000e+00 : f32
    %286 = arith.maximumf %285, %cst_76 : f32
    %287 = math.sqrt %286 : f32
    %c8_i32 = arith.constant 8 : i32
    %288 = vector.broadcast %c8_i32 : i32 to vector<1x128xi32>
    %289 = arith.cmpi eq, %0, %288 : vector<1x128xi32>
    %cst_77 = arith.constant 0.000000e+00 : f32
    %290 = vector.broadcast %287 : f32 to vector<1x128xf32>
    %291 = vector.broadcast %cst_77 : f32 to vector<1x128xf32>
    %292 = arith.select %289, %290, %291 : vector<1x128xi1>, vector<1x128xf32>
    %293 = arith.addf %264, %292 : vector<1x128xf32>
    %294 = vector.broadcast %281 : i32 to vector<1x128xi32>
    %295 = arith.cmpi eq, %0, %294 : vector<1x128xi32>
    %296 = arith.ori %267, %295 : vector<1x128xi1>
    %297 = arith.index_cast %281 : i32 to index
    %c0_78 = arith.constant 0 : index
    %298 = vector.load %arg4[%297, %c0_78] : memref<128x128xf32, #tpu.memory_space<vmem>>, vector<1x128xf32>
    %299 = arith.minimumf %272, %298 : vector<1x128xf32>
    %cst_79 = arith.constant 1.000000e+30 : f32
    %300 = vector.broadcast %cst_79 : f32 to vector<1x128xf32>
    %301 = arith.select %296, %300, %299 : vector<1x128xi1>, vector<1x128xf32>
    %302 = tpu.bitcast %301 : vector<1x128xf32> -> vector<1x128xi32>
    %c-128_i32_80 = arith.constant -128 : i32
    %303 = vector.broadcast %c-128_i32_80 : i32 to vector<1x128xi32>
    %304 = arith.andi %302, %303 : vector<1x128xi32>
    %305 = arith.ori %304, %0 : vector<1x128xi32>
    %306 = vector.shape_cast %305 : vector<1x128xi32> to vector<1x1x128xi32>
    %cst_81 = arith.constant dense<2147483647> : vector<1xi32>
    %307 = vector.multi_reduction <minsi>, %306, %cst_81 [1, 2] : vector<1x1x128xi32> to vector<1xi32>
    %308 = vector.shape_cast %307 : vector<1xi32> to vector<1x1x1xi32>
    %309 = vector.extract %308[0, 0, 0] : i32 from vector<1x1x1xi32>
    %c127_i32_82 = arith.constant 127 : i32
    %310 = arith.andi %309, %c127_i32_82 : i32
    %311 = vector.shape_cast %301 : vector<1x128xf32> to vector<1x1x128xf32>
    %cst_83 = arith.constant dense<0x7F800000> : vector<1xf32>
    %312 = vector.multi_reduction <minimumf>, %311, %cst_83 [1, 2] : vector<1x1x128xf32> to vector<1xf32>
    %313 = vector.shape_cast %312 : vector<1xf32> to vector<1x1x1xf32>
    %314 = vector.extract %313[0, 0, 0] : f32 from vector<1x1x1xf32>
    %cst_84 = arith.constant 0.000000e+00 : f32
    %315 = arith.maximumf %314, %cst_84 : f32
    %316 = math.sqrt %315 : f32
    %c9_i32 = arith.constant 9 : i32
    %317 = vector.broadcast %c9_i32 : i32 to vector<1x128xi32>
    %318 = arith.cmpi eq, %0, %317 : vector<1x128xi32>
    %cst_85 = arith.constant 0.000000e+00 : f32
    %319 = vector.broadcast %316 : f32 to vector<1x128xf32>
    %320 = vector.broadcast %cst_85 : f32 to vector<1x128xf32>
    %321 = arith.select %318, %319, %320 : vector<1x128xi1>, vector<1x128xf32>
    %322 = arith.addf %293, %321 : vector<1x128xf32>
    %323 = vector.broadcast %310 : i32 to vector<1x128xi32>
    %324 = arith.cmpi eq, %0, %323 : vector<1x128xi32>
    %325 = arith.ori %296, %324 : vector<1x128xi1>
    %326 = arith.index_cast %310 : i32 to index
    %c0_86 = arith.constant 0 : index
    %327 = vector.load %arg4[%326, %c0_86] : memref<128x128xf32, #tpu.memory_space<vmem>>, vector<1x128xf32>
    %328 = arith.minimumf %301, %327 : vector<1x128xf32>
    %cst_87 = arith.constant 1.000000e+30 : f32
    %329 = vector.broadcast %cst_87 : f32 to vector<1x128xf32>
    %330 = arith.select %325, %329, %328 : vector<1x128xi1>, vector<1x128xf32>
    %331 = tpu.bitcast %330 : vector<1x128xf32> -> vector<1x128xi32>
    %c-128_i32_88 = arith.constant -128 : i32
    %332 = vector.broadcast %c-128_i32_88 : i32 to vector<1x128xi32>
    %333 = arith.andi %331, %332 : vector<1x128xi32>
    %334 = arith.ori %333, %0 : vector<1x128xi32>
    %335 = vector.shape_cast %334 : vector<1x128xi32> to vector<1x1x128xi32>
    %cst_89 = arith.constant dense<2147483647> : vector<1xi32>
    %336 = vector.multi_reduction <minsi>, %335, %cst_89 [1, 2] : vector<1x1x128xi32> to vector<1xi32>
    %337 = vector.shape_cast %336 : vector<1xi32> to vector<1x1x1xi32>
    %338 = vector.extract %337[0, 0, 0] : i32 from vector<1x1x1xi32>
    %c127_i32_90 = arith.constant 127 : i32
    %339 = arith.andi %338, %c127_i32_90 : i32
    %340 = vector.shape_cast %330 : vector<1x128xf32> to vector<1x1x128xf32>
    %cst_91 = arith.constant dense<0x7F800000> : vector<1xf32>
    %341 = vector.multi_reduction <minimumf>, %340, %cst_91 [1, 2] : vector<1x1x128xf32> to vector<1xf32>
    %342 = vector.shape_cast %341 : vector<1xf32> to vector<1x1x1xf32>
    %343 = vector.extract %342[0, 0, 0] : f32 from vector<1x1x1xf32>
    %cst_92 = arith.constant 0.000000e+00 : f32
    %344 = arith.maximumf %343, %cst_92 : f32
    %345 = math.sqrt %344 : f32
    %c10_i32 = arith.constant 10 : i32
    %346 = vector.broadcast %c10_i32 : i32 to vector<1x128xi32>
    %347 = arith.cmpi eq, %0, %346 : vector<1x128xi32>
    %cst_93 = arith.constant 0.000000e+00 : f32
    %348 = vector.broadcast %345 : f32 to vector<1x128xf32>
    %349 = vector.broadcast %cst_93 : f32 to vector<1x128xf32>
    %350 = arith.select %347, %348, %349 : vector<1x128xi1>, vector<1x128xf32>
    %351 = arith.addf %322, %350 : vector<1x128xf32>
    %352 = vector.broadcast %339 : i32 to vector<1x128xi32>
    %353 = arith.cmpi eq, %0, %352 : vector<1x128xi32>
    %354 = arith.ori %325, %353 : vector<1x128xi1>
    %355 = arith.index_cast %339 : i32 to index
    %c0_94 = arith.constant 0 : index
    %356 = vector.load %arg4[%355, %c0_94] : memref<128x128xf32, #tpu.memory_space<vmem>>, vector<1x128xf32>
    %357 = arith.minimumf %330, %356 : vector<1x128xf32>
    %cst_95 = arith.constant 1.000000e+30 : f32
    %358 = vector.broadcast %cst_95 : f32 to vector<1x128xf32>
    %359 = arith.select %354, %358, %357 : vector<1x128xi1>, vector<1x128xf32>
    %360 = tpu.bitcast %359 : vector<1x128xf32> -> vector<1x128xi32>
    %c-128_i32_96 = arith.constant -128 : i32
    %361 = vector.broadcast %c-128_i32_96 : i32 to vector<1x128xi32>
    %362 = arith.andi %360, %361 : vector<1x128xi32>
    %363 = arith.ori %362, %0 : vector<1x128xi32>
    %364 = vector.shape_cast %363 : vector<1x128xi32> to vector<1x1x128xi32>
    %cst_97 = arith.constant dense<2147483647> : vector<1xi32>
    %365 = vector.multi_reduction <minsi>, %364, %cst_97 [1, 2] : vector<1x1x128xi32> to vector<1xi32>
    %366 = vector.shape_cast %365 : vector<1xi32> to vector<1x1x1xi32>
    %367 = vector.extract %366[0, 0, 0] : i32 from vector<1x1x1xi32>
    %c127_i32_98 = arith.constant 127 : i32
    %368 = arith.andi %367, %c127_i32_98 : i32
    %369 = vector.shape_cast %359 : vector<1x128xf32> to vector<1x1x128xf32>
    %cst_99 = arith.constant dense<0x7F800000> : vector<1xf32>
    %370 = vector.multi_reduction <minimumf>, %369, %cst_99 [1, 2] : vector<1x1x128xf32> to vector<1xf32>
    %371 = vector.shape_cast %370 : vector<1xf32> to vector<1x1x1xf32>
    %372 = vector.extract %371[0, 0, 0] : f32 from vector<1x1x1xf32>
    %cst_100 = arith.constant 0.000000e+00 : f32
    %373 = arith.maximumf %372, %cst_100 : f32
    %374 = math.sqrt %373 : f32
    %c11_i32 = arith.constant 11 : i32
    %375 = vector.broadcast %c11_i32 : i32 to vector<1x128xi32>
    %376 = arith.cmpi eq, %0, %375 : vector<1x128xi32>
    %cst_101 = arith.constant 0.000000e+00 : f32
    %377 = vector.broadcast %374 : f32 to vector<1x128xf32>
    %378 = vector.broadcast %cst_101 : f32 to vector<1x128xf32>
    %379 = arith.select %376, %377, %378 : vector<1x128xi1>, vector<1x128xf32>
    %380 = arith.addf %351, %379 : vector<1x128xf32>
    %381 = vector.broadcast %368 : i32 to vector<1x128xi32>
    %382 = arith.cmpi eq, %0, %381 : vector<1x128xi32>
    %383 = arith.ori %354, %382 : vector<1x128xi1>
    %384 = arith.index_cast %368 : i32 to index
    %c0_102 = arith.constant 0 : index
    %385 = vector.load %arg4[%384, %c0_102] : memref<128x128xf32, #tpu.memory_space<vmem>>, vector<1x128xf32>
    %386 = arith.minimumf %359, %385 : vector<1x128xf32>
    %cst_103 = arith.constant 1.000000e+30 : f32
    %387 = vector.broadcast %cst_103 : f32 to vector<1x128xf32>
    %388 = arith.select %383, %387, %386 : vector<1x128xi1>, vector<1x128xf32>
    %389 = tpu.bitcast %388 : vector<1x128xf32> -> vector<1x128xi32>
    %c-128_i32_104 = arith.constant -128 : i32
    %390 = vector.broadcast %c-128_i32_104 : i32 to vector<1x128xi32>
    %391 = arith.andi %389, %390 : vector<1x128xi32>
    %392 = arith.ori %391, %0 : vector<1x128xi32>
    %393 = vector.shape_cast %392 : vector<1x128xi32> to vector<1x1x128xi32>
    %cst_105 = arith.constant dense<2147483647> : vector<1xi32>
    %394 = vector.multi_reduction <minsi>, %393, %cst_105 [1, 2] : vector<1x1x128xi32> to vector<1xi32>
    %395 = vector.shape_cast %394 : vector<1xi32> to vector<1x1x1xi32>
    %396 = vector.extract %395[0, 0, 0] : i32 from vector<1x1x1xi32>
    %c127_i32_106 = arith.constant 127 : i32
    %397 = arith.andi %396, %c127_i32_106 : i32
    %398 = vector.shape_cast %388 : vector<1x128xf32> to vector<1x1x128xf32>
    %cst_107 = arith.constant dense<0x7F800000> : vector<1xf32>
    %399 = vector.multi_reduction <minimumf>, %398, %cst_107 [1, 2] : vector<1x1x128xf32> to vector<1xf32>
    %400 = vector.shape_cast %399 : vector<1xf32> to vector<1x1x1xf32>
    %401 = vector.extract %400[0, 0, 0] : f32 from vector<1x1x1xf32>
    %cst_108 = arith.constant 0.000000e+00 : f32
    %402 = arith.maximumf %401, %cst_108 : f32
    %403 = math.sqrt %402 : f32
    %c12_i32 = arith.constant 12 : i32
    %404 = vector.broadcast %c12_i32 : i32 to vector<1x128xi32>
    %405 = arith.cmpi eq, %0, %404 : vector<1x128xi32>
    %cst_109 = arith.constant 0.000000e+00 : f32
    %406 = vector.broadcast %403 : f32 to vector<1x128xf32>
    %407 = vector.broadcast %cst_109 : f32 to vector<1x128xf32>
    %408 = arith.select %405, %406, %407 : vector<1x128xi1>, vector<1x128xf32>
    %409 = arith.addf %380, %408 : vector<1x128xf32>
    %410 = vector.broadcast %397 : i32 to vector<1x128xi32>
    %411 = arith.cmpi eq, %0, %410 : vector<1x128xi32>
    %412 = arith.ori %383, %411 : vector<1x128xi1>
    %413 = arith.index_cast %397 : i32 to index
    %c0_110 = arith.constant 0 : index
    %414 = vector.load %arg4[%413, %c0_110] : memref<128x128xf32, #tpu.memory_space<vmem>>, vector<1x128xf32>
    %415 = arith.minimumf %388, %414 : vector<1x128xf32>
    %cst_111 = arith.constant 1.000000e+30 : f32
    %416 = vector.broadcast %cst_111 : f32 to vector<1x128xf32>
    %417 = arith.select %412, %416, %415 : vector<1x128xi1>, vector<1x128xf32>
    %418 = tpu.bitcast %417 : vector<1x128xf32> -> vector<1x128xi32>
    %c-128_i32_112 = arith.constant -128 : i32
    %419 = vector.broadcast %c-128_i32_112 : i32 to vector<1x128xi32>
    %420 = arith.andi %418, %419 : vector<1x128xi32>
    %421 = arith.ori %420, %0 : vector<1x128xi32>
    %422 = vector.shape_cast %421 : vector<1x128xi32> to vector<1x1x128xi32>
    %cst_113 = arith.constant dense<2147483647> : vector<1xi32>
    %423 = vector.multi_reduction <minsi>, %422, %cst_113 [1, 2] : vector<1x1x128xi32> to vector<1xi32>
    %424 = vector.shape_cast %423 : vector<1xi32> to vector<1x1x1xi32>
    %425 = vector.extract %424[0, 0, 0] : i32 from vector<1x1x1xi32>
    %c127_i32_114 = arith.constant 127 : i32
    %426 = arith.andi %425, %c127_i32_114 : i32
    %427 = vector.shape_cast %417 : vector<1x128xf32> to vector<1x1x128xf32>
    %cst_115 = arith.constant dense<0x7F800000> : vector<1xf32>
    %428 = vector.multi_reduction <minimumf>, %427, %cst_115 [1, 2] : vector<1x1x128xf32> to vector<1xf32>
    %429 = vector.shape_cast %428 : vector<1xf32> to vector<1x1x1xf32>
    %430 = vector.extract %429[0, 0, 0] : f32 from vector<1x1x1xf32>
    %cst_116 = arith.constant 0.000000e+00 : f32
    %431 = arith.maximumf %430, %cst_116 : f32
    %432 = math.sqrt %431 : f32
    %c13_i32 = arith.constant 13 : i32
    %433 = vector.broadcast %c13_i32 : i32 to vector<1x128xi32>
    %434 = arith.cmpi eq, %0, %433 : vector<1x128xi32>
    %cst_117 = arith.constant 0.000000e+00 : f32
    %435 = vector.broadcast %432 : f32 to vector<1x128xf32>
    %436 = vector.broadcast %cst_117 : f32 to vector<1x128xf32>
    %437 = arith.select %434, %435, %436 : vector<1x128xi1>, vector<1x128xf32>
    %438 = arith.addf %409, %437 : vector<1x128xf32>
    %439 = vector.broadcast %426 : i32 to vector<1x128xi32>
    %440 = arith.cmpi eq, %0, %439 : vector<1x128xi32>
    %441 = arith.ori %412, %440 : vector<1x128xi1>
    %442 = arith.index_cast %426 : i32 to index
    %c0_118 = arith.constant 0 : index
    %443 = vector.load %arg4[%442, %c0_118] : memref<128x128xf32, #tpu.memory_space<vmem>>, vector<1x128xf32>
    %444 = arith.minimumf %417, %443 : vector<1x128xf32>
    %cst_119 = arith.constant 1.000000e+30 : f32
    %445 = vector.broadcast %cst_119 : f32 to vector<1x128xf32>
    %446 = arith.select %441, %445, %444 : vector<1x128xi1>, vector<1x128xf32>
    %447 = tpu.bitcast %446 : vector<1x128xf32> -> vector<1x128xi32>
    %c-128_i32_120 = arith.constant -128 : i32
    %448 = vector.broadcast %c-128_i32_120 : i32 to vector<1x128xi32>
    %449 = arith.andi %447, %448 : vector<1x128xi32>
    %450 = arith.ori %449, %0 : vector<1x128xi32>
    %451 = vector.shape_cast %450 : vector<1x128xi32> to vector<1x1x128xi32>
    %cst_121 = arith.constant dense<2147483647> : vector<1xi32>
    %452 = vector.multi_reduction <minsi>, %451, %cst_121 [1, 2] : vector<1x1x128xi32> to vector<1xi32>
    %453 = vector.shape_cast %452 : vector<1xi32> to vector<1x1x1xi32>
    %454 = vector.extract %453[0, 0, 0] : i32 from vector<1x1x1xi32>
    %c127_i32_122 = arith.constant 127 : i32
    %455 = arith.andi %454, %c127_i32_122 : i32
    %456 = vector.shape_cast %446 : vector<1x128xf32> to vector<1x1x128xf32>
    %cst_123 = arith.constant dense<0x7F800000> : vector<1xf32>
    %457 = vector.multi_reduction <minimumf>, %456, %cst_123 [1, 2] : vector<1x1x128xf32> to vector<1xf32>
    %458 = vector.shape_cast %457 : vector<1xf32> to vector<1x1x1xf32>
    %459 = vector.extract %458[0, 0, 0] : f32 from vector<1x1x1xf32>
    %cst_124 = arith.constant 0.000000e+00 : f32
    %460 = arith.maximumf %459, %cst_124 : f32
    %461 = math.sqrt %460 : f32
    %c14_i32 = arith.constant 14 : i32
    %462 = vector.broadcast %c14_i32 : i32 to vector<1x128xi32>
    %463 = arith.cmpi eq, %0, %462 : vector<1x128xi32>
    %cst_125 = arith.constant 0.000000e+00 : f32
    %464 = vector.broadcast %461 : f32 to vector<1x128xf32>
    %465 = vector.broadcast %cst_125 : f32 to vector<1x128xf32>
    %466 = arith.select %463, %464, %465 : vector<1x128xi1>, vector<1x128xf32>
    %467 = arith.addf %438, %466 : vector<1x128xf32>
    %468 = vector.broadcast %455 : i32 to vector<1x128xi32>
    %469 = arith.cmpi eq, %0, %468 : vector<1x128xi32>
    %470 = arith.ori %441, %469 : vector<1x128xi1>
    %471 = arith.index_cast %455 : i32 to index
    %c0_126 = arith.constant 0 : index
    %472 = vector.load %arg4[%471, %c0_126] : memref<128x128xf32, #tpu.memory_space<vmem>>, vector<1x128xf32>
    %473 = arith.minimumf %446, %472 : vector<1x128xf32>
    %cst_127 = arith.constant 1.000000e+30 : f32
    %474 = vector.broadcast %cst_127 : f32 to vector<1x128xf32>
    %475 = arith.select %470, %474, %473 : vector<1x128xi1>, vector<1x128xf32>
    %476 = tpu.bitcast %475 : vector<1x128xf32> -> vector<1x128xi32>
    %c-128_i32_128 = arith.constant -128 : i32
    %477 = vector.broadcast %c-128_i32_128 : i32 to vector<1x128xi32>
    %478 = arith.andi %476, %477 : vector<1x128xi32>
    %479 = arith.ori %478, %0 : vector<1x128xi32>
    %480 = vector.shape_cast %479 : vector<1x128xi32> to vector<1x1x128xi32>
    %cst_129 = arith.constant dense<2147483647> : vector<1xi32>
    %481 = vector.multi_reduction <minsi>, %480, %cst_129 [1, 2] : vector<1x1x128xi32> to vector<1xi32>
    %482 = vector.shape_cast %481 : vector<1xi32> to vector<1x1x1xi32>
    %483 = vector.extract %482[0, 0, 0] : i32 from vector<1x1x1xi32>
    %c127_i32_130 = arith.constant 127 : i32
    %484 = arith.andi %483, %c127_i32_130 : i32
    %485 = vector.shape_cast %475 : vector<1x128xf32> to vector<1x1x128xf32>
    %cst_131 = arith.constant dense<0x7F800000> : vector<1xf32>
    %486 = vector.multi_reduction <minimumf>, %485, %cst_131 [1, 2] : vector<1x1x128xf32> to vector<1xf32>
    %487 = vector.shape_cast %486 : vector<1xf32> to vector<1x1x1xf32>
    %488 = vector.extract %487[0, 0, 0] : f32 from vector<1x1x1xf32>
    %cst_132 = arith.constant 0.000000e+00 : f32
    %489 = arith.maximumf %488, %cst_132 : f32
    %490 = math.sqrt %489 : f32
    %c15_i32 = arith.constant 15 : i32
    %491 = vector.broadcast %c15_i32 : i32 to vector<1x128xi32>
    %492 = arith.cmpi eq, %0, %491 : vector<1x128xi32>
    %cst_133 = arith.constant 0.000000e+00 : f32
    %493 = vector.broadcast %490 : f32 to vector<1x128xf32>
    %494 = vector.broadcast %cst_133 : f32 to vector<1x128xf32>
    %495 = arith.select %492, %493, %494 : vector<1x128xi1>, vector<1x128xf32>
    %496 = arith.addf %467, %495 : vector<1x128xf32>
    %497 = vector.broadcast %484 : i32 to vector<1x128xi32>
    %498 = arith.cmpi eq, %0, %497 : vector<1x128xi32>
    %499 = arith.ori %470, %498 : vector<1x128xi1>
    %500 = arith.index_cast %484 : i32 to index
    %c0_134 = arith.constant 0 : index
    %501 = vector.load %arg4[%500, %c0_134] : memref<128x128xf32, #tpu.memory_space<vmem>>, vector<1x128xf32>
    %502 = arith.minimumf %475, %501 : vector<1x128xf32>
    %cst_135 = arith.constant 1.000000e+30 : f32
    %503 = vector.broadcast %cst_135 : f32 to vector<1x128xf32>
    %504 = arith.select %499, %503, %502 : vector<1x128xi1>, vector<1x128xf32>
    %505 = tpu.bitcast %504 : vector<1x128xf32> -> vector<1x128xi32>
    %c-128_i32_136 = arith.constant -128 : i32
    %506 = vector.broadcast %c-128_i32_136 : i32 to vector<1x128xi32>
    %507 = arith.andi %505, %506 : vector<1x128xi32>
    %508 = arith.ori %507, %0 : vector<1x128xi32>
    %509 = vector.shape_cast %508 : vector<1x128xi32> to vector<1x1x128xi32>
    %cst_137 = arith.constant dense<2147483647> : vector<1xi32>
    %510 = vector.multi_reduction <minsi>, %509, %cst_137 [1, 2] : vector<1x1x128xi32> to vector<1xi32>
    %511 = vector.shape_cast %510 : vector<1xi32> to vector<1x1x1xi32>
    %512 = vector.extract %511[0, 0, 0] : i32 from vector<1x1x1xi32>
    %c127_i32_138 = arith.constant 127 : i32
    %513 = arith.andi %512, %c127_i32_138 : i32
    %514 = vector.shape_cast %504 : vector<1x128xf32> to vector<1x1x128xf32>
    %cst_139 = arith.constant dense<0x7F800000> : vector<1xf32>
    %515 = vector.multi_reduction <minimumf>, %514, %cst_139 [1, 2] : vector<1x1x128xf32> to vector<1xf32>
    %516 = vector.shape_cast %515 : vector<1xf32> to vector<1x1x1xf32>
    %517 = vector.extract %516[0, 0, 0] : f32 from vector<1x1x1xf32>
    %cst_140 = arith.constant 0.000000e+00 : f32
    %518 = arith.maximumf %517, %cst_140 : f32
    %519 = math.sqrt %518 : f32
    %c16_i32 = arith.constant 16 : i32
    %520 = vector.broadcast %c16_i32 : i32 to vector<1x128xi32>
    %521 = arith.cmpi eq, %0, %520 : vector<1x128xi32>
    %cst_141 = arith.constant 0.000000e+00 : f32
    %522 = vector.broadcast %519 : f32 to vector<1x128xf32>
    %523 = vector.broadcast %cst_141 : f32 to vector<1x128xf32>
    %524 = arith.select %521, %522, %523 : vector<1x128xi1>, vector<1x128xf32>
    %525 = arith.addf %496, %524 : vector<1x128xf32>
    %526 = vector.broadcast %513 : i32 to vector<1x128xi32>
    %527 = arith.cmpi eq, %0, %526 : vector<1x128xi32>
    %528 = arith.ori %499, %527 : vector<1x128xi1>
    %529 = arith.index_cast %513 : i32 to index
    %c0_142 = arith.constant 0 : index
    %530 = vector.load %arg4[%529, %c0_142] : memref<128x128xf32, #tpu.memory_space<vmem>>, vector<1x128xf32>
    %531 = arith.minimumf %504, %530 : vector<1x128xf32>
    %cst_143 = arith.constant 1.000000e+30 : f32
    %532 = vector.broadcast %cst_143 : f32 to vector<1x128xf32>
    %533 = arith.select %528, %532, %531 : vector<1x128xi1>, vector<1x128xf32>
    %534 = tpu.bitcast %533 : vector<1x128xf32> -> vector<1x128xi32>
    %c-128_i32_144 = arith.constant -128 : i32
    %535 = vector.broadcast %c-128_i32_144 : i32 to vector<1x128xi32>
    %536 = arith.andi %534, %535 : vector<1x128xi32>
    %537 = arith.ori %536, %0 : vector<1x128xi32>
    %538 = vector.shape_cast %537 : vector<1x128xi32> to vector<1x1x128xi32>
    %cst_145 = arith.constant dense<2147483647> : vector<1xi32>
    %539 = vector.multi_reduction <minsi>, %538, %cst_145 [1, 2] : vector<1x1x128xi32> to vector<1xi32>
    %540 = vector.shape_cast %539 : vector<1xi32> to vector<1x1x1xi32>
    %541 = vector.extract %540[0, 0, 0] : i32 from vector<1x1x1xi32>
    %c127_i32_146 = arith.constant 127 : i32
    %542 = arith.andi %541, %c127_i32_146 : i32
    %543 = vector.shape_cast %533 : vector<1x128xf32> to vector<1x1x128xf32>
    %cst_147 = arith.constant dense<0x7F800000> : vector<1xf32>
    %544 = vector.multi_reduction <minimumf>, %543, %cst_147 [1, 2] : vector<1x1x128xf32> to vector<1xf32>
    %545 = vector.shape_cast %544 : vector<1xf32> to vector<1x1x1xf32>
    %546 = vector.extract %545[0, 0, 0] : f32 from vector<1x1x1xf32>
    %cst_148 = arith.constant 0.000000e+00 : f32
    %547 = arith.maximumf %546, %cst_148 : f32
    %548 = math.sqrt %547 : f32
    %c17_i32 = arith.constant 17 : i32
    %549 = vector.broadcast %c17_i32 : i32 to vector<1x128xi32>
    %550 = arith.cmpi eq, %0, %549 : vector<1x128xi32>
    %cst_149 = arith.constant 0.000000e+00 : f32
    %551 = vector.broadcast %548 : f32 to vector<1x128xf32>
    %552 = vector.broadcast %cst_149 : f32 to vector<1x128xf32>
    %553 = arith.select %550, %551, %552 : vector<1x128xi1>, vector<1x128xf32>
    %554 = arith.addf %525, %553 : vector<1x128xf32>
    %555 = vector.broadcast %542 : i32 to vector<1x128xi32>
    %556 = arith.cmpi eq, %0, %555 : vector<1x128xi32>
    %557 = arith.ori %528, %556 : vector<1x128xi1>
    %558 = arith.index_cast %542 : i32 to index
    %c0_150 = arith.constant 0 : index
    %559 = vector.load %arg4[%558, %c0_150] : memref<128x128xf32, #tpu.memory_space<vmem>>, vector<1x128xf32>
    %560 = arith.minimumf %533, %559 : vector<1x128xf32>
    %cst_151 = arith.constant 1.000000e+30 : f32
    %561 = vector.broadcast %cst_151 : f32 to vector<1x128xf32>
    %562 = arith.select %557, %561, %560 : vector<1x128xi1>, vector<1x128xf32>
    %563 = tpu.bitcast %562 : vector<1x128xf32> -> vector<1x128xi32>
    %c-128_i32_152 = arith.constant -128 : i32
    %564 = vector.broadcast %c-128_i32_152 : i32 to vector<1x128xi32>
    %565 = arith.andi %563, %564 : vector<1x128xi32>
    %566 = arith.ori %565, %0 : vector<1x128xi32>
    %567 = vector.shape_cast %566 : vector<1x128xi32> to vector<1x1x128xi32>
    %cst_153 = arith.constant dense<2147483647> : vector<1xi32>
    %568 = vector.multi_reduction <minsi>, %567, %cst_153 [1, 2] : vector<1x1x128xi32> to vector<1xi32>
    %569 = vector.shape_cast %568 : vector<1xi32> to vector<1x1x1xi32>
    %570 = vector.extract %569[0, 0, 0] : i32 from vector<1x1x1xi32>
    %c127_i32_154 = arith.constant 127 : i32
    %571 = arith.andi %570, %c127_i32_154 : i32
    %572 = vector.shape_cast %562 : vector<1x128xf32> to vector<1x1x128xf32>
    %cst_155 = arith.constant dense<0x7F800000> : vector<1xf32>
    %573 = vector.multi_reduction <minimumf>, %572, %cst_155 [1, 2] : vector<1x1x128xf32> to vector<1xf32>
    %574 = vector.shape_cast %573 : vector<1xf32> to vector<1x1x1xf32>
    %575 = vector.extract %574[0, 0, 0] : f32 from vector<1x1x1xf32>
    %cst_156 = arith.constant 0.000000e+00 : f32
    %576 = arith.maximumf %575, %cst_156 : f32
    %577 = math.sqrt %576 : f32
    %c18_i32 = arith.constant 18 : i32
    %578 = vector.broadcast %c18_i32 : i32 to vector<1x128xi32>
    %579 = arith.cmpi eq, %0, %578 : vector<1x128xi32>
    %cst_157 = arith.constant 0.000000e+00 : f32
    %580 = vector.broadcast %577 : f32 to vector<1x128xf32>
    %581 = vector.broadcast %cst_157 : f32 to vector<1x128xf32>
    %582 = arith.select %579, %580, %581 : vector<1x128xi1>, vector<1x128xf32>
    %583 = arith.addf %554, %582 : vector<1x128xf32>
    %584 = vector.broadcast %571 : i32 to vector<1x128xi32>
    %585 = arith.cmpi eq, %0, %584 : vector<1x128xi32>
    %586 = arith.ori %557, %585 : vector<1x128xi1>
    %587 = arith.index_cast %571 : i32 to index
    %c0_158 = arith.constant 0 : index
    %588 = vector.load %arg4[%587, %c0_158] : memref<128x128xf32, #tpu.memory_space<vmem>>, vector<1x128xf32>
    %589 = arith.minimumf %562, %588 : vector<1x128xf32>
    %cst_159 = arith.constant 1.000000e+30 : f32
    %590 = vector.broadcast %cst_159 : f32 to vector<1x128xf32>
    %591 = arith.select %586, %590, %589 : vector<1x128xi1>, vector<1x128xf32>
    %592 = tpu.bitcast %591 : vector<1x128xf32> -> vector<1x128xi32>
    %c-128_i32_160 = arith.constant -128 : i32
    %593 = vector.broadcast %c-128_i32_160 : i32 to vector<1x128xi32>
    %594 = arith.andi %592, %593 : vector<1x128xi32>
    %595 = arith.ori %594, %0 : vector<1x128xi32>
    %596 = vector.shape_cast %595 : vector<1x128xi32> to vector<1x1x128xi32>
    %cst_161 = arith.constant dense<2147483647> : vector<1xi32>
    %597 = vector.multi_reduction <minsi>, %596, %cst_161 [1, 2] : vector<1x1x128xi32> to vector<1xi32>
    %598 = vector.shape_cast %597 : vector<1xi32> to vector<1x1x1xi32>
    %599 = vector.extract %598[0, 0, 0] : i32 from vector<1x1x1xi32>
    %c127_i32_162 = arith.constant 127 : i32
    %600 = arith.andi %599, %c127_i32_162 : i32
    %601 = vector.shape_cast %591 : vector<1x128xf32> to vector<1x1x128xf32>
    %cst_163 = arith.constant dense<0x7F800000> : vector<1xf32>
    %602 = vector.multi_reduction <minimumf>, %601, %cst_163 [1, 2] : vector<1x1x128xf32> to vector<1xf32>
    %603 = vector.shape_cast %602 : vector<1xf32> to vector<1x1x1xf32>
    %604 = vector.extract %603[0, 0, 0] : f32 from vector<1x1x1xf32>
    %cst_164 = arith.constant 0.000000e+00 : f32
    %605 = arith.maximumf %604, %cst_164 : f32
    %606 = math.sqrt %605 : f32
    %c19_i32 = arith.constant 19 : i32
    %607 = vector.broadcast %c19_i32 : i32 to vector<1x128xi32>
    %608 = arith.cmpi eq, %0, %607 : vector<1x128xi32>
    %cst_165 = arith.constant 0.000000e+00 : f32
    %609 = vector.broadcast %606 : f32 to vector<1x128xf32>
    %610 = vector.broadcast %cst_165 : f32 to vector<1x128xf32>
    %611 = arith.select %608, %609, %610 : vector<1x128xi1>, vector<1x128xf32>
    %612 = arith.addf %583, %611 : vector<1x128xf32>
    %613 = vector.broadcast %600 : i32 to vector<1x128xi32>
    %614 = arith.cmpi eq, %0, %613 : vector<1x128xi32>
    %615 = arith.ori %586, %614 : vector<1x128xi1>
    %616 = arith.index_cast %600 : i32 to index
    %c0_166 = arith.constant 0 : index
    %617 = vector.load %arg4[%616, %c0_166] : memref<128x128xf32, #tpu.memory_space<vmem>>, vector<1x128xf32>
    %618 = arith.minimumf %591, %617 : vector<1x128xf32>
    %cst_167 = arith.constant 1.000000e+30 : f32
    %619 = vector.broadcast %cst_167 : f32 to vector<1x128xf32>
    %620 = arith.select %615, %619, %618 : vector<1x128xi1>, vector<1x128xf32>
    %621 = tpu.bitcast %620 : vector<1x128xf32> -> vector<1x128xi32>
    %c-128_i32_168 = arith.constant -128 : i32
    %622 = vector.broadcast %c-128_i32_168 : i32 to vector<1x128xi32>
    %623 = arith.andi %621, %622 : vector<1x128xi32>
    %624 = arith.ori %623, %0 : vector<1x128xi32>
    %625 = vector.shape_cast %624 : vector<1x128xi32> to vector<1x1x128xi32>
    %cst_169 = arith.constant dense<2147483647> : vector<1xi32>
    %626 = vector.multi_reduction <minsi>, %625, %cst_169 [1, 2] : vector<1x1x128xi32> to vector<1xi32>
    %627 = vector.shape_cast %626 : vector<1xi32> to vector<1x1x1xi32>
    %628 = vector.extract %627[0, 0, 0] : i32 from vector<1x1x1xi32>
    %c127_i32_170 = arith.constant 127 : i32
    %629 = arith.andi %628, %c127_i32_170 : i32
    %630 = vector.shape_cast %620 : vector<1x128xf32> to vector<1x1x128xf32>
    %cst_171 = arith.constant dense<0x7F800000> : vector<1xf32>
    %631 = vector.multi_reduction <minimumf>, %630, %cst_171 [1, 2] : vector<1x1x128xf32> to vector<1xf32>
    %632 = vector.shape_cast %631 : vector<1xf32> to vector<1x1x1xf32>
    %633 = vector.extract %632[0, 0, 0] : f32 from vector<1x1x1xf32>
    %cst_172 = arith.constant 0.000000e+00 : f32
    %634 = arith.maximumf %633, %cst_172 : f32
    %635 = math.sqrt %634 : f32
    %c20_i32 = arith.constant 20 : i32
    %636 = vector.broadcast %c20_i32 : i32 to vector<1x128xi32>
    %637 = arith.cmpi eq, %0, %636 : vector<1x128xi32>
    %cst_173 = arith.constant 0.000000e+00 : f32
    %638 = vector.broadcast %635 : f32 to vector<1x128xf32>
    %639 = vector.broadcast %cst_173 : f32 to vector<1x128xf32>
    %640 = arith.select %637, %638, %639 : vector<1x128xi1>, vector<1x128xf32>
    %641 = arith.addf %612, %640 : vector<1x128xf32>
    %642 = vector.broadcast %629 : i32 to vector<1x128xi32>
    %643 = arith.cmpi eq, %0, %642 : vector<1x128xi32>
    %644 = arith.ori %615, %643 : vector<1x128xi1>
    %645 = arith.index_cast %629 : i32 to index
    %c0_174 = arith.constant 0 : index
    %646 = vector.load %arg4[%645, %c0_174] : memref<128x128xf32, #tpu.memory_space<vmem>>, vector<1x128xf32>
    %647 = arith.minimumf %620, %646 : vector<1x128xf32>
    %cst_175 = arith.constant 1.000000e+30 : f32
    %648 = vector.broadcast %cst_175 : f32 to vector<1x128xf32>
    %649 = arith.select %644, %648, %647 : vector<1x128xi1>, vector<1x128xf32>
    %650 = tpu.bitcast %649 : vector<1x128xf32> -> vector<1x128xi32>
    %c-128_i32_176 = arith.constant -128 : i32
    %651 = vector.broadcast %c-128_i32_176 : i32 to vector<1x128xi32>
    %652 = arith.andi %650, %651 : vector<1x128xi32>
    %653 = arith.ori %652, %0 : vector<1x128xi32>
    %654 = vector.shape_cast %653 : vector<1x128xi32> to vector<1x1x128xi32>
    %cst_177 = arith.constant dense<2147483647> : vector<1xi32>
    %655 = vector.multi_reduction <minsi>, %654, %cst_177 [1, 2] : vector<1x1x128xi32> to vector<1xi32>
    %656 = vector.shape_cast %655 : vector<1xi32> to vector<1x1x1xi32>
    %657 = vector.extract %656[0, 0, 0] : i32 from vector<1x1x1xi32>
    %c127_i32_178 = arith.constant 127 : i32
    %658 = arith.andi %657, %c127_i32_178 : i32
    %659 = vector.shape_cast %649 : vector<1x128xf32> to vector<1x1x128xf32>
    %cst_179 = arith.constant dense<0x7F800000> : vector<1xf32>
    %660 = vector.multi_reduction <minimumf>, %659, %cst_179 [1, 2] : vector<1x1x128xf32> to vector<1xf32>
    %661 = vector.shape_cast %660 : vector<1xf32> to vector<1x1x1xf32>
    %662 = vector.extract %661[0, 0, 0] : f32 from vector<1x1x1xf32>
    %cst_180 = arith.constant 0.000000e+00 : f32
    %663 = arith.maximumf %662, %cst_180 : f32
    %664 = math.sqrt %663 : f32
    %c21_i32 = arith.constant 21 : i32
    %665 = vector.broadcast %c21_i32 : i32 to vector<1x128xi32>
    %666 = arith.cmpi eq, %0, %665 : vector<1x128xi32>
    %cst_181 = arith.constant 0.000000e+00 : f32
    %667 = vector.broadcast %664 : f32 to vector<1x128xf32>
    %668 = vector.broadcast %cst_181 : f32 to vector<1x128xf32>
    %669 = arith.select %666, %667, %668 : vector<1x128xi1>, vector<1x128xf32>
    %670 = arith.addf %641, %669 : vector<1x128xf32>
    %671 = vector.broadcast %658 : i32 to vector<1x128xi32>
    %672 = arith.cmpi eq, %0, %671 : vector<1x128xi32>
    %673 = arith.ori %644, %672 : vector<1x128xi1>
    %674 = arith.index_cast %658 : i32 to index
    %c0_182 = arith.constant 0 : index
    %675 = vector.load %arg4[%674, %c0_182] : memref<128x128xf32, #tpu.memory_space<vmem>>, vector<1x128xf32>
    %676 = arith.minimumf %649, %675 : vector<1x128xf32>
    %cst_183 = arith.constant 1.000000e+30 : f32
    %677 = vector.broadcast %cst_183 : f32 to vector<1x128xf32>
    %678 = arith.select %673, %677, %676 : vector<1x128xi1>, vector<1x128xf32>
    %679 = tpu.bitcast %678 : vector<1x128xf32> -> vector<1x128xi32>
    %c-128_i32_184 = arith.constant -128 : i32
    %680 = vector.broadcast %c-128_i32_184 : i32 to vector<1x128xi32>
    %681 = arith.andi %679, %680 : vector<1x128xi32>
    %682 = arith.ori %681, %0 : vector<1x128xi32>
    %683 = vector.shape_cast %682 : vector<1x128xi32> to vector<1x1x128xi32>
    %cst_185 = arith.constant dense<2147483647> : vector<1xi32>
    %684 = vector.multi_reduction <minsi>, %683, %cst_185 [1, 2] : vector<1x1x128xi32> to vector<1xi32>
    %685 = vector.shape_cast %684 : vector<1xi32> to vector<1x1x1xi32>
    %686 = vector.extract %685[0, 0, 0] : i32 from vector<1x1x1xi32>
    %c127_i32_186 = arith.constant 127 : i32
    %687 = arith.andi %686, %c127_i32_186 : i32
    %688 = vector.shape_cast %678 : vector<1x128xf32> to vector<1x1x128xf32>
    %cst_187 = arith.constant dense<0x7F800000> : vector<1xf32>
    %689 = vector.multi_reduction <minimumf>, %688, %cst_187 [1, 2] : vector<1x1x128xf32> to vector<1xf32>
    %690 = vector.shape_cast %689 : vector<1xf32> to vector<1x1x1xf32>
    %691 = vector.extract %690[0, 0, 0] : f32 from vector<1x1x1xf32>
    %cst_188 = arith.constant 0.000000e+00 : f32
    %692 = arith.maximumf %691, %cst_188 : f32
    %693 = math.sqrt %692 : f32
    %c22_i32 = arith.constant 22 : i32
    %694 = vector.broadcast %c22_i32 : i32 to vector<1x128xi32>
    %695 = arith.cmpi eq, %0, %694 : vector<1x128xi32>
    %cst_189 = arith.constant 0.000000e+00 : f32
    %696 = vector.broadcast %693 : f32 to vector<1x128xf32>
    %697 = vector.broadcast %cst_189 : f32 to vector<1x128xf32>
    %698 = arith.select %695, %696, %697 : vector<1x128xi1>, vector<1x128xf32>
    %699 = arith.addf %670, %698 : vector<1x128xf32>
    %700 = vector.broadcast %687 : i32 to vector<1x128xi32>
    %701 = arith.cmpi eq, %0, %700 : vector<1x128xi32>
    %702 = arith.ori %673, %701 : vector<1x128xi1>
    %703 = arith.index_cast %687 : i32 to index
    %c0_190 = arith.constant 0 : index
    %704 = vector.load %arg4[%703, %c0_190] : memref<128x128xf32, #tpu.memory_space<vmem>>, vector<1x128xf32>
    %705 = arith.minimumf %678, %704 : vector<1x128xf32>
    %cst_191 = arith.constant 1.000000e+30 : f32
    %706 = vector.broadcast %cst_191 : f32 to vector<1x128xf32>
    %707 = arith.select %702, %706, %705 : vector<1x128xi1>, vector<1x128xf32>
    %708 = tpu.bitcast %707 : vector<1x128xf32> -> vector<1x128xi32>
    %c-128_i32_192 = arith.constant -128 : i32
    %709 = vector.broadcast %c-128_i32_192 : i32 to vector<1x128xi32>
    %710 = arith.andi %708, %709 : vector<1x128xi32>
    %711 = arith.ori %710, %0 : vector<1x128xi32>
    %712 = vector.shape_cast %711 : vector<1x128xi32> to vector<1x1x128xi32>
    %cst_193 = arith.constant dense<2147483647> : vector<1xi32>
    %713 = vector.multi_reduction <minsi>, %712, %cst_193 [1, 2] : vector<1x1x128xi32> to vector<1xi32>
    %714 = vector.shape_cast %713 : vector<1xi32> to vector<1x1x1xi32>
    %715 = vector.extract %714[0, 0, 0] : i32 from vector<1x1x1xi32>
    %c127_i32_194 = arith.constant 127 : i32
    %716 = arith.andi %715, %c127_i32_194 : i32
    %717 = vector.shape_cast %707 : vector<1x128xf32> to vector<1x1x128xf32>
    %cst_195 = arith.constant dense<0x7F800000> : vector<1xf32>
    %718 = vector.multi_reduction <minimumf>, %717, %cst_195 [1, 2] : vector<1x1x128xf32> to vector<1xf32>
    %719 = vector.shape_cast %718 : vector<1xf32> to vector<1x1x1xf32>
    %720 = vector.extract %719[0, 0, 0] : f32 from vector<1x1x1xf32>
    %cst_196 = arith.constant 0.000000e+00 : f32
    %721 = arith.maximumf %720, %cst_196 : f32
    %722 = math.sqrt %721 : f32
    %c23_i32 = arith.constant 23 : i32
    %723 = vector.broadcast %c23_i32 : i32 to vector<1x128xi32>
    %724 = arith.cmpi eq, %0, %723 : vector<1x128xi32>
    %cst_197 = arith.constant 0.000000e+00 : f32
    %725 = vector.broadcast %722 : f32 to vector<1x128xf32>
    %726 = vector.broadcast %cst_197 : f32 to vector<1x128xf32>
    %727 = arith.select %724, %725, %726 : vector<1x128xi1>, vector<1x128xf32>
    %728 = arith.addf %699, %727 : vector<1x128xf32>
    %729 = vector.broadcast %716 : i32 to vector<1x128xi32>
    %730 = arith.cmpi eq, %0, %729 : vector<1x128xi32>
    %731 = arith.ori %702, %730 : vector<1x128xi1>
    %732 = arith.index_cast %716 : i32 to index
    %c0_198 = arith.constant 0 : index
    %733 = vector.load %arg4[%732, %c0_198] : memref<128x128xf32, #tpu.memory_space<vmem>>, vector<1x128xf32>
    %734 = arith.minimumf %707, %733 : vector<1x128xf32>
    %cst_199 = arith.constant 1.000000e+30 : f32
    %735 = vector.broadcast %cst_199 : f32 to vector<1x128xf32>
    %736 = arith.select %731, %735, %734 : vector<1x128xi1>, vector<1x128xf32>
    %737 = tpu.bitcast %736 : vector<1x128xf32> -> vector<1x128xi32>
    %c-128_i32_200 = arith.constant -128 : i32
    %738 = vector.broadcast %c-128_i32_200 : i32 to vector<1x128xi32>
    %739 = arith.andi %737, %738 : vector<1x128xi32>
    %740 = arith.ori %739, %0 : vector<1x128xi32>
    %741 = vector.shape_cast %740 : vector<1x128xi32> to vector<1x1x128xi32>
    %cst_201 = arith.constant dense<2147483647> : vector<1xi32>
    %742 = vector.multi_reduction <minsi>, %741, %cst_201 [1, 2] : vector<1x1x128xi32> to vector<1xi32>
    %743 = vector.shape_cast %742 : vector<1xi32> to vector<1x1x1xi32>
    %744 = vector.extract %743[0, 0, 0] : i32 from vector<1x1x1xi32>
    %c127_i32_202 = arith.constant 127 : i32
    %745 = arith.andi %744, %c127_i32_202 : i32
    %746 = vector.shape_cast %736 : vector<1x128xf32> to vector<1x1x128xf32>
    %cst_203 = arith.constant dense<0x7F800000> : vector<1xf32>
    %747 = vector.multi_reduction <minimumf>, %746, %cst_203 [1, 2] : vector<1x1x128xf32> to vector<1xf32>
    %748 = vector.shape_cast %747 : vector<1xf32> to vector<1x1x1xf32>
    %749 = vector.extract %748[0, 0, 0] : f32 from vector<1x1x1xf32>
    %cst_204 = arith.constant 0.000000e+00 : f32
    %750 = arith.maximumf %749, %cst_204 : f32
    %751 = math.sqrt %750 : f32
    %c24_i32 = arith.constant 24 : i32
    %752 = vector.broadcast %c24_i32 : i32 to vector<1x128xi32>
    %753 = arith.cmpi eq, %0, %752 : vector<1x128xi32>
    %cst_205 = arith.constant 0.000000e+00 : f32
    %754 = vector.broadcast %751 : f32 to vector<1x128xf32>
    %755 = vector.broadcast %cst_205 : f32 to vector<1x128xf32>
    %756 = arith.select %753, %754, %755 : vector<1x128xi1>, vector<1x128xf32>
    %757 = arith.addf %728, %756 : vector<1x128xf32>
    %758 = vector.broadcast %745 : i32 to vector<1x128xi32>
    %759 = arith.cmpi eq, %0, %758 : vector<1x128xi32>
    %760 = arith.ori %731, %759 : vector<1x128xi1>
    %761 = arith.index_cast %745 : i32 to index
    %c0_206 = arith.constant 0 : index
    %762 = vector.load %arg4[%761, %c0_206] : memref<128x128xf32, #tpu.memory_space<vmem>>, vector<1x128xf32>
    %763 = arith.minimumf %736, %762 : vector<1x128xf32>
    %cst_207 = arith.constant 1.000000e+30 : f32
    %764 = vector.broadcast %cst_207 : f32 to vector<1x128xf32>
    %765 = arith.select %760, %764, %763 : vector<1x128xi1>, vector<1x128xf32>
    %766 = tpu.bitcast %765 : vector<1x128xf32> -> vector<1x128xi32>
    %c-128_i32_208 = arith.constant -128 : i32
    %767 = vector.broadcast %c-128_i32_208 : i32 to vector<1x128xi32>
    %768 = arith.andi %766, %767 : vector<1x128xi32>
    %769 = arith.ori %768, %0 : vector<1x128xi32>
    %770 = vector.shape_cast %769 : vector<1x128xi32> to vector<1x1x128xi32>
    %cst_209 = arith.constant dense<2147483647> : vector<1xi32>
    %771 = vector.multi_reduction <minsi>, %770, %cst_209 [1, 2] : vector<1x1x128xi32> to vector<1xi32>
    %772 = vector.shape_cast %771 : vector<1xi32> to vector<1x1x1xi32>
    %773 = vector.extract %772[0, 0, 0] : i32 from vector<1x1x1xi32>
    %c127_i32_210 = arith.constant 127 : i32
    %774 = arith.andi %773, %c127_i32_210 : i32
    %775 = vector.shape_cast %765 : vector<1x128xf32> to vector<1x1x128xf32>
    %cst_211 = arith.constant dense<0x7F800000> : vector<1xf32>
    %776 = vector.multi_reduction <minimumf>, %775, %cst_211 [1, 2] : vector<1x1x128xf32> to vector<1xf32>
    %777 = vector.shape_cast %776 : vector<1xf32> to vector<1x1x1xf32>
    %778 = vector.extract %777[0, 0, 0] : f32 from vector<1x1x1xf32>
    %cst_212 = arith.constant 0.000000e+00 : f32
    %779 = arith.maximumf %778, %cst_212 : f32
    %780 = math.sqrt %779 : f32
    %c25_i32 = arith.constant 25 : i32
    %781 = vector.broadcast %c25_i32 : i32 to vector<1x128xi32>
    %782 = arith.cmpi eq, %0, %781 : vector<1x128xi32>
    %cst_213 = arith.constant 0.000000e+00 : f32
    %783 = vector.broadcast %780 : f32 to vector<1x128xf32>
    %784 = vector.broadcast %cst_213 : f32 to vector<1x128xf32>
    %785 = arith.select %782, %783, %784 : vector<1x128xi1>, vector<1x128xf32>
    %786 = arith.addf %757, %785 : vector<1x128xf32>
    %787 = vector.broadcast %774 : i32 to vector<1x128xi32>
    %788 = arith.cmpi eq, %0, %787 : vector<1x128xi32>
    %789 = arith.ori %760, %788 : vector<1x128xi1>
    %790 = arith.index_cast %774 : i32 to index
    %c0_214 = arith.constant 0 : index
    %791 = vector.load %arg4[%790, %c0_214] : memref<128x128xf32, #tpu.memory_space<vmem>>, vector<1x128xf32>
    %792 = arith.minimumf %765, %791 : vector<1x128xf32>
    %cst_215 = arith.constant 1.000000e+30 : f32
    %793 = vector.broadcast %cst_215 : f32 to vector<1x128xf32>
    %794 = arith.select %789, %793, %792 : vector<1x128xi1>, vector<1x128xf32>
    %795 = tpu.bitcast %794 : vector<1x128xf32> -> vector<1x128xi32>
    %c-128_i32_216 = arith.constant -128 : i32
    %796 = vector.broadcast %c-128_i32_216 : i32 to vector<1x128xi32>
    %797 = arith.andi %795, %796 : vector<1x128xi32>
    %798 = arith.ori %797, %0 : vector<1x128xi32>
    %799 = vector.shape_cast %798 : vector<1x128xi32> to vector<1x1x128xi32>
    %cst_217 = arith.constant dense<2147483647> : vector<1xi32>
    %800 = vector.multi_reduction <minsi>, %799, %cst_217 [1, 2] : vector<1x1x128xi32> to vector<1xi32>
    %801 = vector.shape_cast %800 : vector<1xi32> to vector<1x1x1xi32>
    %802 = vector.extract %801[0, 0, 0] : i32 from vector<1x1x1xi32>
    %c127_i32_218 = arith.constant 127 : i32
    %803 = arith.andi %802, %c127_i32_218 : i32
    %804 = vector.shape_cast %794 : vector<1x128xf32> to vector<1x1x128xf32>
    %cst_219 = arith.constant dense<0x7F800000> : vector<1xf32>
    %805 = vector.multi_reduction <minimumf>, %804, %cst_219 [1, 2] : vector<1x1x128xf32> to vector<1xf32>
    %806 = vector.shape_cast %805 : vector<1xf32> to vector<1x1x1xf32>
    %807 = vector.extract %806[0, 0, 0] : f32 from vector<1x1x1xf32>
    %cst_220 = arith.constant 0.000000e+00 : f32
    %808 = arith.maximumf %807, %cst_220 : f32
    %809 = math.sqrt %808 : f32
    %c26_i32 = arith.constant 26 : i32
    %810 = vector.broadcast %c26_i32 : i32 to vector<1x128xi32>
    %811 = arith.cmpi eq, %0, %810 : vector<1x128xi32>
    %cst_221 = arith.constant 0.000000e+00 : f32
    %812 = vector.broadcast %809 : f32 to vector<1x128xf32>
    %813 = vector.broadcast %cst_221 : f32 to vector<1x128xf32>
    %814 = arith.select %811, %812, %813 : vector<1x128xi1>, vector<1x128xf32>
    %815 = arith.addf %786, %814 : vector<1x128xf32>
    %816 = vector.broadcast %803 : i32 to vector<1x128xi32>
    %817 = arith.cmpi eq, %0, %816 : vector<1x128xi32>
    %818 = arith.ori %789, %817 : vector<1x128xi1>
    %819 = arith.index_cast %803 : i32 to index
    %c0_222 = arith.constant 0 : index
    %820 = vector.load %arg4[%819, %c0_222] : memref<128x128xf32, #tpu.memory_space<vmem>>, vector<1x128xf32>
    %821 = arith.minimumf %794, %820 : vector<1x128xf32>
    %cst_223 = arith.constant 1.000000e+30 : f32
    %822 = vector.broadcast %cst_223 : f32 to vector<1x128xf32>
    %823 = arith.select %818, %822, %821 : vector<1x128xi1>, vector<1x128xf32>
    %824 = tpu.bitcast %823 : vector<1x128xf32> -> vector<1x128xi32>
    %c-128_i32_224 = arith.constant -128 : i32
    %825 = vector.broadcast %c-128_i32_224 : i32 to vector<1x128xi32>
    %826 = arith.andi %824, %825 : vector<1x128xi32>
    %827 = arith.ori %826, %0 : vector<1x128xi32>
    %828 = vector.shape_cast %827 : vector<1x128xi32> to vector<1x1x128xi32>
    %cst_225 = arith.constant dense<2147483647> : vector<1xi32>
    %829 = vector.multi_reduction <minsi>, %828, %cst_225 [1, 2] : vector<1x1x128xi32> to vector<1xi32>
    %830 = vector.shape_cast %829 : vector<1xi32> to vector<1x1x1xi32>
    %831 = vector.extract %830[0, 0, 0] : i32 from vector<1x1x1xi32>
    %c127_i32_226 = arith.constant 127 : i32
    %832 = arith.andi %831, %c127_i32_226 : i32
    %833 = vector.shape_cast %823 : vector<1x128xf32> to vector<1x1x128xf32>
    %cst_227 = arith.constant dense<0x7F800000> : vector<1xf32>
    %834 = vector.multi_reduction <minimumf>, %833, %cst_227 [1, 2] : vector<1x1x128xf32> to vector<1xf32>
    %835 = vector.shape_cast %834 : vector<1xf32> to vector<1x1x1xf32>
    %836 = vector.extract %835[0, 0, 0] : f32 from vector<1x1x1xf32>
    %cst_228 = arith.constant 0.000000e+00 : f32
    %837 = arith.maximumf %836, %cst_228 : f32
    %838 = math.sqrt %837 : f32
    %c27_i32 = arith.constant 27 : i32
    %839 = vector.broadcast %c27_i32 : i32 to vector<1x128xi32>
    %840 = arith.cmpi eq, %0, %839 : vector<1x128xi32>
    %cst_229 = arith.constant 0.000000e+00 : f32
    %841 = vector.broadcast %838 : f32 to vector<1x128xf32>
    %842 = vector.broadcast %cst_229 : f32 to vector<1x128xf32>
    %843 = arith.select %840, %841, %842 : vector<1x128xi1>, vector<1x128xf32>
    %844 = arith.addf %815, %843 : vector<1x128xf32>
    %845 = vector.broadcast %832 : i32 to vector<1x128xi32>
    %846 = arith.cmpi eq, %0, %845 : vector<1x128xi32>
    %847 = arith.ori %818, %846 : vector<1x128xi1>
    %848 = arith.index_cast %832 : i32 to index
    %c0_230 = arith.constant 0 : index
    %849 = vector.load %arg4[%848, %c0_230] : memref<128x128xf32, #tpu.memory_space<vmem>>, vector<1x128xf32>
    %850 = arith.minimumf %823, %849 : vector<1x128xf32>
    %cst_231 = arith.constant 1.000000e+30 : f32
    %851 = vector.broadcast %cst_231 : f32 to vector<1x128xf32>
    %852 = arith.select %847, %851, %850 : vector<1x128xi1>, vector<1x128xf32>
    %853 = tpu.bitcast %852 : vector<1x128xf32> -> vector<1x128xi32>
    %c-128_i32_232 = arith.constant -128 : i32
    %854 = vector.broadcast %c-128_i32_232 : i32 to vector<1x128xi32>
    %855 = arith.andi %853, %854 : vector<1x128xi32>
    %856 = arith.ori %855, %0 : vector<1x128xi32>
    %857 = vector.shape_cast %856 : vector<1x128xi32> to vector<1x1x128xi32>
    %cst_233 = arith.constant dense<2147483647> : vector<1xi32>
    %858 = vector.multi_reduction <minsi>, %857, %cst_233 [1, 2] : vector<1x1x128xi32> to vector<1xi32>
    %859 = vector.shape_cast %858 : vector<1xi32> to vector<1x1x1xi32>
    %860 = vector.extract %859[0, 0, 0] : i32 from vector<1x1x1xi32>
    %c127_i32_234 = arith.constant 127 : i32
    %861 = arith.andi %860, %c127_i32_234 : i32
    %862 = vector.shape_cast %852 : vector<1x128xf32> to vector<1x1x128xf32>
    %cst_235 = arith.constant dense<0x7F800000> : vector<1xf32>
    %863 = vector.multi_reduction <minimumf>, %862, %cst_235 [1, 2] : vector<1x1x128xf32> to vector<1xf32>
    %864 = vector.shape_cast %863 : vector<1xf32> to vector<1x1x1xf32>
    %865 = vector.extract %864[0, 0, 0] : f32 from vector<1x1x1xf32>
    %cst_236 = arith.constant 0.000000e+00 : f32
    %866 = arith.maximumf %865, %cst_236 : f32
    %867 = math.sqrt %866 : f32
    %c28_i32 = arith.constant 28 : i32
    %868 = vector.broadcast %c28_i32 : i32 to vector<1x128xi32>
    %869 = arith.cmpi eq, %0, %868 : vector<1x128xi32>
    %cst_237 = arith.constant 0.000000e+00 : f32
    %870 = vector.broadcast %867 : f32 to vector<1x128xf32>
    %871 = vector.broadcast %cst_237 : f32 to vector<1x128xf32>
    %872 = arith.select %869, %870, %871 : vector<1x128xi1>, vector<1x128xf32>
    %873 = arith.addf %844, %872 : vector<1x128xf32>
    %874 = vector.broadcast %861 : i32 to vector<1x128xi32>
    %875 = arith.cmpi eq, %0, %874 : vector<1x128xi32>
    %876 = arith.ori %847, %875 : vector<1x128xi1>
    %877 = arith.index_cast %861 : i32 to index
    %c0_238 = arith.constant 0 : index
    %878 = vector.load %arg4[%877, %c0_238] : memref<128x128xf32, #tpu.memory_space<vmem>>, vector<1x128xf32>
    %879 = arith.minimumf %852, %878 : vector<1x128xf32>
    %cst_239 = arith.constant 1.000000e+30 : f32
    %880 = vector.broadcast %cst_239 : f32 to vector<1x128xf32>
    %881 = arith.select %876, %880, %879 : vector<1x128xi1>, vector<1x128xf32>
    %882 = tpu.bitcast %881 : vector<1x128xf32> -> vector<1x128xi32>
    %c-128_i32_240 = arith.constant -128 : i32
    %883 = vector.broadcast %c-128_i32_240 : i32 to vector<1x128xi32>
    %884 = arith.andi %882, %883 : vector<1x128xi32>
    %885 = arith.ori %884, %0 : vector<1x128xi32>
    %886 = vector.shape_cast %885 : vector<1x128xi32> to vector<1x1x128xi32>
    %cst_241 = arith.constant dense<2147483647> : vector<1xi32>
    %887 = vector.multi_reduction <minsi>, %886, %cst_241 [1, 2] : vector<1x1x128xi32> to vector<1xi32>
    %888 = vector.shape_cast %887 : vector<1xi32> to vector<1x1x1xi32>
    %889 = vector.extract %888[0, 0, 0] : i32 from vector<1x1x1xi32>
    %c127_i32_242 = arith.constant 127 : i32
    %890 = arith.andi %889, %c127_i32_242 : i32
    %891 = vector.shape_cast %881 : vector<1x128xf32> to vector<1x1x128xf32>
    %cst_243 = arith.constant dense<0x7F800000> : vector<1xf32>
    %892 = vector.multi_reduction <minimumf>, %891, %cst_243 [1, 2] : vector<1x1x128xf32> to vector<1xf32>
    %893 = vector.shape_cast %892 : vector<1xf32> to vector<1x1x1xf32>
    %894 = vector.extract %893[0, 0, 0] : f32 from vector<1x1x1xf32>
    %cst_244 = arith.constant 0.000000e+00 : f32
    %895 = arith.maximumf %894, %cst_244 : f32
    %896 = math.sqrt %895 : f32
    %c29_i32 = arith.constant 29 : i32
    %897 = vector.broadcast %c29_i32 : i32 to vector<1x128xi32>
    %898 = arith.cmpi eq, %0, %897 : vector<1x128xi32>
    %cst_245 = arith.constant 0.000000e+00 : f32
    %899 = vector.broadcast %896 : f32 to vector<1x128xf32>
    %900 = vector.broadcast %cst_245 : f32 to vector<1x128xf32>
    %901 = arith.select %898, %899, %900 : vector<1x128xi1>, vector<1x128xf32>
    %902 = arith.addf %873, %901 : vector<1x128xf32>
    %903 = vector.broadcast %890 : i32 to vector<1x128xi32>
    %904 = arith.cmpi eq, %0, %903 : vector<1x128xi32>
    %905 = arith.ori %876, %904 : vector<1x128xi1>
    %906 = arith.index_cast %890 : i32 to index
    %c0_246 = arith.constant 0 : index
    %907 = vector.load %arg4[%906, %c0_246] : memref<128x128xf32, #tpu.memory_space<vmem>>, vector<1x128xf32>
    %908 = arith.minimumf %881, %907 : vector<1x128xf32>
    %cst_247 = arith.constant 1.000000e+30 : f32
    %909 = vector.broadcast %cst_247 : f32 to vector<1x128xf32>
    %910 = arith.select %905, %909, %908 : vector<1x128xi1>, vector<1x128xf32>
    %911 = vector.shape_cast %910 : vector<1x128xf32> to vector<1x1x128xf32>
    %cst_248 = arith.constant dense<0x7F800000> : vector<1xf32>
    %912 = vector.multi_reduction <minimumf>, %911, %cst_248 [1, 2] : vector<1x1x128xf32> to vector<1xf32>
    %913 = vector.shape_cast %912 : vector<1xf32> to vector<1x1x1xf32>
    %914 = vector.extract %913[0, 0, 0] : f32 from vector<1x1x1xf32>
    %cst_249 = arith.constant 0.000000e+00 : f32
    %915 = arith.maximumf %914, %cst_249 : f32
    %916 = math.sqrt %915 : f32
    %c30_i32 = arith.constant 30 : i32
    %917 = vector.broadcast %c30_i32 : i32 to vector<1x128xi32>
    %918 = arith.cmpi eq, %0, %917 : vector<1x128xi32>
    %cst_250 = arith.constant 0.000000e+00 : f32
    %919 = vector.broadcast %916 : f32 to vector<1x128xf32>
    %920 = vector.broadcast %cst_250 : f32 to vector<1x128xf32>
    %921 = arith.select %918, %919, %920 : vector<1x128xi1>, vector<1x128xf32>
    %922 = arith.addf %902, %921 : vector<1x128xf32>
    %c0_251 = arith.constant 0 : index
    %c0_252 = arith.constant 0 : index
    %923 = vector.load %arg3[%c0_251, %c0_252] : memref<1x128xf32, #tpu.memory_space<vmem>>, vector<1x128xf32>
    tpu.vector_store %arg3[%c0_251, %c0_252], %922 {strides = array<i32>} : memref<1x128xf32, #tpu.memory_space<vmem>>, vector<1x128xf32>,
    return
  }
  func.func @transform_0(%arg0: i32) -> (i32, i32) {
    %c0_i32 = arith.constant 0 : i32
    %c0_i32_0 = arith.constant 0 : i32
    %c0_i32_1 = arith.constant 0 : i32
    return %c0_i32, %c0_i32_0 : i32, i32
  }
  func.func @transform_1(%arg0: i32) -> (i32, i32) {
    %c0_i32 = arith.constant 0 : i32
    %c0_i32_0 = arith.constant 0 : i32
    %c0_i32_1 = arith.constant 0 : i32
    return %c0_i32, %c0_i32_0 : i32, i32
  }
  func.func @transform_2(%arg0: i32) -> (i32, i32) {
    %c0_i32 = arith.constant 0 : i32
    %c0_i32_0 = arith.constant 0 : i32
    %c0_i32_1 = arith.constant 0 : i32
    return %c0_i32, %c0_i32_0 : i32, i32
  }
}

</mosaic_0001>

<bundles_post_ra>
// kernel: tpu_custom_call.1
= control target key start
LH: loop header
LB: loop body
LE: loop exit
PB: predicated region body
PF: predicated region fallthrough
CT: control target
= control target key end

     0   :  { %s3359_s0 = inlined_call_operand.vmem [shape: f32[128,8], index: 0, kind: input, shape index: {}]   ;;  %s3360_s1 = inlined_call_operand.vmem [shape: f32[8,128], index: 1, kind: input, shape index: {}]   ;;  %s3361_s2 = inlined_call_operand.hbm [shape: f32[1,128], index: 2, kind: output, shape index: {}]  }
   0x1   :  { %3362 = sst [smem:[#allocation10_spill]] %s3361_s2 }
   0x2   :  { %v15_v0 = vld [vmem:[%s3359_s0] sm:$0xff]  ;;  %v2585_v1 = vmov 0   ;;  %v2586_v2 = vmov 2  }
   0x3   :  { %2492 = vset.pattern.permute.xlu0 %v2585_v1  ;;  %2494 = vset.pattern.permute.xlu1 %v2586_v2 }
   0x4   :  { %7 = vsyncpa [#allocation4], 0  ;;  %34 = vperm.xlu0 %2492, %v15_v0   ;;  %281 = vperm.xlu1 %2494, %v15_v0   ;;  %v2612_v3 = vld [vmem:[%s3359_s0 + $0x8] sm:$0xff]  ;;  %v2587_v4 = vmov 1   ;;  %v2619_v5 = vld [vmem:[%s3359_s0 + $0x10] sm:$0xff]  ;;  %v12_v12 = vlaneseq  ;;  %vm437_vm4 = vcmask 1040384  }
   0x5   :  { %v2625_v6 = vld [vmem:[%s3359_s0 + $0x58] sm:$0xff]  ;;  %v2631_v7 = vld [vmem:[%s3359_s0 + $0x68] sm:$0xff]  ;;  %v31_v16 = vld [vmem:[%s3360_s1] sm:$0xff]  ;;  %s2588_s17 = smov 0.0  }
   0x6   :  { %v2637_v8 = vld [vmem:[%s3359_s0 + $0x78] sm:$0xff]  ;;  %v2645_v9 = vld [vmem:[%s3359_s0 + $0x28] sm:$0xff]  ;;  %v113_v13 = vshrl.u32 %v12_v12, 7  ;;  %v2673_v25 = vand.u32 127, %v12_v12  ;;  %v19_v42 = vld [vmem:[%s3359_s0 + $0x20] sm:$0xff] }
   0x7   :  { %v2651_v10 = vld [vmem:[%s3359_s0 + $0x38] sm:$0xff]  ;;  %v2657_v11 = vld [vmem:[%s3359_s0 + $0x48] sm:$0xff]  ;;  %v21_v43 = vld [vmem:[%s3359_s0 + $0x30] sm:$0xff] }
   0x8   :  { %2493 = vset.pattern.permute.xlu0 %v2587_v4  ;;  %2495 = vset.pattern.permute.xlu1 %v2585_v1  ;;  %v114_v14 = vsub.s32 0, %v113_v13  ;;  %v346_v15 = vsub.s32 2, %v113_v13  ;;  %v230_v17 = vsub.s32 1, %v113_v13  ;;  %vm430_vm0 = vcmp.eq.s32.totalorder %v2673_v25, 0  ;;  %v18_v41 = vld [vmem:[%s3359_s0 + $0x18] sm:$0xff]  ;;  %v23_v44 = vld [vmem:[%s3359_s0 + $0x40] sm:$0xff] }
   0x9   :  { %165 = vperm.xlu0 %2493, %v15_v0   ;;  %39 = vperm.xlu1 %2495, %v2612_v3   ;;  %vm431_vm1 = vcmp.ge.s32.totalorder %v2673_v25, 32  ;;  %vm14_vm2 = vcmp.lt.s32.totalorder %v2673_v25, 32  ;;  %v25_v45 = vld [vmem:[%s3359_s0 + $0x50] sm:$0xff]  ;;  %v27_v46 = vld [vmem:[%s3359_s0 + $0x60] sm:$0xff] }
   0xa   :  { %v2665_v19 = vrot.slane %v31_v16, %v114_v14  ;;  %v2667_v20 = vrot.slane %v31_v16, %v346_v15  ;;  %v2669_v22 = vrot.slane %v31_v16, %v230_v17  ;;  %vm2681_vm3 = vmor %vm430_vm0, %vm431_vm1  ;;  %v29_v47 = vld [vmem:[%s3359_s0 + $0x70] sm:$0xff] }
   0xd   :  { %2496 = vset.pattern.permute.xlu0 %v2585_v1 }
   0xe   :  { %44 = vperm.xlu0 %2496, %v2619_v5  }
  0x12   :  { %89 = vperm.xlu0 %2496, %v2625_v6  }
  0x16   :  { %99 = vperm.xlu0 %2496, %v2631_v7  }
  0x1a   :  { %109 = vperm.xlu0 %2496, %v2637_v8  }
  0x1e   :  { %2498 = vset.pattern.permute.xlu0 %v2587_v4 }
  0x1f   :  { %173 = vperm.xlu0 %2498, %v2619_v5  }
  0x23   :  { %185 = vperm.xlu0 %2498, %v2645_v9  }
  0x27   :  { %193 = vperm.xlu0 %2498, %v2651_v10  }
  0x2b   :  { %201 = vperm.xlu0 %2498, %v2657_v11  }
  0x2f   :  { %209 = vperm.xlu0 %2498, %v2625_v6  }
  0x33   :  { %217 = vperm.xlu0 %2498, %v2631_v7  }
  0x7f   :  { %v35_v18 = vpop.permute.xlu0 %34  ;;  %v282_v21 = vpop.permute.xlu1 %281 }
  0x80   :  { %v116_v23 = vsub.f32 %v35_v18, %v2665_v19  ;;  %v348_v24 = vsub.f32 %v282_v21, %v2667_v20 }
  0x82   :  { %v132_v28 = vmul.f32 %v116_v23, %v116_v23  ;;  %v364_v30 = vmul.f32 %v348_v24, %v348_v24 }
  0x84   :  { %v166_v26 = vpop.permute.xlu0 %165  ;;  %v40_v48 = vpop.permute.xlu1 %39 }
  0x85   :  { %v232_v27 = vsub.f32 %v166_v26, %v2669_v22  ;;  %v117_v12 = vsub.f32 %v40_v48, %v2665_v19 }
  0x87   :  { %v248_v29 = vmul.f32 %v232_v27, %v232_v27  ;;  %v133_v14 = vmul.f32 %v117_v12, %v117_v12 }
  0x89   :  { %v264_v31 = vadd.f32 %v248_v29, %v132_v28 }
  0x8b   :  { %v380_v32 = vadd.f32 %v364_v30, %v264_v31 }
  0x8d   :  { %v398_v34 = vsel %vm14_vm2, %v380_v32, 1e+30 }
  0x8e   :  { %414 = vst [vmem:[#allocation2] sm:$0xff] %v398_v34  ;;  %v2689_v35 = vsel %vm2681_vm3, 1e+30, %v398_v34 }
  0x8f   :  { %v435_v36 = vand.u32 4294967168, %v2689_v35  ;;  %v464_v29 = vsel %vm437_vm4, %v2689_v35, inf }
  0x91   :  { %v436_v37 = vor.u32 %v435_v36, %v2673_v25 }
  0x93   :  { %v438_v38 = vsel %vm437_vm4, %v436_v37, 2147483647 }
  0x94   :  { %v440_v39 = vshra.s32 %v438_v38, 16  ;;  %v439_v49 = vand.u32 65535, %v438_v38 }
  0x96   :  { %v442_v40 = vcvt.s32.f32 %v440_v39  ;;  %v441_v51 = vcvt.s32.f32 %v439_v49 }
  0x98   :  { %443 = vmin.xlane.f32.xlu1 %v442_v40 }
  0xa9   :  { %49 = vperm.xlu1 %2495, %v18_v41  }
  0xad   :  { %54 = vperm.xlu1 %2495, %v19_v42  }
  0xb1   :  { %59 = vperm.xlu1 %2495, %v2645_v9  }
  0xb5   :  { %64 = vperm.xlu1 %2495, %v21_v43  }
  0xb9   :  { %69 = vperm.xlu1 %2495, %v2651_v10  }
  0xbd   :  { %74 = vperm.xlu1 %2495, %v23_v44  }
  0xc1   :  { %79 = vperm.xlu1 %2495, %v2657_v11  }
  0xc5   :  { %84 = vperm.xlu1 %2495, %v25_v45  }
  0xc9   :  { %94 = vperm.xlu1 %2495, %v27_v46  }
  0xcd   :  { %104 = vperm.xlu1 %2495, %v29_v47  }
  0xd1   :  { %2497 = vset.pattern.permute.xlu1 %v2587_v4 }
  0xd2   :  { %169 = vperm.xlu1 %2497, %v2612_v3  }
  0xd6   :  { %177 = vperm.xlu1 %2497, %v18_v41  }
  0xda   :  { %181 = vperm.xlu1 %2497, %v19_v42  }
  0xde   :  { %189 = vperm.xlu1 %2497, %v21_v43  }
  0xe2   :  { %197 = vperm.xlu1 %2497, %v23_v44  }
  0xe6   :  { %205 = vperm.xlu1 %2497, %v25_v45  }
  0xea   :  { %213 = vperm.xlu1 %2497, %v27_v46  }
  0xee   :  { %221 = vperm.xlu1 %2497, %v29_v47  }
  0xf2   :  { %2499 = vset.pattern.permute.xlu1 %v2586_v2 }
  0xf3   :  { %285 = vperm.xlu1 %2499, %v2612_v3  }
  0xf7   :  { %293 = vperm.xlu1 %2499, %v18_v41  }
  0xfb   :  { %297 = vperm.xlu1 %2499, %v19_v42   ;;  %v2763_v42 = vpop.permute.xlu0 %44 }
  0xff   :  { %305 = vperm.xlu1 %2499, %v21_v43  }
 0x103   :  { %313 = vperm.xlu1 %2499, %v23_v44  }
 0x107   :  { %321 = vperm.xlu1 %2499, %v25_v45  }
 0x10b   :  { %329 = vperm.xlu1 %2499, %v27_v46  }
 0x10f   :  { %337 = vperm.xlu1 %2499, %v29_v47  }
 0x121   :  { %v2722_v50 = vpop.xlane.xlu1 %443 }
 0x122   :  { %vm445_vm5 = vcmp.eq.f32.partialorder %v442_v40, %v2722_v50 }
 0x123   :  { %v446_v52 = vsel %vm445_vm5, %v441_v51, inf }
 0x124   :  { %447 = vmin.xlane.f32.xlu0 %v446_v52 }
 0x125   :  { %v50_v53 = vpop.permute.xlu1 %49 }
 0x129   :  { %v55_v54 = vpop.permute.xlu1 %54 }
 0x12a   :  { %v120_v21 = vsub.f32 %v55_v54, %v2665_v19 }
 0x12c   :  { %v136_v36 = vmul.f32 %v120_v21, %v120_v21 }
 0x12d   :  { %v2725_v55 = vpop.permute.xlu1 %59 }
 0x131   :  { %v65_v56 = vpop.permute.xlu1 %64 }
 0x132   :  { %v122_v38 = vsub.f32 %v65_v56, %v2665_v19 }
 0x134   :  { %v138_v48 = vmul.f32 %v122_v38, %v122_v38 }
 0x135   :  { %v2727_v57 = vpop.permute.xlu1 %69 }
 0x139   :  { %v75_v58 = vpop.permute.xlu1 %74 }
 0x13a   :  { %225 = vperm.xlu0 %2498, %v2637_v8   ;;  %v124_v49 = vsub.f32 %v75_v58, %v2665_v19 }
 0x13d   :  { %v2730_v59 = vpop.permute.xlu1 %79 }
 0x13e   :  { %2500 = vset.pattern.permute.xlu0 %v2586_v2 }
 0x13f   :  { %289 = vperm.xlu0 %2500, %v2619_v5  }
 0x141   :  { %v2734_v60 = vpop.permute.xlu1 %84 }
 0x143   :  { %301 = vperm.xlu0 %2500, %v2645_v9  }
 0x145   :  { %v2737_v61 = vpop.permute.xlu1 %94 }
 0x147   :  { %309 = vperm.xlu0 %2500, %v2651_v10  }
 0x149   :  { %v2740_v62 = vpop.permute.xlu1 %104 }
 0x14b   :  { %317 = vperm.xlu0 %2500, %v2657_v11  }
 0x14d   :  { %v170_v63 = vpop.permute.xlu1 %169 }
 0x14e   :  { %v233_v9 = vsub.f32 %v170_v63, %v2669_v22 }
 0x14f   :  { %325 = vperm.xlu0 %2500, %v2625_v6  }
 0x150   :  { %v249_v11 = vmul.f32 %v233_v9, %v233_v9  ;;  %v140_v9 = vmul.f32 %v124_v49, %v124_v49 }
 0x151   :  { %v178_v0 = vpop.permute.xlu1 %177 }
 0x152   :  { %v235_v13 = vsub.f32 %v178_v0, %v2669_v22  ;;  %v265_v16 = vadd.f32 %v249_v11, %v133_v14 }
 0x153   :  { %333 = vperm.xlu0 %2500, %v2631_v7   ;;  %v119_v7 = vsub.f32 %v50_v53, %v2665_v19 }
 0x154   :  { %v251_v17 = vmul.f32 %v235_v13, %v235_v13 }
 0x155   :  { %v182_v1 = vpop.permute.xlu1 %181  ;;  %v135_v24 = vmul.f32 %v119_v7, %v119_v7 }
 0x157   :  { %341 = vperm.xlu0 %2500, %v2637_v8   ;;  %v236_v8 = vsub.f32 %v182_v1, %v2669_v22  ;;  %v267_v30 = vadd.f32 %v251_v17, %v135_v24  ;;  %v126_v1 = vsub.f32 %v2734_v60, %v2665_v19  ;;  %v128_v60 = vsub.f32 %v2737_v61, %v2665_v19 }
 0x158   :  { %v130_v61 = vsub.f32 %v2740_v62, %v2665_v19 }
 0x159   :  { %v190_v2 = vpop.permute.xlu1 %189  ;;  %v252_v28 = vmul.f32 %v236_v8, %v236_v8  ;;  %v142_v7 = vmul.f32 %v126_v1, %v126_v1  ;;  %v118_v1 = vsub.f32 %v2763_v42, %v2665_v19 }
 0x15a   :  { %v238_v31 = vsub.f32 %v190_v2, %v2669_v22 }
 0x15b   :  { %v268_v41 = vadd.f32 %v252_v28, %v136_v36 }
 0x15c   :  { %v254_v43 = vmul.f32 %v238_v31, %v238_v31 }
 0x15d   :  { %v198_v3 = vpop.permute.xlu1 %197 }
 0x15e   :  { %v240_v44 = vsub.f32 %v198_v3, %v2669_v22  ;;  %v270_v54 = vadd.f32 %v254_v43, %v138_v48  ;;  %v2775_v3 = vpop.permute.xlu0 %89 }
 0x160   :  { %v256_v56 = vmul.f32 %v240_v44, %v240_v44 }
 0x161   :  { %v206_v4 = vpop.permute.xlu1 %205 }
 0x162   :  { %v242_v53 = vsub.f32 %v206_v4, %v2669_v22  ;;  %v272_v13 = vadd.f32 %v256_v56, %v140_v9 }
 0x164   :  { %v258_v11 = vmul.f32 %v242_v53, %v242_v53 }
 0x165   :  { %v214_v5 = vpop.permute.xlu1 %213 }
 0x166   :  { %v244_v4 = vsub.f32 %v214_v5, %v2669_v22  ;;  %v274_v17 = vadd.f32 %v258_v11, %v142_v7 }
 0x168   :  { %v260_v21 = vmul.f32 %v244_v4, %v244_v4 }
 0x169   :  { %v2747_v10 = vpop.permute.xlu1 %221 }
 0x16a   :  { %v246_v5 = vsub.f32 %v2747_v10, %v2669_v22 }
 0x16c   :  { %v262_v31 = vmul.f32 %v246_v5, %v246_v5 }
 0x16e   :  { %v286_v6 = vpop.permute.xlu1 %285 }
 0x16f   :  { %v349_v15 = vsub.f32 %v286_v6, %v2667_v20 }
 0x171   :  { %v365_v18 = vmul.f32 %v349_v15, %v349_v15 }
 0x172   :  { %v294_v23 = vpop.permute.xlu1 %293 }
 0x173   :  { %v381_v26 = vadd.f32 %v365_v18, %v265_v16  ;;  %v351_v27 = vsub.f32 %v294_v23, %v2667_v20  ;;  %v2784_v18 = vpop.permute.xlu0 %99 }
 0x175   :  { %v399_v32 = vsel %vm14_vm2, %v381_v26, 1e+30  ;;  %v367_v34 = vmul.f32 %v351_v27, %v351_v27  ;;  %v144_v27 = vmul.f32 %v128_v60, %v128_v60 }
 0x176   :  { %415 = vst [vmem:[#allocation2 + $0x8] sm:$0xff] %v399_v32  ;;  %v298_v37 = vpop.permute.xlu1 %297  ;;  %465 = vmin.xlane.f32.xlu0 %v464_v29 }
 0x177   :  { %v383_v39 = vadd.f32 %v367_v34, %v267_v30  ;;  %v352_v40 = vsub.f32 %v298_v37, %v2667_v20  ;;  %v276_v30 = vadd.f32 %v260_v21, %v144_v27  ;;  %v2795_v36 = vpop.permute.xlu0 %109  ;;  %v146_v37 = vmul.f32 %v130_v61, %v130_v61 }
 0x179   :  { %v401_v45 = vsel %vm14_vm2, %v383_v39, 1e+30  ;;  %v368_v46 = vmul.f32 %v352_v40, %v352_v40  ;;  %v278_v40 = vadd.f32 %v262_v31, %v146_v37 }
 0x17a   :  { %417 = vst [vmem:[#allocation2 + $0x18] sm:$0xff] %v401_v45  ;;  %v306_v47 = vpop.permute.xlu1 %305 }
 0x17b   :  { %v384_v51 = vadd.f32 %v368_v46, %v268_v41  ;;  %v354_v52 = vsub.f32 %v306_v47, %v2667_v20  ;;  %v174_v44 = vpop.permute.xlu0 %173 }
 0x17d   :  { %v402_v63 = vsel %vm14_vm2, %v384_v51, 1e+30  ;;  %v370_v0 = vmul.f32 %v354_v52, %v354_v52  ;;  %v450_v52 = vcvt.f32.s32 %v2722_v50  ;;  %v134_v50 = vmul.f32 %v118_v1, %v118_v1 }
 0x17e   :  { %418 = vst [vmem:[#allocation2 + $0x20] sm:$0xff] %v402_v63  ;;  %v314_v2 = vpop.permute.xlu1 %313 }
 0x17f   :  { %v386_v58 = vadd.f32 %v370_v0, %v270_v54  ;;  %v356_v12 = vsub.f32 %v314_v2, %v2667_v20  ;;  %v186_v46 = vpop.permute.xlu0 %185  ;;  %v451_v54 = vshll.u32 %v450_v52, 16  ;;  %v234_v2 = vsub.f32 %v174_v44, %v2669_v22 }
 0x180   :  { %v237_v11 = vsub.f32 %v186_v46, %v2669_v22  ;;  %v129_v46 = vsub.f32 %v2784_v18, %v2665_v19 }
 0x181   :  { %v404_v6 = vsel %vm14_vm2, %v386_v58, 1e+30  ;;  %v372_v14 = vmul.f32 %v356_v12, %v356_v12  ;;  %v250_v4 = vmul.f32 %v234_v2, %v234_v2 }
 0x182   :  { %420 = vst [vmem:[#allocation2 + $0x30] sm:$0xff] %v404_v6  ;;  %v322_v15 = vpop.permute.xlu1 %321  ;;  %v253_v60 = vmul.f32 %v237_v11, %v237_v11 }
 0x183   :  { %v388_v8 = vadd.f32 %v372_v14, %v272_v13  ;;  %v358_v16 = vsub.f32 %v322_v15, %v2667_v20  ;;  %v194_v47 = vpop.permute.xlu0 %193  ;;  %v121_v13 = vsub.f32 %v2725_v55, %v2665_v19 }
 0x185   :  { %v406_v23 = vsel %vm14_vm2, %v388_v8, 1e+30  ;;  %v374_v24 = vmul.f32 %v358_v16, %v358_v16  ;;  %v137_v42 = vmul.f32 %v121_v13, %v121_v13  ;;  %v239_v8 = vsub.f32 %v194_v47, %v2669_v22 }
 0x186   :  { %422 = vst [vmem:[#allocation2 + $0x40] sm:$0xff] %v406_v23  ;;  %v330_v26 = vpop.permute.xlu1 %329  ;;  %v266_v16 = vadd.f32 %v250_v4, %v134_v50 }
 0x187   :  { %v390_v28 = vadd.f32 %v374_v24, %v274_v17  ;;  %v360_v29 = vsub.f32 %v330_v26, %v2667_v20  ;;  %v202_v48 = vpop.permute.xlu0 %201  ;;  %v123_v17 = vsub.f32 %v2727_v57, %v2665_v19  ;;  %v269_v26 = vadd.f32 %v253_v60, %v137_v42 }
 0x188   :  { %v255_v27 = vmul.f32 %v239_v8, %v239_v8  ;;  %v241_v61 = vsub.f32 %v202_v48, %v2669_v22 }
 0x189   :  { %v408_v32 = vsel %vm14_vm2, %v390_v28, 1e+30  ;;  %v376_v34 = vmul.f32 %v360_v29, %v360_v29  ;;  %v139_v28 = vmul.f32 %v123_v17, %v123_v17  ;;  %v125_v29 = vsub.f32 %v2730_v59, %v2665_v19 }
 0x18a   :  { %424 = vst [vmem:[#allocation2 + $0x50] sm:$0xff] %v408_v32  ;;  %v338_v10 = vpop.permute.xlu1 %337  ;;  %v257_v37 = vmul.f32 %v241_v61, %v241_v61 }
 0x18b   :  { %v392_v38 = vadd.f32 %v376_v34, %v276_v30  ;;  %v362_v39 = vsub.f32 %v338_v10, %v2667_v20  ;;  %v210_v49 = vpop.permute.xlu0 %209  ;;  %v127_v10 = vsub.f32 %v2775_v3, %v2665_v19 }
 0x18d   :  { %v410_v62 = vsel %vm14_vm2, %v392_v38, 1e+30  ;;  %v378_v41 = vmul.f32 %v362_v39, %v362_v39  ;;  %v243_v38 = vsub.f32 %v210_v49, %v2669_v22  ;;  %v271_v39 = vadd.f32 %v255_v27, %v139_v28 }
 0x18e   :  { %426 = vst [vmem:[#allocation2 + $0x60] sm:$0xff] %v410_v62 }
 0x18f   :  { %v394_v43 = vadd.f32 %v378_v41, %v278_v40  ;;  %v218_v51 = vpop.permute.xlu0 %217  ;;  %v141_v40 = vmul.f32 %v125_v29, %v125_v29  ;;  %v259_v47 = vmul.f32 %v243_v38, %v243_v38 }
 0x190   :  { %v245_v48 = vsub.f32 %v218_v51, %v2669_v22 }
 0x191   :  { %v412_v45 = vsel %vm14_vm2, %v394_v43, 1e+30  ;;  %v273_v3 = vadd.f32 %v257_v37, %v141_v40 }
 0x192   :  { %428 = vst [vmem:[#allocation2 + $0x70] sm:$0xff] %v412_v45  ;;  %v143_v45 = vmul.f32 %v127_v10, %v127_v10  ;;  %v261_v1 = vmul.f32 %v245_v48, %v245_v48 }
 0x1ad   :  { %v448_v53 = vpop.xlane.xlu0 %447 }
 0x1ae   :  { %v449_v56 = vcvt.f32.s32 %v448_v53 }
 0x1b0   :  { %v452_v63 = vadd.s32 %v451_v54, %v449_v56 }
 0x1b2   :  { %v453_v0 = vrot.slane %v452_v63, 4 }
 0x1b4   :  { %vm454_vm6 = vcmp.lt.s32.totalorder %v452_v63, %v453_v0 }
 0x1b5   :  { %v226_v9 = vpop.permute.xlu0 %225  ;;  %v455_v58 = vsel %vm454_vm6, %v452_v63, %v453_v0  ;;  %v145_v63 = vmul.f32 %v129_v46, %v129_v46  ;;  %v275_v0 = vadd.f32 %v259_v47, %v143_v45 }
 0x1b6   :  { %v456_v12 = vrot.slane %v455_v58, 2  ;;  %v247_v2 = vsub.f32 %v226_v9, %v2669_v22 }
 0x1b7   :  { %v277_v50 = vadd.f32 %v261_v1, %v145_v63 }
 0x1b8   :  { %vm457_vm7 = vcmp.lt.s32.totalorder %v455_v58, %v456_v12  ;;  %v263_v4 = vmul.f32 %v247_v2, %v247_v2 }
 0x1b9   :  { %v458_v6 = vsel %vm457_vm7, %v455_v58, %v456_v12  ;;  %v131_v12 = vsub.f32 %v2795_v36, %v2665_v19 }
 0x1ba   :  { %v290_v14 = vpop.permute.xlu0 %289  ;;  %v459_v7 = vrot.slane %v458_v6, 1 }
 0x1bb   :  { %v350_v15 = vsub.f32 %v290_v14, %v2667_v20  ;;  %v147_v9 = vmul.f32 %v131_v12, %v131_v12 }
 0x1bc   :  { %vm460_vm8 = vcmp.lt.s32.totalorder %v458_v6, %v459_v7 }
 0x1bd   :  { %v366_v21 = vmul.f32 %v350_v15, %v350_v15  ;;  %v461_v5 = vsel %vm460_vm8, %v458_v6, %v459_v7  ;;  %v279_v60 = vadd.f32 %v263_v4, %v147_v9 }
 0x1be   :  { %2303 = vpush %v461_v5  ;;  %v302_v55 = vpop.permute.xlu0 %301 }
 0x1bf   :  { %v382_v23 = vadd.f32 %v366_v21, %v266_v16  ;;  %v353_v24 = vsub.f32 %v302_v55, %v2667_v20 }
 0x1c1   :  { %v400_v30 = vsel %vm14_vm2, %v382_v23, 1e+30  ;;  %v369_v31 = vmul.f32 %v353_v24, %v353_v24 }
 0x1c2   :  { %416 = vst [vmem:[#allocation2 + $0x10] sm:$0xff] %v400_v30  ;;  %v310_v57 = vpop.permute.xlu0 %309 }
 0x1c3   :  { %v385_v32 = vadd.f32 %v369_v31, %v269_v26  ;;  %v355_v34 = vsub.f32 %v310_v57, %v2667_v20 }
 0x1c5   :  { %v403_v59 = vsel %vm14_vm2, %v385_v32, 1e+30  ;;  %v371_v62 = vmul.f32 %v355_v34, %v355_v34 }
 0x1c6   :  { %419 = vst [vmem:[#allocation2 + $0x28] sm:$0xff] %v403_v59  ;;  %v318_v41 = vpop.permute.xlu0 %317 }
 0x1c7   :  { %v387_v43 = vadd.f32 %v371_v62, %v271_v39  ;;  %v357_v44 = vsub.f32 %v318_v41, %v2667_v20 }
 0x1c9   :  { %v405_v49 = vsel %vm14_vm2, %v387_v43, 1e+30  ;;  %v373_v52 = vmul.f32 %v357_v44, %v357_v44 }
 0x1ca   :  { %421 = vst [vmem:[#allocation2 + $0x38] sm:$0xff] %v405_v49  ;;  %v326_v53 = vpop.permute.xlu0 %325 }
 0x1cb   :  { %v389_v54 = vadd.f32 %v373_v52, %v273_v3  ;;  %v359_v56 = vsub.f32 %v326_v53, %v2667_v20 }
 0x1cd   :  { %v407_v18 = vsel %vm14_vm2, %v389_v54, 1e+30  ;;  %v375_v58 = vmul.f32 %v359_v56, %v359_v56 }
 0x1ce   :  { %423 = vst [vmem:[#allocation2 + $0x48] sm:$0xff] %v407_v18  ;;  %v334_v51 = vpop.permute.xlu0 %333 }
 0x1cf   :  { %v391_v11 = vadd.f32 %v375_v58, %v275_v0  ;;  %v361_v13 = vsub.f32 %v334_v51, %v2667_v20 }
 0x1d1   :  { %v409_v6 = vsel %vm14_vm2, %v391_v11, 1e+30  ;;  %v377_v14 = vmul.f32 %v361_v13, %v361_v13 }
 0x1d2   :  { %425 = vst [vmem:[#allocation2 + $0x58] sm:$0xff] %v409_v6  ;;  %v342_v22 = vpop.permute.xlu0 %341 }
 0x1d3   :  { %v393_v7 = vadd.f32 %v377_v14, %v277_v50  ;;  %v363_v15 = vsub.f32 %v342_v22, %v2667_v20 }
 0x1d5   :  { %v411_v42 = vsel %vm14_vm2, %v393_v7, 1e+30  ;;  %v379_v19 = vmul.f32 %v363_v15, %v363_v15 }
 0x1d6   :  { %427 = vst [vmem:[#allocation2 + $0x68] sm:$0xff] %v411_v42 }
 0x1d7   :  { %v395_v36 = vadd.f32 %v379_v19, %v279_v60 }
 0x1d9   :  { %v413_v8 = vsel %vm14_vm2, %v395_v36, 1e+30 }
 0x1da   :  { %429 = vst [vmem:[#allocation2 + $0x78] sm:$0xff] %v413_v8 }
 0x1ef   :  { %s2304_s0 = spop %2303 }
 0x1f0   :  { %s463_s14 = sand.u32 127, %s2304_s0 }
 0x1f1   :  { %v487_v16 = vstv %s463_s14  ;;  %s490_s15 = scalar_lea.vmem [#allocation2], %s463_s14 }
 0x1f2   :  { %vm488_vm9 = vcmp.eq.s32.totalorder %v2673_v25, %v487_v16  ;;  %v491_v17 = vld [vmem:[%s490_s15] sm:$0x1] }
 0x1f3   :  { %vm2848_vm10 = vmor %vm2681_vm3, %vm488_vm9  ;;  %v492_v21 = vmin.f32 %v2689_v35, %v491_v17 }
 0x1f5   :  { %v2855_v5 = vsel %vm2848_vm10, 1e+30, %v492_v21 }
 0x1f6   :  { %v495_v55 = vand.u32 4294967168, %v2855_v5  ;;  %v523_v41 = vsel %vm437_vm4, %v2855_v5, inf }
 0x1f8   :  { %v496_v23 = vor.u32 %v495_v55, %v2673_v25 }
 0x1fa   :  { %v497_v24 = vsel %vm437_vm4, %v496_v23, 2147483647 }
 0x1fb   :  { %v499_v26 = vshra.s32 %v497_v24, 16  ;;  %v498_v39 = vand.u32 65535, %v497_v24 }
 0x1fd   :  { %v501_v27 = vcvt.s32.f32 %v499_v26  ;;  %v500_v59 = vcvt.s32.f32 %v498_v39 }
 0x1ff   :  { %v466_v61 = vpop.xlane.xlu0 %465  ;;  %502 = vmin.xlane.f32.xlu1 %v501_v27 }
 0x200   :  { %v467_v33 = vrot.slane %v466_v61, 4 }
 0x202   :  { %v468_v28 = vmin.f32 %v466_v61, %v467_v33 }
 0x204   :  { %v469_v29 = vrot.slane %v468_v28, 2 }
 0x206   :  { %v470_v30 = vmin.f32 %v468_v28, %v469_v29 }
 0x208   :  { %v471_v31 = vrot.slane %v470_v30, 1 }
 0x20a   :  { %v472_v35 = vmin.f32 %v470_v30, %v471_v31 }
 0x20c   :  { %2305 = vpush %v472_v35 }
 0x23d   :  { %s2306_s16 = spop %2305 }
 0x23e   :  { %s474_s18 = smax.f32 %s2588_s17, %s2306_s16 }
 0x23f   :  { %v475_v57 = vstv %s474_s18 }
 0x240   :  { %2501 = vrsqrt.f32 %v475_v57  ;;  %vm478_vm11 = vcmp.eq.f32.partialorder %v475_v57, inf  ;;  %v481_v10 = vand.u32 2147483648, %v475_v57  ;;  %vm480_vm12 = vcmp.eq.f32.partialorder %v475_v57, 0.0 }
 0x24d   :  { %v2502_v32 = vpop.eup %2501 }
 0x24e   :  { %v477_v34 = vmul.f32 %v2502_v32, %v475_v57 }
 0x250   :  { %v479_v37 = vsel %vm478_vm11, %v475_v57, %v477_v34 }
 0x251   :  { %v482_v38 = vsel %vm480_vm12, %v481_v10, %v479_v37 }
 0x252   :  { %2307 = vpush %v482_v38 }
 0x283   :  { %s2863_s19 = spop %2307 }
 0x288   :  { %v503_v40 = vpop.xlane.xlu1 %502 }
 0x289   :  { %vm504_vm13 = vcmp.eq.f32.partialorder %v501_v27, %v503_v40  ;;  %v509_v43 = vcvt.f32.s32 %v503_v40 }
 0x28a   :  { %v505_v62 = vsel %vm504_vm13, %v500_v59, inf }
 0x28b   :  { %506 = vmin.xlane.f32.xlu0 %v505_v62  ;;  %v510_v45 = vshll.u32 %v509_v43, 16 }
 0x28f   :  { %524 = vmin.xlane.f32.xlu0 %v523_v41 }
 0x314   :  { %v507_v44 = vpop.xlane.xlu0 %506 }
 0x315   :  { %v508_v46 = vcvt.f32.s32 %v507_v44 }
 0x317   :  { %v511_v47 = vadd.s32 %v510_v45, %v508_v46 }
 0x318   :  { %v525_v3 = vpop.xlane.xlu0 %524 }
 0x319   :  { %v512_v48 = vrot.slane %v511_v47, 4  ;;  %v526_v49 = vrot.slane %v525_v3, 4 }
 0x31b   :  { %vm513_vm14 = vcmp.lt.s32.totalorder %v511_v47, %v512_v48  ;;  %v527_v52 = vmin.f32 %v525_v3, %v526_v49 }
 0x31c   :  { %v514_v53 = vsel %vm513_vm14, %v511_v47, %v512_v48 }
 0x31d   :  { %v528_v54 = vrot.slane %v527_v52, 2  ;;  %v515_v56 = vrot.slane %v514_v53, 2 }
 0x31f   :  { %vm516_vm15 = vcmp.lt.s32.totalorder %v514_v53, %v515_v56  ;;  %v529_v63 = vmin.f32 %v527_v52, %v528_v54 }
 0x320   :  { %v517_v0 = vsel %vm516_vm15, %v514_v53, %v515_v56 }
 0x321   :  { %v518_v1 = vrot.slane %v517_v0, 1  ;;  %v530_v2 = vrot.slane %v529_v63, 1 }
 0x323   :  { %vm519_vm1 = vcmp.lt.s32.totalorder %v517_v0, %v518_v1  ;;  %v531_v18 = vmin.f32 %v529_v63, %v530_v2 }
 0x324   :  { %v520_v58 = vsel %vm519_vm1, %v517_v0, %v518_v1 }
 0x325   :  { %2309 = vpush %v520_v58 }
 0x326   :  { %2311 = vpush %v531_v18 }
 0x356   :  { %s2310_s20 = spop %2309 }
 0x357   :  { %s522_s21 = sand.u32 127, %s2310_s20  ;;  %s2312_s22 = spop %2311 }
 0x358   :  { %v547_v51 = vstv %s522_s21  ;;  %s533_s23 = smax.f32 %s2588_s17, %s2312_s22  ;;  %s550_s24 = scalar_lea.vmem [#allocation2], %s522_s21 }
 0x359   :  { %vm548_vm2 = vcmp.eq.s32.totalorder %v2673_v25, %v547_v51  ;;  %v551_v12 = vld [vmem:[%s550_s24] sm:$0x1]  ;;  %v534_v11 = vstv %s533_s23 }
 0x35a   :  { %vm2869_vm3 = vmor %vm2848_vm10, %vm548_vm2  ;;  %v552_v50 = vmin.f32 %v2855_v5, %v551_v12  ;;  %2503 = vrsqrt.f32 %v534_v11  ;;  %vm537_vm5 = vcmp.eq.f32.partialorder %v534_v11, inf  ;;  %v540_v42 = vand.u32 2147483648, %v534_v11 }
 0x35b   :  { %vm539_vm6 = vcmp.eq.f32.partialorder %v534_v11, 0.0 }
 0x35c   :  { %v553_v4 = vsel %vm2869_vm3, 1e+30, %v552_v50 }
 0x35d   :  { %v555_v6 = vand.u32 4294967168, %v553_v4  ;;  %v583_v21 = vsel %vm437_vm4, %v553_v4, inf }
 0x35f   :  { %v556_v14 = vor.u32 %v555_v6, %v2673_v25 }
 0x361   :  { %v557_v22 = vsel %vm437_vm4, %v556_v14, 2147483647 }
 0x362   :  { %v559_v9 = vshra.s32 %v557_v22, 16  ;;  %v558_v8 = vand.u32 65535, %v557_v22 }
 0x364   :  { %v561_v7 = vcvt.s32.f32 %v559_v9  ;;  %v560_v17 = vcvt.s32.f32 %v558_v8 }
 0x366   :  { %562 = vmin.xlane.f32.xlu1 %v561_v7 }
 0x367   :  { %v2504_v15 = vpop.eup %2503 }
 0x368   :  { %v536_v60 = vmul.f32 %v2504_v15, %v534_v11 }
 0x36a   :  { %v538_v19 = vsel %vm537_vm5, %v534_v11, %v536_v60 }
 0x36b   :  { %v541_v36 = vsel %vm539_vm6, %v540_v42, %v538_v19 }
 0x36c   :  { %2313 = vpush %v541_v36 }
 0x39d   :  { %s2879_s25 = spop %2313 }
 0x3ef   :  { %v563_v16 = vpop.xlane.xlu1 %562 }
 0x3f0   :  { %vm564_vm7 = vcmp.eq.f32.partialorder %v561_v7, %v563_v16  ;;  %v569_v5 = vcvt.f32.s32 %v563_v16 }
 0x3f1   :  { %v565_v20 = vsel %vm564_vm7, %v560_v17, inf }
 0x3f2   :  { %566 = vmin.xlane.f32.xlu1 %v565_v20  ;;  %v570_v23 = vshll.u32 %v569_v5, 16 }
 0x3f6   :  { %584 = vmin.xlane.f32.xlu1 %v583_v21 }
 0x47b   :  { %v567_v55 = vpop.xlane.xlu1 %566 }
 0x47c   :  { %v568_v24 = vcvt.f32.s32 %v567_v55 }
 0x47e   :  { %v571_v26 = vadd.s32 %v570_v23, %v568_v24 }
 0x47f   :  { %v585_v27 = vpop.xlane.xlu1 %584 }
 0x480   :  { %v572_v61 = vrot.slane %v571_v26, 4  ;;  %v586_v33 = vrot.slane %v585_v27, 4 }
 0x482   :  { %vm573_vm8 = vcmp.lt.s32.totalorder %v571_v26, %v572_v61  ;;  %v587_v28 = vmin.f32 %v585_v27, %v586_v33 }
 0x483   :  { %v574_v29 = vsel %vm573_vm8, %v571_v26, %v572_v61 }
 0x484   :  { %v588_v30 = vrot.slane %v587_v28, 2  ;;  %v575_v31 = vrot.slane %v574_v29, 2 }
 0x486   :  { %vm576_vm9 = vcmp.lt.s32.totalorder %v574_v29, %v575_v31  ;;  %v589_v35 = vmin.f32 %v587_v28, %v588_v30 }
 0x487   :  { %v577_v57 = vsel %vm576_vm9, %v574_v29, %v575_v31 }
 0x488   :  { %v578_v32 = vrot.slane %v577_v57, 1  ;;  %v590_v34 = vrot.slane %v589_v35, 1 }
 0x48a   :  { %vm579_vm10 = vcmp.lt.s32.totalorder %v577_v57, %v578_v32  ;;  %v591_v10 = vmin.f32 %v589_v35, %v590_v34 }
 0x48b   :  { %v580_v37 = vsel %vm579_vm10, %v577_v57, %v578_v32 }
 0x48c   :  { %2315 = vpush %v580_v37 }
 0x48d   :  { %2317 = vpush %v591_v10 }
 0x4bd   :  { %s2316_s26 = spop %2315 }
 0x4be   :  { %s582_s27 = sand.u32 127, %s2316_s26  ;;  %s2318_s28 = spop %2317 }
 0x4bf   :  { %v607_v38 = vstv %s582_s27  ;;  %s593_s1 = smax.f32 %s2588_s17, %s2318_s28  ;;  %s610_s29 = scalar_lea.vmem [#allocation2], %s582_s27 }
 0x4c0   :  { %vm608_vm11 = vcmp.eq.s32.totalorder %v2673_v25, %v607_v38  ;;  %v611_v39 = vld [vmem:[%s610_s29] sm:$0x1]  ;;  %v594_v40 = vstv %s593_s1 }
 0x4c1   :  { %vm2885_vm12 = vmor %vm2869_vm3, %vm608_vm11  ;;  %v612_v62 = vmin.f32 %v553_v4, %v611_v39  ;;  %2505 = vrsqrt.f32 %v594_v40  ;;  %vm597_vm13 = vcmp.eq.f32.partialorder %v594_v40, inf  ;;  %v600_v49 = vand.u32 2147483648, %v594_v40 }
 0x4c2   :  { %vm599_vm14 = vcmp.eq.f32.partialorder %v594_v40, 0.0 }
 0x4c3   :  { %v613_v41 = vsel %vm2885_vm12, 1e+30, %v612_v62 }
 0x4c4   :  { %v615_v43 = vand.u32 4294967168, %v613_v41  ;;  %v643_v1 = vsel %vm437_vm4, %v613_v41, inf }
 0x4c6   :  { %v616_v44 = vor.u32 %v615_v43, %v2673_v25 }
 0x4c8   :  { %v617_v45 = vsel %vm437_vm4, %v616_v44, 2147483647 }
 0x4c9   :  { %v619_v46 = vshra.s32 %v617_v45, 16  ;;  %v618_v54 = vand.u32 65535, %v617_v45 }
 0x4cb   :  { %v621_v47 = vcvt.s32.f32 %v619_v46  ;;  %v620_v63 = vcvt.s32.f32 %v618_v54 }
 0x4cd   :  { %622 = vmin.xlane.f32.xlu0 %v621_v47 }
 0x4ce   :  { %v2506_v3 = vpop.eup %2505 }
 0x4cf   :  { %v596_v48 = vmul.f32 %v2506_v3, %v594_v40 }
 0x4d1   :  { %v598_v52 = vsel %vm597_vm13, %v594_v40, %v596_v48 }
 0x4d2   :  { %v601_v53 = vsel %vm599_vm14, %v600_v49, %v598_v52 }
 0x4d3   :  { %2319 = vpush %v601_v53 }
 0x504   :  { %s2894_s30 = spop %2319 }
 0x556   :  { %v623_v56 = vpop.xlane.xlu0 %622 }
 0x557   :  { %vm624_vm15 = vcmp.eq.f32.partialorder %v621_v47, %v623_v56  ;;  %v629_v2 = vcvt.f32.s32 %v623_v56 }
 0x558   :  { %v625_v0 = vsel %vm624_vm15, %v620_v63, inf }
 0x559   :  { %626 = vmin.xlane.f32.xlu0 %v625_v0  ;;  %v630_v58 = vshll.u32 %v629_v2, 16 }
 0x55d   :  { %644 = vmin.xlane.f32.xlu0 %v643_v1 }
 0x5e2   :  { %v627_v18 = vpop.xlane.xlu0 %626 }
 0x5e3   :  { %v628_v51 = vcvt.f32.s32 %v627_v18 }
 0x5e5   :  { %v631_v12 = vadd.s32 %v630_v58, %v628_v51 }
 0x5e6   :  { %v645_v11 = vpop.xlane.xlu0 %644 }
 0x5e7   :  { %v632_v13 = vrot.slane %v631_v12, 4  ;;  %v646_v50 = vrot.slane %v645_v11, 4 }
 0x5e9   :  { %vm633_vm1 = vcmp.lt.s32.totalorder %v631_v12, %v632_v13  ;;  %v647_v4 = vmin.f32 %v645_v11, %v646_v50 }
 0x5ea   :  { %v634_v6 = vsel %vm633_vm1, %v631_v12, %v632_v13 }
 0x5eb   :  { %v648_v14 = vrot.slane %v647_v4, 2  ;;  %v635_v22 = vrot.slane %v634_v6, 2 }
 0x5ed   :  { %vm636_vm2 = vcmp.lt.s32.totalorder %v634_v6, %v635_v22  ;;  %v649_v9 = vmin.f32 %v647_v4, %v648_v14 }
 0x5ee   :  { %v637_v7 = vsel %vm636_vm2, %v634_v6, %v635_v22 }
 0x5ef   :  { %v638_v15 = vrot.slane %v637_v7, 1  ;;  %v650_v60 = vrot.slane %v649_v9, 1 }
 0x5f1   :  { %vm639_vm3 = vcmp.lt.s32.totalorder %v637_v7, %v638_v15  ;;  %v651_v42 = vmin.f32 %v649_v9, %v650_v60 }
 0x5f2   :  { %v640_v19 = vsel %vm639_vm3, %v637_v7, %v638_v15 }
 0x5f3   :  { %2321 = vpush %v640_v19 }
 0x5f4   :  { %2323 = vpush %v651_v42 }
 0x624   :  { %s2322_s3 = spop %2321 }
 0x625   :  { %s642_s4 = sand.u32 127, %s2322_s3  ;;  %s2324_s5 = spop %2323 }
 0x626   :  { %v667_v36 = vstv %s642_s4  ;;  %s653_s6 = smax.f32 %s2588_s17, %s2324_s5  ;;  %s670_s7 = scalar_lea.vmem [#allocation2], %s642_s4 }
 0x627   :  { %vm668_vm5 = vcmp.eq.s32.totalorder %v2673_v25, %v667_v36  ;;  %v671_v8 = vld [vmem:[%s670_s7] sm:$0x1]  ;;  %v654_v16 = vstv %s653_s6 }
 0x628   :  { %vm2900_vm6 = vmor %vm2885_vm12, %vm668_vm5  ;;  %v672_v20 = vmin.f32 %v613_v41, %v671_v8  ;;  %2507 = vrsqrt.f32 %v654_v16  ;;  %vm657_vm7 = vcmp.eq.f32.partialorder %v654_v16, inf  ;;  %v660_v33 = vand.u32 2147483648, %v654_v16 }
 0x629   :  { %vm659_vm8 = vcmp.eq.f32.partialorder %v654_v16, 0.0 }
 0x62a   :  { %v673_v21 = vsel %vm2900_vm6, 1e+30, %v672_v20 }
 0x62b   :  { %v675_v5 = vand.u32 4294967168, %v673_v21  ;;  %v703_v32 = vsel %vm437_vm4, %v673_v21, inf }
 0x62d   :  { %v676_v55 = vor.u32 %v675_v5, %v2673_v25 }
 0x62f   :  { %v677_v23 = vsel %vm437_vm4, %v676_v55, 2147483647 }
 0x630   :  { %v679_v24 = vshra.s32 %v677_v23, 16  ;;  %v678_v30 = vand.u32 65535, %v677_v23 }
 0x632   :  { %v681_v26 = vcvt.s32.f32 %v679_v24  ;;  %v680_v35 = vcvt.s32.f32 %v678_v30 }
 0x634   :  { %682 = vmin.xlane.f32.xlu1 %v681_v26 }
 0x635   :  { %v2508_v27 = vpop.eup %2507 }
 0x636   :  { %v656_v61 = vmul.f32 %v2508_v27, %v654_v16 }
 0x638   :  { %v658_v28 = vsel %vm657_vm7, %v654_v16, %v656_v61 }
 0x639   :  { %v661_v29 = vsel %vm659_vm8, %v660_v33, %v658_v28 }
 0x63a   :  { %2325 = vpush %v661_v29 }
 0x66b   :  { %s2909_s8 = spop %2325 }
 0x6bd   :  { %v683_v31 = vpop.xlane.xlu1 %682 }
 0x6be   :  { %vm684_vm9 = vcmp.eq.f32.partialorder %v681_v26, %v683_v31  ;;  %v689_v34 = vcvt.f32.s32 %v683_v31 }
 0x6bf   :  { %v685_v57 = vsel %vm684_vm9, %v680_v35, inf }
 0x6c0   :  { %686 = vmin.xlane.f32.xlu1 %v685_v57  ;;  %v690_v37 = vshll.u32 %v689_v34, 16 }
 0x6c4   :  { %704 = vmin.xlane.f32.xlu1 %v703_v32 }
 0x749   :  { %v687_v10 = vpop.xlane.xlu1 %686 }
 0x74a   :  { %v688_v38 = vcvt.f32.s32 %v687_v10 }
 0x74c   :  { %v691_v39 = vadd.s32 %v690_v37, %v688_v38 }
 0x74d   :  { %v705_v40 = vpop.xlane.xlu1 %704 }
 0x74e   :  { %v692_v59 = vrot.slane %v691_v39, 4  ;;  %v706_v62 = vrot.slane %v705_v40, 4 }
 0x750   :  { %vm693_vm10 = vcmp.lt.s32.totalorder %v691_v39, %v692_v59  ;;  %v707_v41 = vmin.f32 %v705_v40, %v706_v62 }
 0x751   :  { %v694_v43 = vsel %vm693_vm10, %v691_v39, %v692_v59 }
 0x752   :  { %v708_v44 = vrot.slane %v707_v41, 2  ;;  %v695_v45 = vrot.slane %v694_v43, 2 }
 0x754   :  { %vm696_vm11 = vcmp.lt.s32.totalorder %v694_v43, %v695_v45  ;;  %v709_v46 = vmin.f32 %v707_v41, %v708_v44 }
 0x755   :  { %v697_v47 = vsel %vm696_vm11, %v694_v43, %v695_v45 }
 0x756   :  { %v698_v3 = vrot.slane %v697_v47, 1  ;;  %v710_v48 = vrot.slane %v709_v46, 1 }
 0x758   :  { %vm699_vm12 = vcmp.lt.s32.totalorder %v697_v47, %v698_v3  ;;  %v711_v49 = vmin.f32 %v709_v46, %v710_v48 }
 0x759   :  { %v700_v52 = vsel %vm699_vm12, %v697_v47, %v698_v3 }
 0x75a   :  { %2327 = vpush %v700_v52 }
 0x75b   :  { %2329 = vpush %v711_v49 }
 0x78b   :  { %s2328_s9 = spop %2327 }
 0x78c   :  { %s702_s10 = sand.u32 127, %s2328_s9  ;;  %s2330_s11 = spop %2329 }
 0x78d   :  { %v727_v53 = vstv %s702_s10  ;;  %s713_s12 = smax.f32 %s2588_s17, %s2330_s11  ;;  %s730_s13 = scalar_lea.vmem [#allocation2], %s702_s10 }
 0x78e   :  { %vm728_vm13 = vcmp.eq.s32.totalorder %v2673_v25, %v727_v53  ;;  %v731_v54 = vld [vmem:[%s730_s13] sm:$0x1]  ;;  %v714_v56 = vstv %s713_s12 }
 0x78f   :  { %vm2915_vm14 = vmor %vm2900_vm6, %vm728_vm13  ;;  %v732_v0 = vmin.f32 %v673_v21, %v731_v54  ;;  %2509 = vrsqrt.f32 %v714_v56  ;;  %vm717_vm15 = vcmp.eq.f32.partialorder %v714_v56, inf  ;;  %v720_v50 = vand.u32 2147483648, %v714_v56 }
 0x790   :  { %vm719_vm1 = vcmp.eq.f32.partialorder %v714_v56, 0.0 }
 0x791   :  { %v733_v1 = vsel %vm2915_vm14, 1e+30, %v732_v0 }
 0x792   :  { %v735_v2 = vand.u32 4294967168, %v733_v1  ;;  %v763_v15 = vsel %vm437_vm4, %v733_v1, inf }
 0x794   :  { %v736_v18 = vor.u32 %v735_v2, %v2673_v25 }
 0x796   :  { %v737_v58 = vsel %vm437_vm4, %v736_v18, 2147483647 }
 0x797   :  { %v739_v51 = vshra.s32 %v737_v58, 16  ;;  %v738_v14 = vand.u32 65535, %v737_v58 }
 0x799   :  { %v741_v12 = vcvt.s32.f32 %v739_v51  ;;  %v740_v9 = vcvt.s32.f32 %v738_v14 }
 0x79b   :  { %742 = vmin.xlane.f32.xlu0 %v741_v12 }
 0x79c   :  { %v2510_v11 = vpop.eup %2509 }
 0x79d   :  { %v716_v13 = vmul.f32 %v2510_v11, %v714_v56 }
 0x79f   :  { %v718_v4 = vsel %vm717_vm15, %v714_v56, %v716_v13 }
 0x7a0   :  { %v721_v6 = vsel %vm719_vm1, %v720_v50, %v718_v4 }
 0x7a1   :  { %2331 = vpush %v721_v6 }
 0x7d2   :  { %s2924_s0 = spop %2331 }
 0x824   :  { %v743_v22 = vpop.xlane.xlu0 %742 }
 0x825   :  { %vm744_vm2 = vcmp.eq.f32.partialorder %v741_v12, %v743_v22  ;;  %v749_v60 = vcvt.f32.s32 %v743_v22 }
 0x826   :  { %v745_v7 = vsel %vm744_vm2, %v740_v9, inf }
 0x827   :  { %746 = vmin.xlane.f32.xlu0 %v745_v7  ;;  %v750_v19 = vshll.u32 %v749_v60, 16 }
 0x82b   :  { %764 = vmin.xlane.f32.xlu0 %v763_v15 }
 0x8b0   :  { %v747_v42 = vpop.xlane.xlu0 %746 }
 0x8b1   :  { %v748_v36 = vcvt.f32.s32 %v747_v42 }
 0x8b3   :  { %v751_v8 = vadd.s32 %v750_v19, %v748_v36 }
 0x8b4   :  { %v765_v16 = vpop.xlane.xlu0 %764 }
 0x8b5   :  { %v752_v17 = vrot.slane %v751_v8, 4  ;;  %v766_v20 = vrot.slane %v765_v16, 4 }
 0x8b7   :  { %vm753_vm3 = vcmp.lt.s32.totalorder %v751_v8, %v752_v17  ;;  %v767_v21 = vmin.f32 %v765_v16, %v766_v20 }
 0x8b8   :  { %v754_v5 = vsel %vm753_vm3, %v751_v8, %v752_v17 }
 0x8b9   :  { %v768_v55 = vrot.slane %v767_v21, 2  ;;  %v755_v23 = vrot.slane %v754_v5, 2 }
 0x8bb   :  { %vm756_vm5 = vcmp.lt.s32.totalorder %v754_v5, %v755_v23  ;;  %v769_v24 = vmin.f32 %v767_v21, %v768_v55 }
 0x8bc   :  { %v757_v26 = vsel %vm756_vm5, %v754_v5, %v755_v23 }
 0x8bd   :  { %v758_v27 = vrot.slane %v757_v26, 1  ;;  %v770_v61 = vrot.slane %v769_v24, 1 }
 0x8bf   :  { %vm759_vm6 = vcmp.lt.s32.totalorder %v757_v26, %v758_v27  ;;  %v771_v33 = vmin.f32 %v769_v24, %v770_v61 }
 0x8c0   :  { %v760_v28 = vsel %vm759_vm6, %v757_v26, %v758_v27 }
 0x8c1   :  { %2333 = vpush %v760_v28 }
 0x8c2   :  { %2335 = vpush %v771_v33 }
 0x8f2   :  { %s2334_s14 = spop %2333 }
 0x8f3   :  { %s762_s15 = sand.u32 127, %s2334_s14  ;;  %s2336_s16 = spop %2335 }
 0x8f4   :  { %v787_v29 = vstv %s762_s15  ;;  %s773_s18 = smax.f32 %s2588_s17, %s2336_s16  ;;  %s790_s20 = scalar_lea.vmem [#allocation2], %s762_s15 }
 0x8f5   :  { %vm788_vm7 = vcmp.eq.s32.totalorder %v2673_v25, %v787_v29  ;;  %v791_v30 = vld [vmem:[%s790_s20] sm:$0x1]  ;;  %v774_v31 = vstv %s773_s18 }
 0x8f6   :  { %vm2930_vm8 = vmor %vm2915_vm14, %vm788_vm7  ;;  %v792_v57 = vmin.f32 %v733_v1, %v791_v30  ;;  %2511 = vrsqrt.f32 %v774_v31  ;;  %vm777_vm9 = vcmp.eq.f32.partialorder %v774_v31, inf  ;;  %v780_v62 = vand.u32 2147483648, %v774_v31 }
 0x8f7   :  { %vm779_vm10 = vcmp.eq.f32.partialorder %v774_v31, 0.0 }
 0x8f8   :  { %v793_v32 = vsel %vm2930_vm8, 1e+30, %v792_v57 }
 0x8f9   :  { %v795_v34 = vand.u32 4294967168, %v793_v32  ;;  %v823_v3 = vsel %vm437_vm4, %v793_v32, inf }
 0x8fb   :  { %v796_v10 = vor.u32 %v795_v34, %v2673_v25 }
 0x8fd   :  { %v797_v37 = vsel %vm437_vm4, %v796_v10, 2147483647 }
 0x8fe   :  { %v799_v38 = vshra.s32 %v797_v37, 16  ;;  %v798_v44 = vand.u32 65535, %v797_v37 }
 0x900   :  { %v801_v39 = vcvt.s32.f32 %v799_v38  ;;  %v800_v46 = vcvt.s32.f32 %v798_v44 }
 0x902   :  { %802 = vmin.xlane.f32.xlu1 %v801_v39 }
 0x903   :  { %v2512_v40 = vpop.eup %2511 }
 0x904   :  { %v776_v59 = vmul.f32 %v2512_v40, %v774_v31 }
 0x906   :  { %v778_v41 = vsel %vm777_vm9, %v774_v31, %v776_v59 }
 0x907   :  { %v781_v43 = vsel %vm779_vm10, %v780_v62, %v778_v41 }
 0x908   :  { %2337 = vpush %v781_v43 }
 0x939   :  { %s2939_s21 = spop %2337 }
 0x98b   :  { %v803_v45 = vpop.xlane.xlu1 %802 }
 0x98c   :  { %vm804_vm11 = vcmp.eq.f32.partialorder %v801_v39, %v803_v45  ;;  %v809_v48 = vcvt.f32.s32 %v803_v45 }
 0x98d   :  { %v805_v47 = vsel %vm804_vm11, %v800_v46, inf }
 0x98e   :  { %806 = vmin.xlane.f32.xlu1 %v805_v47  ;;  %v810_v52 = vshll.u32 %v809_v48, 16 }
 0x992   :  { %824 = vmin.xlane.f32.xlu1 %v823_v3 }
 0xa17   :  { %v807_v49 = vpop.xlane.xlu1 %806 }
 0xa18   :  { %v808_v53 = vcvt.f32.s32 %v807_v49 }
 0xa1a   :  { %v811_v54 = vadd.s32 %v810_v52, %v808_v53 }
 0xa1b   :  { %v825_v56 = vpop.xlane.xlu1 %824 }
 0xa1c   :  { %v812_v63 = vrot.slane %v811_v54, 4  ;;  %v826_v0 = vrot.slane %v825_v56, 4 }
 0xa1e   :  { %vm813_vm12 = vcmp.lt.s32.totalorder %v811_v54, %v812_v63  ;;  %v827_v1 = vmin.f32 %v825_v56, %v826_v0 }
 0xa1f   :  { %v814_v2 = vsel %vm813_vm12, %v811_v54, %v812_v63 }
 0xa20   :  { %v828_v18 = vrot.slane %v827_v1, 2  ;;  %v815_v58 = vrot.slane %v814_v2, 2 }
 0xa22   :  { %vm816_vm13 = vcmp.lt.s32.totalorder %v814_v2, %v815_v58  ;;  %v829_v51 = vmin.f32 %v827_v1, %v828_v18 }
 0xa23   :  { %v817_v12 = vsel %vm816_vm13, %v814_v2, %v815_v58 }
 0xa24   :  { %v818_v11 = vrot.slane %v817_v12, 1  ;;  %v830_v13 = vrot.slane %v829_v51, 1 }
 0xa26   :  { %vm819_vm14 = vcmp.lt.s32.totalorder %v817_v12, %v818_v11  ;;  %v831_v50 = vmin.f32 %v829_v51, %v830_v13 }
 0xa27   :  { %v820_v4 = vsel %vm819_vm14, %v817_v12, %v818_v11 }
 0xa28   :  { %2339 = vpush %v820_v4 }
 0xa29   :  { %2341 = vpush %v831_v50 }
 0xa59   :  { %s2340_s22 = spop %2339 }
 0xa5a   :  { %s822_s23 = sand.u32 127, %s2340_s22  ;;  %s2342_s24 = spop %2341 }
 0xa5b   :  { %v847_v6 = vstv %s822_s23  ;;  %s833_s26 = smax.f32 %s2588_s17, %s2342_s24  ;;  %s850_s27 = scalar_lea.vmem [#allocation2], %s822_s23 }
 0xa5c   :  { %vm848_vm15 = vcmp.eq.s32.totalorder %v2673_v25, %v847_v6  ;;  %v851_v14 = vld [vmem:[%s850_s27] sm:$0x1]  ;;  %v834_v22 = vstv %s833_s26 }
 0xa5d   :  { %vm2945_vm1 = vmor %vm2930_vm8, %vm848_vm15  ;;  %v852_v7 = vmin.f32 %v793_v32, %v851_v14  ;;  %2513 = vrsqrt.f32 %v834_v22  ;;  %vm837_vm2 = vcmp.eq.f32.partialorder %v834_v22, inf  ;;  %v840_v20 = vand.u32 2147483648, %v834_v22 }
 0xa5e   :  { %vm839_vm3 = vcmp.eq.f32.partialorder %v834_v22, 0.0 }
 0xa5f   :  { %v853_v15 = vsel %vm2945_vm1, 1e+30, %v852_v7 }
 0xa60   :  { %v855_v60 = vand.u32 4294967168, %v853_v15  ;;  %v883_v27 = vsel %vm437_vm4, %v853_v15, inf }
 0xa62   :  { %v856_v42 = vor.u32 %v855_v60, %v2673_v25 }
 0xa64   :  { %v857_v19 = vsel %vm437_vm4, %v856_v42, 2147483647 }
 0xa65   :  { %v859_v36 = vshra.s32 %v857_v19, 16  ;;  %v858_v55 = vand.u32 65535, %v857_v19 }
 0xa67   :  { %v861_v8 = vcvt.s32.f32 %v859_v36  ;;  %v860_v24 = vcvt.s32.f32 %v858_v55 }
 0xa69   :  { %862 = vmin.xlane.f32.xlu0 %v861_v8 }
 0xa6a   :  { %v2514_v16 = vpop.eup %2513 }
 0xa6b   :  { %v836_v17 = vmul.f32 %v2514_v16, %v834_v22 }
 0xa6d   :  { %v838_v21 = vsel %vm837_vm2, %v834_v22, %v836_v17 }
 0xa6e   :  { %v841_v5 = vsel %vm839_vm3, %v840_v20, %v838_v21 }
 0xa6f   :  { %2343 = vpush %v841_v5 }
 0xaa0   :  { %s2954_s28 = spop %2343 }
 0xaf2   :  { %v863_v23 = vpop.xlane.xlu0 %862 }
 0xaf3   :  { %vm864_vm5 = vcmp.eq.f32.partialorder %v861_v8, %v863_v23  ;;  %v869_v61 = vcvt.f32.s32 %v863_v23 }
 0xaf4   :  { %v865_v26 = vsel %vm864_vm5, %v860_v24, inf }
 0xaf5   :  { %866 = vmin.xlane.f32.xlu0 %v865_v26  ;;  %v870_v28 = vshll.u32 %v869_v61, 16 }
 0xaf9   :  { %884 = vmin.xlane.f32.xlu0 %v883_v27 }
 0xb7e   :  { %v867_v33 = vpop.xlane.xlu0 %866 }
 0xb7f   :  { %v868_v29 = vcvt.f32.s32 %v867_v33 }
 0xb81   :  { %v871_v30 = vadd.s32 %v870_v28, %v868_v29 }
 0xb82   :  { %v885_v31 = vpop.xlane.xlu0 %884 }
 0xb83   :  { %v872_v35 = vrot.slane %v871_v30, 4  ;;  %v886_v57 = vrot.slane %v885_v31, 4 }
 0xb85   :  { %vm873_vm6 = vcmp.lt.s32.totalorder %v871_v30, %v872_v35  ;;  %v887_v32 = vmin.f32 %v885_v31, %v886_v57 }
 0xb86   :  { %v874_v34 = vsel %vm873_vm6, %v871_v30, %v872_v35 }
 0xb87   :  { %v888_v10 = vrot.slane %v887_v32, 2  ;;  %v875_v37 = vrot.slane %v874_v34, 2 }
 0xb89   :  { %vm876_vm7 = vcmp.lt.s32.totalorder %v874_v34, %v875_v37  ;;  %v889_v38 = vmin.f32 %v887_v32, %v888_v10 }
 0xb8a   :  { %v877_v39 = vsel %vm876_vm7, %v874_v34, %v875_v37 }
 0xb8b   :  { %v878_v40 = vrot.slane %v877_v39, 1  ;;  %v890_v59 = vrot.slane %v889_v38, 1 }
 0xb8d   :  { %vm879_vm8 = vcmp.lt.s32.totalorder %v877_v39, %v878_v40  ;;  %v891_v62 = vmin.f32 %v889_v38, %v890_v59 }
 0xb8e   :  { %v880_v41 = vsel %vm879_vm8, %v877_v39, %v878_v40 }
 0xb8f   :  { %2345 = vpush %v880_v41 }
 0xb90   :  { %2347 = vpush %v891_v62 }
 0xbc0   :  { %s2346_s1 = spop %2345 }
 0xbc1   :  { %s882_s29 = sand.u32 127, %s2346_s1  ;;  %s2348_s3 = spop %2347 }
 0xbc2   :  { %v907_v43 = vstv %s882_s29  ;;  %s893_s4 = smax.f32 %s2588_s17, %s2348_s3  ;;  %s910_s5 = scalar_lea.vmem [#allocation2], %s882_s29 }
 0xbc3   :  { %vm908_vm9 = vcmp.eq.s32.totalorder %v2673_v25, %v907_v43  ;;  %v911_v44 = vld [vmem:[%s910_s5] sm:$0x1]  ;;  %v894_v45 = vstv %s893_s4 }
 0xbc4   :  { %vm2960_vm10 = vmor %vm2945_vm1, %vm908_vm9  ;;  %v912_v47 = vmin.f32 %v853_v15, %v911_v44  ;;  %2515 = vrsqrt.f32 %v894_v45  ;;  %vm897_vm11 = vcmp.eq.f32.partialorder %v894_v45, inf  ;;  %v900_v0 = vand.u32 2147483648, %v894_v45 }
 0xbc5   :  { %vm899_vm12 = vcmp.eq.f32.partialorder %v894_v45, 0.0 }
 0xbc6   :  { %v913_v3 = vsel %vm2960_vm10, 1e+30, %v912_v47 }
 0xbc7   :  { %v915_v48 = vand.u32 4294967168, %v913_v3  ;;  %v943_v11 = vsel %vm437_vm4, %v913_v3, inf }
 0xbc9   :  { %v916_v49 = vor.u32 %v915_v48, %v2673_v25 }
 0xbcb   :  { %v917_v52 = vsel %vm437_vm4, %v916_v49, 2147483647 }
 0xbcc   :  { %v919_v53 = vshra.s32 %v917_v52, 16  ;;  %v918_v18 = vand.u32 65535, %v917_v52 }
 0xbce   :  { %v921_v54 = vcvt.s32.f32 %v919_v53  ;;  %v920_v51 = vcvt.s32.f32 %v918_v18 }
 0xbd0   :  { %922 = vmin.xlane.f32.xlu1 %v921_v54 }
 0xbd1   :  { %v2516_v56 = vpop.eup %2515 }
 0xbd2   :  { %v896_v63 = vmul.f32 %v2516_v56, %v894_v45 }
 0xbd4   :  { %v898_v1 = vsel %vm897_vm11, %v894_v45, %v896_v63 }
 0xbd5   :  { %v901_v2 = vsel %vm899_vm12, %v900_v0, %v898_v1 }
 0xbd6   :  { %2349 = vpush %v901_v2 }
 0xc07   :  { %s2969_s6 = spop %2349 }
 0xc59   :  { %v923_v58 = vpop.xlane.xlu1 %922 }
 0xc5a   :  { %vm924_vm13 = vcmp.eq.f32.partialorder %v921_v54, %v923_v58  ;;  %v929_v13 = vcvt.f32.s32 %v923_v58 }
 0xc5b   :  { %v925_v12 = vsel %vm924_vm13, %v920_v51, inf }
 0xc5c   :  { %926 = vmin.xlane.f32.xlu1 %v925_v12  ;;  %v930_v4 = vshll.u32 %v929_v13, 16 }
 0xc60   :  { %944 = vmin.xlane.f32.xlu1 %v943_v11 }
 0xce5   :  { %v927_v50 = vpop.xlane.xlu1 %926 }
 0xce6   :  { %v928_v6 = vcvt.f32.s32 %v927_v50 }
 0xce8   :  { %v931_v14 = vadd.s32 %v930_v4, %v928_v6 }
 0xce9   :  { %v945_v22 = vpop.xlane.xlu1 %944 }
 0xcea   :  { %v932_v9 = vrot.slane %v931_v14, 4  ;;  %v946_v7 = vrot.slane %v945_v22, 4 }
 0xcec   :  { %vm933_vm14 = vcmp.lt.s32.totalorder %v931_v14, %v932_v9  ;;  %v947_v15 = vmin.f32 %v945_v22, %v946_v7 }
 0xced   :  { %v934_v60 = vsel %vm933_vm14, %v931_v14, %v932_v9 }
 0xcee   :  { %v948_v42 = vrot.slane %v947_v15, 2  ;;  %v935_v19 = vrot.slane %v934_v60, 2 }
 0xcf0   :  { %vm936_vm15 = vcmp.lt.s32.totalorder %v934_v60, %v935_v19  ;;  %v949_v36 = vmin.f32 %v947_v15, %v948_v42 }
 0xcf1   :  { %v937_v8 = vsel %vm936_vm15, %v934_v60, %v935_v19 }
 0xcf2   :  { %v938_v16 = vrot.slane %v937_v8, 1  ;;  %v950_v17 = vrot.slane %v949_v36, 1 }
 0xcf4   :  { %vm939_vm1 = vcmp.lt.s32.totalorder %v937_v8, %v938_v16  ;;  %v951_v20 = vmin.f32 %v949_v36, %v950_v17 }
 0xcf5   :  { %v940_v21 = vsel %vm939_vm1, %v937_v8, %v938_v16 }
 0xcf6   :  { %2351 = vpush %v940_v21 }
 0xcf7   :  { %2353 = vpush %v951_v20 }
 0xd27   :  { %s2352_s7 = spop %2351 }
 0xd28   :  { %s942_s9 = sand.u32 127, %s2352_s7  ;;  %s2354_s10 = spop %2353 }
 0xd29   :  { %v967_v5 = vstv %s942_s9  ;;  %s953_s11 = smax.f32 %s2588_s17, %s2354_s10  ;;  %s970_s12 = scalar_lea.vmem [#allocation2], %s942_s9 }
 0xd2a   :  { %vm968_vm2 = vcmp.eq.s32.totalorder %v2673_v25, %v967_v5  ;;  %v971_v55 = vld [vmem:[%s970_s12] sm:$0x1]  ;;  %v954_v23 = vstv %s953_s11 }
 0xd2b   :  { %vm2975_vm3 = vmor %vm2960_vm10, %vm968_vm2  ;;  %v972_v26 = vmin.f32 %v913_v3, %v971_v55  ;;  %2517 = vrsqrt.f32 %v954_v23  ;;  %vm957_vm5 = vcmp.eq.f32.partialorder %v954_v23, inf  ;;  %v960_v57 = vand.u32 2147483648, %v954_v23 }
 0xd2c   :  { %vm959_vm6 = vcmp.eq.f32.partialorder %v954_v23, 0.0 }
 0xd2d   :  { %v973_v27 = vsel %vm2975_vm3, 1e+30, %v972_v26 }
 0xd2e   :  { %v975_v61 = vand.u32 4294967168, %v973_v27  ;;  %v1003_v40 = vsel %vm437_vm4, %v973_v27, inf }
 0xd30   :  { %v976_v33 = vor.u32 %v975_v61, %v2673_v25 }
 0xd32   :  { %v977_v28 = vsel %vm437_vm4, %v976_v33, 2147483647 }
 0xd33   :  { %v979_v29 = vshra.s32 %v977_v28, 16  ;;  %v978_v10 = vand.u32 65535, %v977_v28 }
 0xd35   :  { %v981_v30 = vcvt.s32.f32 %v979_v29  ;;  %v980_v38 = vcvt.s32.f32 %v978_v10 }
 0xd37   :  { %982 = vmin.xlane.f32.xlu0 %v981_v30 }
 0xd38   :  { %v2518_v31 = vpop.eup %2517 }
 0xd39   :  { %v956_v35 = vmul.f32 %v2518_v31, %v954_v23 }
 0xd3b   :  { %v958_v32 = vsel %vm957_vm5, %v954_v23, %v956_v35 }
 0xd3c   :  { %v961_v34 = vsel %vm959_vm6, %v960_v57, %v958_v32 }
 0xd3d   :  { %2355 = vpush %v961_v34 }
 0xd6e   :  { %s2984_s13 = spop %2355 }
 0xdc0   :  { %v983_v37 = vpop.xlane.xlu0 %982 }
 0xdc1   :  { %vm984_vm7 = vcmp.eq.f32.partialorder %v981_v30, %v983_v37  ;;  %v989_v59 = vcvt.f32.s32 %v983_v37 }
 0xdc2   :  { %v985_v39 = vsel %vm984_vm7, %v980_v38, inf }
 0xdc3   :  { %986 = vmin.xlane.f32.xlu0 %v985_v39  ;;  %v990_v41 = vshll.u32 %v989_v59, 16 }
 0xdc7   :  { %1004 = vmin.xlane.f32.xlu0 %v1003_v40 }
 0xe4c   :  { %v987_v62 = vpop.xlane.xlu0 %986 }
 0xe4d   :  { %v988_v43 = vcvt.f32.s32 %v987_v62 }
 0xe4f   :  { %v991_v44 = vadd.s32 %v990_v41, %v988_v43 }
 0xe50   :  { %v1005_v45 = vpop.xlane.xlu0 %1004 }
 0xe51   :  { %v992_v46 = vrot.slane %v991_v44, 4  ;;  %v1006_v47 = vrot.slane %v1005_v45, 4 }
 0xe53   :  { %vm993_vm8 = vcmp.lt.s32.totalorder %v991_v44, %v992_v46  ;;  %v1007_v3 = vmin.f32 %v1005_v45, %v1006_v47 }
 0xe54   :  { %v994_v48 = vsel %vm993_vm8, %v991_v44, %v992_v46 }
 0xe55   :  { %v1008_v49 = vrot.slane %v1007_v3, 2  ;;  %v995_v52 = vrot.slane %v994_v48, 2 }
 0xe57   :  { %vm996_vm9 = vcmp.lt.s32.totalorder %v994_v48, %v995_v52  ;;  %v1009_v53 = vmin.f32 %v1007_v3, %v1008_v49 }
 0xe58   :  { %v997_v54 = vsel %vm996_vm9, %v994_v48, %v995_v52 }
 0xe59   :  { %v998_v56 = vrot.slane %v997_v54, 1  ;;  %v1010_v63 = vrot.slane %v1009_v53, 1 }
 0xe5b   :  { %vm999_vm10 = vcmp.lt.s32.totalorder %v997_v54, %v998_v56  ;;  %v1011_v0 = vmin.f32 %v1009_v53, %v1010_v63 }
 0xe5c   :  { %v1000_v1 = vsel %vm999_vm10, %v997_v54, %v998_v56 }
 0xe5d   :  { %2357 = vpush %v1000_v1 }
 0xe5e   :  { %2359 = vpush %v1011_v0 }
 0xe8e   :  { %s2358_s14 = spop %2357 }
 0xe8f   :  { %s1002_s15 = sand.u32 127, %s2358_s14  ;;  %s2360_s16 = spop %2359 }
 0xe90   :  { %v1027_v2 = vstv %s1002_s15  ;;  %s1013_s18 = smax.f32 %s2588_s17, %s2360_s16  ;;  %s1030_s20 = scalar_lea.vmem [#allocation2], %s1002_s15 }
 0xe91   :  { %vm1028_vm11 = vcmp.eq.s32.totalorder %v2673_v25, %v1027_v2  ;;  %v1031_v18 = vld [vmem:[%s1030_s20] sm:$0x1]  ;;  %v1014_v58 = vstv %s1013_s18 }
 0xe92   :  { %vm2990_vm12 = vmor %vm2975_vm3, %vm1028_vm11  ;;  %v1032_v12 = vmin.f32 %v973_v27, %v1031_v18  ;;  %2519 = vrsqrt.f32 %v1014_v58  ;;  %vm1017_vm13 = vcmp.eq.f32.partialorder %v1014_v58, inf  ;;  %v1020_v7 = vand.u32 2147483648, %v1014_v58 }
 0xe93   :  { %vm1019_vm14 = vcmp.eq.f32.partialorder %v1014_v58, 0.0 }
 0xe94   :  { %v1033_v11 = vsel %vm2990_vm12, 1e+30, %v1032_v12 }
 0xe95   :  { %v1035_v13 = vand.u32 4294967168, %v1033_v11  ;;  %v1063_v16 = vsel %vm437_vm4, %v1033_v11, inf }
 0xe97   :  { %v1036_v50 = vor.u32 %v1035_v13, %v2673_v25 }
 0xe99   :  { %v1037_v4 = vsel %vm437_vm4, %v1036_v50, 2147483647 }
 0xe9a   :  { %v1039_v6 = vshra.s32 %v1037_v4, 16  ;;  %v1038_v42 = vand.u32 65535, %v1037_v4 }
 0xe9c   :  { %v1041_v14 = vcvt.s32.f32 %v1039_v6  ;;  %v1040_v36 = vcvt.s32.f32 %v1038_v42 }
 0xe9e   :  { %1042 = vmin.xlane.f32.xlu1 %v1041_v14 }
 0xe9f   :  { %v2520_v22 = vpop.eup %2519 }
 0xea0   :  { %v1016_v9 = vmul.f32 %v2520_v22, %v1014_v58 }
 0xea2   :  { %v1018_v15 = vsel %vm1017_vm13, %v1014_v58, %v1016_v9 }
 0xea3   :  { %v1021_v60 = vsel %vm1019_vm14, %v1020_v7, %v1018_v15 }
 0xea4   :  { %2361 = vpush %v1021_v60 }
 0xed5   :  { %s2999_s22 = spop %2361 }
 0xf27   :  { %v1043_v19 = vpop.xlane.xlu1 %1042 }
 0xf28   :  { %vm1044_vm15 = vcmp.eq.f32.partialorder %v1041_v14, %v1043_v19  ;;  %v1049_v17 = vcvt.f32.s32 %v1043_v19 }
 0xf29   :  { %v1045_v8 = vsel %vm1044_vm15, %v1040_v36, inf }
 0xf2a   :  { %1046 = vmin.xlane.f32.xlu1 %v1045_v8  ;;  %v1050_v21 = vshll.u32 %v1049_v17, 16 }
 0xf2e   :  { %1064 = vmin.xlane.f32.xlu1 %v1063_v16 }
 0xfb3   :  { %v1047_v20 = vpop.xlane.xlu1 %1046 }
 0xfb4   :  { %v1048_v5 = vcvt.f32.s32 %v1047_v20 }
 0xfb6   :  { %v1051_v55 = vadd.s32 %v1050_v21, %v1048_v5 }
 0xfb7   :  { %v1065_v23 = vpop.xlane.xlu1 %1064 }
 0xfb8   :  { %v1052_v24 = vrot.slane %v1051_v55, 4  ;;  %v1066_v26 = vrot.slane %v1065_v23, 4 }
 0xfba   :  { %vm1053_vm1 = vcmp.lt.s32.totalorder %v1051_v55, %v1052_v24  ;;  %v1067_v27 = vmin.f32 %v1065_v23, %v1066_v26 }
 0xfbb   :  { %v1054_v61 = vsel %vm1053_vm1, %v1051_v55, %v1052_v24 }
 0xfbc   :  { %v1068_v33 = vrot.slane %v1067_v27, 2  ;;  %v1055_v28 = vrot.slane %v1054_v61, 2 }
 0xfbe   :  { %vm1056_vm2 = vcmp.lt.s32.totalorder %v1054_v61, %v1055_v28  ;;  %v1069_v29 = vmin.f32 %v1067_v27, %v1068_v33 }
 0xfbf   :  { %v1057_v30 = vsel %vm1056_vm2, %v1054_v61, %v1055_v28 }
 0xfc0   :  { %v1058_v31 = vrot.slane %v1057_v30, 1  ;;  %v1070_v35 = vrot.slane %v1069_v29, 1 }
 0xfc2   :  { %vm1059_vm3 = vcmp.lt.s32.totalorder %v1057_v30, %v1058_v31  ;;  %v1071_v57 = vmin.f32 %v1069_v29, %v1070_v35 }
 0xfc3   :  { %v1060_v32 = vsel %vm1059_vm3, %v1057_v30, %v1058_v31 }
 0xfc4   :  { %2363 = vpush %v1060_v32 }
 0xfc5   :  { %2365 = vpush %v1071_v57 }
 0xff5   :  { %s2364_s23 = spop %2363 }
 0xff6   :  { %s1062_s24 = sand.u32 127, %s2364_s23  ;;  %s2366_s26 = spop %2365 }
 0xff7   :  { %v1087_v34 = vstv %s1062_s24  ;;  %s1073_s27 = smax.f32 %s2588_s17, %s2366_s26  ;;  %s1090_s1 = scalar_lea.vmem [#allocation2], %s1062_s24 }
 0xff8   :  { %vm1088_vm5 = vcmp.eq.s32.totalorder %v2673_v25, %v1087_v34  ;;  %v1091_v10 = vld [vmem:[%s1090_s1] sm:$0x1]  ;;  %v1074_v37 = vstv %s1073_s27 }
 0xff9   :  { %vm3005_vm6 = vmor %vm2990_vm12, %vm1088_vm5  ;;  %v1092_v39 = vmin.f32 %v1033_v11, %v1091_v10  ;;  %2521 = vrsqrt.f32 %v1074_v37  ;;  %vm1077_vm7 = vcmp.eq.f32.partialorder %v1074_v37, inf  ;;  %v1080_v47 = vand.u32 2147483648, %v1074_v37 }
 0xffa   :  { %vm1079_vm8 = vcmp.eq.f32.partialorder %v1074_v37, 0.0 }
 0xffb   :  { %v1093_v40 = vsel %vm3005_vm6, 1e+30, %v1092_v39 }
 0xffc   :  { %v1095_v59 = vand.u32 4294967168, %v1093_v40  ;;  %v1123_v56 = vsel %vm437_vm4, %v1093_v40, inf }
 0xffe   :  { %v1096_v62 = vor.u32 %v1095_v59, %v2673_v25 }
0x1000   :  { %v1097_v41 = vsel %vm437_vm4, %v1096_v62, 2147483647 }
0x1001   :  { %v1099_v43 = vshra.s32 %v1097_v41, 16  ;;  %v1098_v49 = vand.u32 65535, %v1097_v41 }
0x1003   :  { %v1101_v44 = vcvt.s32.f32 %v1099_v43  ;;  %v1100_v53 = vcvt.s32.f32 %v1098_v49 }
0x1005   :  { %1102 = vmin.xlane.f32.xlu0 %v1101_v44 }
0x1006   :  { %v2522_v45 = vpop.eup %2521 }
0x1007   :  { %v1076_v46 = vmul.f32 %v2522_v45, %v1074_v37 }
0x1009   :  { %v1078_v3 = vsel %vm1077_vm7, %v1074_v37, %v1076_v46 }
0x100a   :  { %v1081_v48 = vsel %vm1079_vm8, %v1080_v47, %v1078_v3 }
0x100b   :  { %2367 = vpush %v1081_v48 }
0x103c   :  { %s3014_s29 = spop %2367 }
0x108e   :  { %v1103_v52 = vpop.xlane.xlu0 %1102 }
0x108f   :  { %vm1104_vm9 = vcmp.eq.f32.partialorder %v1101_v44, %v1103_v52  ;;  %v1109_v63 = vcvt.f32.s32 %v1103_v52 }
0x1090   :  { %v1105_v54 = vsel %vm1104_vm9, %v1100_v53, inf }
0x1091   :  { %1106 = vmin.xlane.f32.xlu0 %v1105_v54  ;;  %v1110_v1 = vshll.u32 %v1109_v63, 16 }
0x1095   :  { %1124 = vmin.xlane.f32.xlu0 %v1123_v56 }
0x111a   :  { %v1107_v0 = vpop.xlane.xlu0 %1106 }
0x111b   :  { %v1108_v2 = vcvt.f32.s32 %v1107_v0 }
0x111d   :  { %v1111_v18 = vadd.s32 %v1110_v1, %v1108_v2 }
0x111e   :  { %v1125_v58 = vpop.xlane.xlu0 %1124 }
0x111f   :  { %v1112_v51 = vrot.slane %v1111_v18, 4  ;;  %v1126_v12 = vrot.slane %v1125_v58, 4 }
0x1121   :  { %vm1113_vm10 = vcmp.lt.s32.totalorder %v1111_v18, %v1112_v51  ;;  %v1127_v11 = vmin.f32 %v1125_v58, %v1126_v12 }
0x1122   :  { %v1114_v13 = vsel %vm1113_vm10, %v1111_v18, %v1112_v51 }
0x1123   :  { %v1128_v50 = vrot.slane %v1127_v11, 2  ;;  %v1115_v4 = vrot.slane %v1114_v13, 2 }
0x1125   :  { %vm1116_vm11 = vcmp.lt.s32.totalorder %v1114_v13, %v1115_v4  ;;  %v1129_v6 = vmin.f32 %v1127_v11, %v1128_v50 }
0x1126   :  { %v1117_v14 = vsel %vm1116_vm11, %v1114_v13, %v1115_v4 }
0x1127   :  { %v1118_v22 = vrot.slane %v1117_v14, 1  ;;  %v1130_v9 = vrot.slane %v1129_v6, 1 }
0x1129   :  { %vm1119_vm12 = vcmp.lt.s32.totalorder %v1117_v14, %v1118_v22  ;;  %v1131_v7 = vmin.f32 %v1129_v6, %v1130_v9 }
0x112a   :  { %v1120_v15 = vsel %vm1119_vm12, %v1117_v14, %v1118_v22 }
0x112b   :  { %2369 = vpush %v1120_v15 }
0x112c   :  { %2371 = vpush %v1131_v7 }
0x115c   :  { %s2370_s3 = spop %2369 }
0x115d   :  { %s1122_s4 = sand.u32 127, %s2370_s3  ;;  %s2372_s5 = spop %2371 }
0x115e   :  { %v1147_v60 = vstv %s1122_s4  ;;  %s1133_s7 = smax.f32 %s2588_s17, %s2372_s5  ;;  %s1150_s9 = scalar_lea.vmem [#allocation2], %s1122_s4 }
0x115f   :  { %vm1148_vm13 = vcmp.eq.s32.totalorder %v2673_v25, %v1147_v60  ;;  %v1151_v42 = vld [vmem:[%s1150_s9] sm:$0x1]  ;;  %v1134_v19 = vstv %s1133_s7 }
0x1160   :  { %vm3020_vm14 = vmor %vm3005_vm6, %vm1148_vm13  ;;  %v1152_v8 = vmin.f32 %v1093_v40, %v1151_v42  ;;  %2523 = vrsqrt.f32 %v1134_v19  ;;  %vm1137_vm15 = vcmp.eq.f32.partialorder %v1134_v19, inf  ;;  %v1140_v26 = vand.u32 2147483648, %v1134_v19 }
0x1161   :  { %vm1139_vm1 = vcmp.eq.f32.partialorder %v1134_v19, 0.0 }
0x1162   :  { %v1153_v16 = vsel %vm3020_vm14, 1e+30, %v1152_v8 }
0x1163   :  { %v1155_v17 = vand.u32 4294967168, %v1153_v16  ;;  %v1183_v31 = vsel %vm437_vm4, %v1153_v16, inf }
0x1165   :  { %v1156_v20 = vor.u32 %v1155_v17, %v2673_v25 }
0x1167   :  { %v1157_v21 = vsel %vm437_vm4, %v1156_v20, 2147483647 }
0x1168   :  { %v1159_v5 = vshra.s32 %v1157_v21, 16  ;;  %v1158_v33 = vand.u32 65535, %v1157_v21 }
0x116a   :  { %v1161_v55 = vcvt.s32.f32 %v1159_v5  ;;  %v1160_v29 = vcvt.s32.f32 %v1158_v33 }
0x116c   :  { %1162 = vmin.xlane.f32.xlu1 %v1161_v55 }
0x116d   :  { %v2524_v23 = vpop.eup %2523 }
0x116e   :  { %v1136_v24 = vmul.f32 %v2524_v23, %v1134_v19 }
0x1170   :  { %v1138_v27 = vsel %vm1137_vm15, %v1134_v19, %v1136_v24 }
0x1171   :  { %v1141_v61 = vsel %vm1139_vm1, %v1140_v26, %v1138_v27 }
0x1172   :  { %2373 = vpush %v1141_v61 }
0x11a3   :  { %s3029_s10 = spop %2373 }
0x11f5   :  { %v1163_v28 = vpop.xlane.xlu1 %1162 }
0x11f6   :  { %vm1164_vm2 = vcmp.eq.f32.partialorder %v1161_v55, %v1163_v28  ;;  %v1169_v35 = vcvt.f32.s32 %v1163_v28 }
0x11f7   :  { %v1165_v30 = vsel %vm1164_vm2, %v1160_v29, inf }
0x11f8   :  { %1166 = vmin.xlane.f32.xlu1 %v1165_v30  ;;  %v1170_v32 = vshll.u32 %v1169_v35, 16 }
0x11fc   :  { %1184 = vmin.xlane.f32.xlu1 %v1183_v31 }
0x1281   :  { %v1167_v57 = vpop.xlane.xlu1 %1166 }
0x1282   :  { %v1168_v34 = vcvt.f32.s32 %v1167_v57 }
0x1284   :  { %v1171_v10 = vadd.s32 %v1170_v32, %v1168_v34 }
0x1285   :  { %v1185_v37 = vpop.xlane.xlu1 %1184 }
0x1286   :  { %v1172_v38 = vrot.slane %v1171_v10, 4  ;;  %v1186_v39 = vrot.slane %v1185_v37, 4 }
0x1288   :  { %vm1173_vm3 = vcmp.lt.s32.totalorder %v1171_v10, %v1172_v38  ;;  %v1187_v40 = vmin.f32 %v1185_v37, %v1186_v39 }
0x1289   :  { %v1174_v59 = vsel %vm1173_vm3, %v1171_v10, %v1172_v38 }
0x128a   :  { %v1188_v62 = vrot.slane %v1187_v40, 2  ;;  %v1175_v41 = vrot.slane %v1174_v59, 2 }
0x128c   :  { %vm1176_vm5 = vcmp.lt.s32.totalorder %v1174_v59, %v1175_v41  ;;  %v1189_v43 = vmin.f32 %v1187_v40, %v1188_v62 }
0x128d   :  { %v1177_v44 = vsel %vm1176_vm5, %v1174_v59, %v1175_v41 }
0x128e   :  { %v1178_v45 = vrot.slane %v1177_v44, 1  ;;  %v1190_v46 = vrot.slane %v1189_v43, 1 }
0x1290   :  { %vm1179_vm6 = vcmp.lt.s32.totalorder %v1177_v44, %v1178_v45  ;;  %v1191_v47 = vmin.f32 %v1189_v43, %v1190_v46 }
0x1291   :  { %v1180_v3 = vsel %vm1179_vm6, %v1177_v44, %v1178_v45 }
0x1292   :  { %2375 = vpush %v1180_v3 }
0x1293   :  { %2377 = vpush %v1191_v47 }
0x12c3   :  { %s2376_s11 = spop %2375 }
0x12c4   :  { %s1182_s12 = sand.u32 127, %s2376_s11  ;;  %s2378_s14 = spop %2377 }
0x12c5   :  { %v1207_v48 = vstv %s1182_s12  ;;  %s1193_s15 = smax.f32 %s2588_s17, %s2378_s14  ;;  %s1210_s16 = scalar_lea.vmem [#allocation2], %s1182_s12 }
0x12c6   :  { %vm1208_vm7 = vcmp.eq.s32.totalorder %v2673_v25, %v1207_v48  ;;  %v1211_v49 = vld [vmem:[%s1210_s16] sm:$0x1]  ;;  %v1194_v52 = vstv %s1193_s15 }
0x12c7   :  { %vm3035_vm8 = vmor %vm3020_vm14, %vm1208_vm7  ;;  %v1212_v54 = vmin.f32 %v1153_v16, %v1211_v49  ;;  %2525 = vrsqrt.f32 %v1194_v52  ;;  %vm1197_vm9 = vcmp.eq.f32.partialorder %v1194_v52, inf  ;;  %v1200_v12 = vand.u32 2147483648, %v1194_v52 }
0x12c8   :  { %vm1199_vm10 = vcmp.eq.f32.partialorder %v1194_v52, 0.0 }
0x12c9   :  { %v1213_v56 = vsel %vm3035_vm8, 1e+30, %v1212_v54 }
0x12ca   :  { %v1215_v63 = vand.u32 4294967168, %v1213_v56  ;;  %v1243_v22 = vsel %vm437_vm4, %v1213_v56, inf }
0x12cc   :  { %v1216_v0 = vor.u32 %v1215_v63, %v2673_v25 }
0x12ce   :  { %v1217_v1 = vsel %vm437_vm4, %v1216_v0, 2147483647 }
0x12cf   :  { %v1219_v2 = vshra.s32 %v1217_v1, 16  ;;  %v1218_v50 = vand.u32 65535, %v1217_v1 }
0x12d1   :  { %v1221_v18 = vcvt.s32.f32 %v1219_v2  ;;  %v1220_v6 = vcvt.s32.f32 %v1218_v50 }
0x12d3   :  { %1222 = vmin.xlane.f32.xlu0 %v1221_v18 }
0x12d4   :  { %v2526_v58 = vpop.eup %2525 }
0x12d5   :  { %v1196_v51 = vmul.f32 %v2526_v58, %v1194_v52 }
0x12d7   :  { %v1198_v11 = vsel %vm1197_vm9, %v1194_v52, %v1196_v51 }
0x12d8   :  { %v1201_v13 = vsel %vm1199_vm10, %v1200_v12, %v1198_v11 }
0x12d9   :  { %2379 = vpush %v1201_v13 }
0x130a   :  { %s3044_s18 = spop %2379 }
0x135c   :  { %v1223_v4 = vpop.xlane.xlu0 %1222 }
0x135d   :  { %vm1224_vm11 = vcmp.eq.f32.partialorder %v1221_v18, %v1223_v4  ;;  %v1229_v9 = vcvt.f32.s32 %v1223_v4 }
0x135e   :  { %v1225_v14 = vsel %vm1224_vm11, %v1220_v6, inf }
0x135f   :  { %1226 = vmin.xlane.f32.xlu0 %v1225_v14  ;;  %v1230_v15 = vshll.u32 %v1229_v9, 16 }
0x1363   :  { %1244 = vmin.xlane.f32.xlu0 %v1243_v22 }
0x13e8   :  { %v1227_v7 = vpop.xlane.xlu0 %1226 }
0x13e9   :  { %v1228_v60 = vcvt.f32.s32 %v1227_v7 }
0x13eb   :  { %v1231_v42 = vadd.s32 %v1230_v15, %v1228_v60 }
0x13ec   :  { %v1245_v19 = vpop.xlane.xlu0 %1244 }
0x13ed   :  { %v1232_v36 = vrot.slane %v1231_v42, 4  ;;  %v1246_v8 = vrot.slane %v1245_v19, 4 }
0x13ef   :  { %vm1233_vm12 = vcmp.lt.s32.totalorder %v1231_v42, %v1232_v36  ;;  %v1247_v16 = vmin.f32 %v1245_v19, %v1246_v8 }
0x13f0   :  { %v1234_v17 = vsel %vm1233_vm12, %v1231_v42, %v1232_v36 }
0x13f1   :  { %v1248_v20 = vrot.slane %v1247_v16, 2  ;;  %v1235_v21 = vrot.slane %v1234_v17, 2 }
0x13f3   :  { %vm1236_vm13 = vcmp.lt.s32.totalorder %v1234_v17, %v1235_v21  ;;  %v1249_v5 = vmin.f32 %v1247_v16, %v1248_v20 }
0x13f4   :  { %v1237_v55 = vsel %vm1236_vm13, %v1234_v17, %v1235_v21 }
0x13f5   :  { %v1238_v23 = vrot.slane %v1237_v55, 1  ;;  %v1250_v24 = vrot.slane %v1249_v5, 1 }
0x13f7   :  { %vm1239_vm14 = vcmp.lt.s32.totalorder %v1237_v55, %v1238_v23  ;;  %v1251_v26 = vmin.f32 %v1249_v5, %v1250_v24 }
0x13f8   :  { %v1240_v27 = vsel %vm1239_vm14, %v1237_v55, %v1238_v23 }
0x13f9   :  { %2381 = vpush %v1240_v27 }
0x13fa   :  { %2383 = vpush %v1251_v26 }
0x142a   :  { %s2382_s20 = spop %2381 }
0x142b   :  { %s1242_s23 = sand.u32 127, %s2382_s20  ;;  %s2384_s24 = spop %2383 }
0x142c   :  { %v1267_v61 = vstv %s1242_s23  ;;  %s1253_s26 = smax.f32 %s2588_s17, %s2384_s24  ;;  %s1270_s27 = scalar_lea.vmem [#allocation2], %s1242_s23 }
0x142d   :  { %vm1268_vm15 = vcmp.eq.s32.totalorder %v2673_v25, %v1267_v61  ;;  %v1271_v33 = vld [vmem:[%s1270_s27] sm:$0x1]  ;;  %v1254_v28 = vstv %s1253_s26 }
0x142e   :  { %vm3050_vm1 = vmor %vm3035_vm8, %vm1268_vm15  ;;  %v1272_v30 = vmin.f32 %v1213_v56, %v1271_v33  ;;  %2527 = vrsqrt.f32 %v1254_v28  ;;  %vm1257_vm2 = vcmp.eq.f32.partialorder %v1254_v28, inf  ;;  %v1260_v39 = vand.u32 2147483648, %v1254_v28 }
0x142f   :  { %vm1259_vm3 = vcmp.eq.f32.partialorder %v1254_v28, 0.0 }
0x1430   :  { %v1273_v31 = vsel %vm3050_vm1, 1e+30, %v1272_v30 }
0x1431   :  { %v1275_v35 = vand.u32 4294967168, %v1273_v31  ;;  %v1303_v45 = vsel %vm437_vm4, %v1273_v31, inf }
0x1433   :  { %v1276_v57 = vor.u32 %v1275_v35, %v2673_v25 }
0x1435   :  { %v1277_v32 = vsel %vm437_vm4, %v1276_v57, 2147483647 }
0x1436   :  { %v1279_v34 = vshra.s32 %v1277_v32, 16  ;;  %v1278_v62 = vand.u32 65535, %v1277_v32 }
0x1438   :  { %v1281_v10 = vcvt.s32.f32 %v1279_v34  ;;  %v1280_v43 = vcvt.s32.f32 %v1278_v62 }
0x143a   :  { %1282 = vmin.xlane.f32.xlu1 %v1281_v10 }
0x143b   :  { %v2528_v37 = vpop.eup %2527 }
0x143c   :  { %v1256_v38 = vmul.f32 %v2528_v37, %v1254_v28 }
0x143e   :  { %v1258_v40 = vsel %vm1257_vm2, %v1254_v28, %v1256_v38 }
0x143f   :  { %v1261_v59 = vsel %vm1259_vm3, %v1260_v39, %v1258_v40 }
0x1440   :  { %2385 = vpush %v1261_v59 }
0x1471   :  { %s3059_s1 = spop %2385 }
0x14c3   :  { %v1283_v41 = vpop.xlane.xlu1 %1282 }
0x14c4   :  { %vm1284_vm5 = vcmp.eq.f32.partialorder %v1281_v10, %v1283_v41  ;;  %v1289_v46 = vcvt.f32.s32 %v1283_v41 }
0x14c5   :  { %v1285_v44 = vsel %vm1284_vm5, %v1280_v43, inf }
0x14c6   :  { %1286 = vmin.xlane.f32.xlu1 %v1285_v44  ;;  %v1290_v3 = vshll.u32 %v1289_v46, 16 }
0x14ca   :  { %1304 = vmin.xlane.f32.xlu1 %v1303_v45 }
0x154f   :  { %v1287_v47 = vpop.xlane.xlu1 %1286 }
0x1550   :  { %v1288_v48 = vcvt.f32.s32 %v1287_v47 }
0x1552   :  { %v1291_v49 = vadd.s32 %v1290_v3, %v1288_v48 }
0x1553   :  { %v1305_v52 = vpop.xlane.xlu1 %1304 }
0x1554   :  { %v1292_v53 = vrot.slane %v1291_v49, 4  ;;  %v1306_v54 = vrot.slane %v1305_v52, 4 }
0x1556   :  { %vm1293_vm6 = vcmp.lt.s32.totalorder %v1291_v49, %v1292_v53  ;;  %v1307_v56 = vmin.f32 %v1305_v52, %v1306_v54 }
0x1557   :  { %v1294_v63 = vsel %vm1293_vm6, %v1291_v49, %v1292_v53 }
0x1558   :  { %v1308_v0 = vrot.slane %v1307_v56, 2  ;;  %v1295_v1 = vrot.slane %v1294_v63, 2 }
0x155a   :  { %vm1296_vm7 = vcmp.lt.s32.totalorder %v1294_v63, %v1295_v1  ;;  %v1309_v2 = vmin.f32 %v1307_v56, %v1308_v0 }
0x155b   :  { %v1297_v18 = vsel %vm1296_vm7, %v1294_v63, %v1295_v1 }
0x155c   :  { %v1298_v58 = vrot.slane %v1297_v18, 1  ;;  %v1310_v51 = vrot.slane %v1309_v2, 1 }
0x155e   :  { %vm1299_vm8 = vcmp.lt.s32.totalorder %v1297_v18, %v1298_v58  ;;  %v1311_v12 = vmin.f32 %v1309_v2, %v1310_v51 }
0x155f   :  { %v1300_v11 = vsel %vm1299_vm8, %v1297_v18, %v1298_v58 }
0x1560   :  { %2387 = vpush %v1300_v11 }
0x1561   :  { %2389 = vpush %v1311_v12 }
0x1591   :  { %s2388_s3 = spop %2387 }
0x1592   :  { %s1302_s4 = sand.u32 127, %s2388_s3  ;;  %s2390_s5 = spop %2389 }
0x1593   :  { %v1327_v13 = vstv %s1302_s4  ;;  %s1313_s7 = smax.f32 %s2588_s17, %s2390_s5  ;;  %s1330_s9 = scalar_lea.vmem [#allocation2], %s1302_s4 }
0x1594   :  { %vm1328_vm9 = vcmp.eq.s32.totalorder %v2673_v25, %v1327_v13  ;;  %v1331_v50 = vld [vmem:[%s1330_s9] sm:$0x1]  ;;  %v1314_v4 = vstv %s1313_s7 }
0x1595   :  { %vm3065_vm10 = vmor %vm3050_vm1, %vm1328_vm9  ;;  %v1332_v14 = vmin.f32 %v1273_v31, %v1331_v50  ;;  %2529 = vrsqrt.f32 %v1314_v4  ;;  %vm1317_vm11 = vcmp.eq.f32.partialorder %v1314_v4, inf  ;;  %v1320_v8 = vand.u32 2147483648, %v1314_v4 }
0x1596   :  { %vm1319_vm12 = vcmp.eq.f32.partialorder %v1314_v4, 0.0 }
0x1597   :  { %v1333_v22 = vsel %vm3065_vm10, 1e+30, %v1332_v14 }
0x1598   :  { %v1335_v9 = vand.u32 4294967168, %v1333_v22  ;;  %v1363_v23 = vsel %vm437_vm4, %v1333_v22, inf }
0x159a   :  { %v1336_v7 = vor.u32 %v1335_v9, %v2673_v25 }
0x159c   :  { %v1337_v15 = vsel %vm437_vm4, %v1336_v7, 2147483647 }
0x159d   :  { %v1339_v60 = vshra.s32 %v1337_v15, 16  ;;  %v1338_v20 = vand.u32 65535, %v1337_v15 }
0x159f   :  { %v1341_v42 = vcvt.s32.f32 %v1339_v60  ;;  %v1340_v5 = vcvt.s32.f32 %v1338_v20 }
0x15a1   :  { %1342 = vmin.xlane.f32.xlu0 %v1341_v42 }
0x15a2   :  { %v2530_v19 = vpop.eup %2529 }
0x15a3   :  { %v1316_v36 = vmul.f32 %v2530_v19, %v1314_v4 }
0x15a5   :  { %v1318_v16 = vsel %vm1317_vm11, %v1314_v4, %v1316_v36 }
0x15a6   :  { %v1321_v17 = vsel %vm1319_vm12, %v1320_v8, %v1318_v16 }
0x15a7   :  { %2391 = vpush %v1321_v17 }
0x15d8   :  { %s3074_s11 = spop %2391 }
0x162a   :  { %v1343_v21 = vpop.xlane.xlu0 %1342 }
0x162b   :  { %vm1344_vm13 = vcmp.eq.f32.partialorder %v1341_v42, %v1343_v21  ;;  %v1349_v24 = vcvt.f32.s32 %v1343_v21 }
0x162c   :  { %v1345_v55 = vsel %vm1344_vm13, %v1340_v5, inf }
0x162d   :  { %1346 = vmin.xlane.f32.xlu0 %v1345_v55  ;;  %v1350_v27 = vshll.u32 %v1349_v24, 16 }
0x1631   :  { %1364 = vmin.xlane.f32.xlu0 %v1363_v23 }
0x16b6   :  { %v1347_v26 = vpop.xlane.xlu0 %1346 }
0x16b7   :  { %v1348_v61 = vcvt.f32.s32 %v1347_v26 }
0x16b9   :  { %v1351_v33 = vadd.s32 %v1350_v27, %v1348_v61 }
0x16ba   :  { %v1365_v28 = vpop.xlane.xlu0 %1364 }
0x16bb   :  { %v1352_v29 = vrot.slane %v1351_v33, 4  ;;  %v1366_v30 = vrot.slane %v1365_v28, 4 }
0x16bd   :  { %vm1353_vm14 = vcmp.lt.s32.totalorder %v1351_v33, %v1352_v29  ;;  %v1367_v31 = vmin.f32 %v1365_v28, %v1366_v30 }
0x16be   :  { %v1354_v35 = vsel %vm1353_vm14, %v1351_v33, %v1352_v29 }
0x16bf   :  { %v1368_v57 = vrot.slane %v1367_v31, 2  ;;  %v1355_v32 = vrot.slane %v1354_v35, 2 }
0x16c1   :  { %vm1356_vm15 = vcmp.lt.s32.totalorder %v1354_v35, %v1355_v32  ;;  %v1369_v34 = vmin.f32 %v1367_v31, %v1368_v57 }
0x16c2   :  { %v1357_v10 = vsel %vm1356_vm15, %v1354_v35, %v1355_v32 }
0x16c3   :  { %v1358_v37 = vrot.slane %v1357_v10, 1  ;;  %v1370_v38 = vrot.slane %v1369_v34, 1 }
0x16c5   :  { %vm1359_vm1 = vcmp.lt.s32.totalorder %v1357_v10, %v1358_v37  ;;  %v1371_v39 = vmin.f32 %v1369_v34, %v1370_v38 }
0x16c6   :  { %v1360_v40 = vsel %vm1359_vm1, %v1357_v10, %v1358_v37 }
0x16c7   :  { %2393 = vpush %v1360_v40 }
0x16c8   :  { %2395 = vpush %v1371_v39 }
0x16f8   :  { %s2394_s12 = spop %2393 }
0x16f9   :  { %s1362_s14 = sand.u32 127, %s2394_s12  ;;  %s2396_s15 = spop %2395 }
0x16fa   :  { %v1387_v59 = vstv %s1362_s14  ;;  %s1373_s16 = smax.f32 %s2588_s17, %s2396_s15  ;;  %s1390_s20 = scalar_lea.vmem [#allocation2], %s1362_s14 }
0x16fb   :  { %vm1388_vm2 = vcmp.eq.s32.totalorder %v2673_v25, %v1387_v59  ;;  %v1391_v62 = vld [vmem:[%s1390_s20] sm:$0x1]  ;;  %v1374_v41 = vstv %s1373_s16 }
0x16fc   :  { %vm3080_vm3 = vmor %vm3065_vm10, %vm1388_vm2  ;;  %v1392_v44 = vmin.f32 %v1333_v22, %v1391_v62  ;;  %2531 = vrsqrt.f32 %v1374_v41  ;;  %vm1377_vm5 = vcmp.eq.f32.partialorder %v1374_v41, inf  ;;  %v1380_v54 = vand.u32 2147483648, %v1374_v41 }
0x16fd   :  { %vm1379_vm6 = vcmp.eq.f32.partialorder %v1374_v41, 0.0 }
0x16fe   :  { %v1393_v45 = vsel %vm3080_vm3, 1e+30, %v1392_v44 }
0x16ff   :  { %v1395_v46 = vand.u32 4294967168, %v1393_v45  ;;  %v1423_v58 = vsel %vm437_vm4, %v1393_v45, inf }
0x1701   :  { %v1396_v47 = vor.u32 %v1395_v46, %v2673_v25 }
0x1703   :  { %v1397_v3 = vsel %vm437_vm4, %v1396_v47, 2147483647 }
0x1704   :  { %v1399_v48 = vshra.s32 %v1397_v3, 16  ;;  %v1398_v0 = vand.u32 65535, %v1397_v3 }
0x1706   :  { %v1401_v49 = vcvt.s32.f32 %v1399_v48  ;;  %v1400_v2 = vcvt.s32.f32 %v1398_v0 }
0x1708   :  { %1402 = vmin.xlane.f32.xlu1 %v1401_v49 }
0x1709   :  { %v2532_v52 = vpop.eup %2531 }
0x170a   :  { %v1376_v53 = vmul.f32 %v2532_v52, %v1374_v41 }
0x170c   :  { %v1378_v56 = vsel %vm1377_vm5, %v1374_v41, %v1376_v53 }
0x170d   :  { %v1381_v63 = vsel %vm1379_vm6, %v1380_v54, %v1378_v56 }
0x170e   :  { %2397 = vpush %v1381_v63 }
0x173f   :  { %s3089_s23 = spop %2397 }
0x1791   :  { %v1403_v1 = vpop.xlane.xlu1 %1402 }
0x1792   :  { %vm1404_vm7 = vcmp.eq.f32.partialorder %v1401_v49, %v1403_v1  ;;  %v1409_v51 = vcvt.f32.s32 %v1403_v1 }
0x1793   :  { %v1405_v18 = vsel %vm1404_vm7, %v1400_v2, inf }
0x1794   :  { %1406 = vmin.xlane.f32.xlu1 %v1405_v18  ;;  %v1410_v11 = vshll.u32 %v1409_v51, 16 }
0x1798   :  { %1424 = vmin.xlane.f32.xlu1 %v1423_v58 }
0x181d   :  { %v1407_v12 = vpop.xlane.xlu1 %1406 }
0x181e   :  { %v1408_v13 = vcvt.f32.s32 %v1407_v12 }
0x1820   :  { %v1411_v50 = vadd.s32 %v1410_v11, %v1408_v13 }
0x1821   :  { %v1425_v4 = vpop.xlane.xlu1 %1424 }
0x1822   :  { %v1412_v6 = vrot.slane %v1411_v50, 4  ;;  %v1426_v14 = vrot.slane %v1425_v4, 4 }
0x1824   :  { %vm1413_vm8 = vcmp.lt.s32.totalorder %v1411_v50, %v1412_v6  ;;  %v1427_v22 = vmin.f32 %v1425_v4, %v1426_v14 }
0x1825   :  { %v1414_v9 = vsel %vm1413_vm8, %v1411_v50, %v1412_v6 }
0x1826   :  { %v1428_v7 = vrot.slane %v1427_v22, 2  ;;  %v1415_v15 = vrot.slane %v1414_v9, 2 }
0x1828   :  { %vm1416_vm9 = vcmp.lt.s32.totalorder %v1414_v9, %v1415_v15  ;;  %v1429_v60 = vmin.f32 %v1427_v22, %v1428_v7 }
0x1829   :  { %v1417_v42 = vsel %vm1416_vm9, %v1414_v9, %v1415_v15 }
0x182a   :  { %v1418_v19 = vrot.slane %v1417_v42, 1  ;;  %v1430_v36 = vrot.slane %v1429_v60, 1 }
0x182c   :  { %vm1419_vm10 = vcmp.lt.s32.totalorder %v1417_v42, %v1418_v19  ;;  %v1431_v8 = vmin.f32 %v1429_v60, %v1430_v36 }
0x182d   :  { %v1420_v16 = vsel %vm1419_vm10, %v1417_v42, %v1418_v19 }
0x182e   :  { %2399 = vpush %v1420_v16 }
0x182f   :  { %2401 = vpush %v1431_v8 }
0x185f   :  { %s2400_s24 = spop %2399 }
0x1860   :  { %s1422_s26 = sand.u32 127, %s2400_s24  ;;  %s2402_s27 = spop %2401 }
0x1861   :  { %v1447_v17 = vstv %s1422_s26  ;;  %s1433_s3 = smax.f32 %s2588_s17, %s2402_s27  ;;  %s1450_s4 = scalar_lea.vmem [#allocation2], %s1422_s26 }
0x1862   :  { %vm1448_vm11 = vcmp.eq.s32.totalorder %v2673_v25, %v1447_v17  ;;  %v1451_v20 = vld [vmem:[%s1450_s4] sm:$0x1]  ;;  %v1434_v21 = vstv %s1433_s3 }
0x1863   :  { %vm3095_vm12 = vmor %vm3080_vm3, %vm1448_vm11  ;;  %v1452_v55 = vmin.f32 %v1393_v45, %v1451_v20  ;;  %2533 = vrsqrt.f32 %v1434_v21  ;;  %vm1437_vm13 = vcmp.eq.f32.partialorder %v1434_v21, inf  ;;  %v1440_v30 = vand.u32 2147483648, %v1434_v21 }
0x1864   :  { %vm1439_vm14 = vcmp.eq.f32.partialorder %v1434_v21, 0.0 }
0x1865   :  { %v1453_v23 = vsel %vm3095_vm12, 1e+30, %v1452_v55 }
0x1866   :  { %v1455_v24 = vand.u32 4294967168, %v1453_v23  ;;  %v1483_v37 = vsel %vm437_vm4, %v1453_v23, inf }
0x1868   :  { %v1456_v26 = vor.u32 %v1455_v24, %v2673_v25 }
0x186a   :  { %v1457_v27 = vsel %vm437_vm4, %v1456_v26, 2147483647 }
0x186b   :  { %v1459_v61 = vshra.s32 %v1457_v27, 16  ;;  %v1458_v57 = vand.u32 65535, %v1457_v27 }
0x186d   :  { %v1461_v33 = vcvt.s32.f32 %v1459_v61  ;;  %v1460_v34 = vcvt.s32.f32 %v1458_v57 }
0x186f   :  { %1462 = vmin.xlane.f32.xlu0 %v1461_v33 }
0x1870   :  { %v2534_v28 = vpop.eup %2533 }
0x1871   :  { %v1436_v29 = vmul.f32 %v2534_v28, %v1434_v21 }
0x1873   :  { %v1438_v31 = vsel %vm1437_vm13, %v1434_v21, %v1436_v29 }
0x1874   :  { %v1441_v35 = vsel %vm1439_vm14, %v1440_v30, %v1438_v31 }
0x1875   :  { %2403 = vpush %v1441_v35 }
0x18a6   :  { %s3104_s5 = spop %2403 }
0x18f8   :  { %v1463_v32 = vpop.xlane.xlu0 %1462 }
0x18f9   :  { %vm1464_vm15 = vcmp.eq.f32.partialorder %v1461_v33, %v1463_v32  ;;  %v1469_v38 = vcvt.f32.s32 %v1463_v32 }
0x18fa   :  { %v1465_v10 = vsel %vm1464_vm15, %v1460_v34, inf }
0x18fb   :  { %1466 = vmin.xlane.f32.xlu0 %v1465_v10  ;;  %v1470_v40 = vshll.u32 %v1469_v38, 16 }
0x18ff   :  { %1484 = vmin.xlane.f32.xlu0 %v1483_v37 }
0x1984   :  { %v1467_v39 = vpop.xlane.xlu0 %1466 }
0x1985   :  { %v1468_v59 = vcvt.f32.s32 %v1467_v39 }
0x1987   :  { %v1471_v62 = vadd.s32 %v1470_v40, %v1468_v59 }
0x1988   :  { %v1485_v41 = vpop.xlane.xlu0 %1484 }
0x1989   :  { %v1472_v43 = vrot.slane %v1471_v62, 4  ;;  %v1486_v44 = vrot.slane %v1485_v41, 4 }
0x198b   :  { %vm1473_vm1 = vcmp.lt.s32.totalorder %v1471_v62, %v1472_v43  ;;  %v1487_v45 = vmin.f32 %v1485_v41, %v1486_v44 }
0x198c   :  { %v1474_v46 = vsel %vm1473_vm1, %v1471_v62, %v1472_v43 }
0x198d   :  { %v1488_v47 = vrot.slane %v1487_v45, 2  ;;  %v1475_v3 = vrot.slane %v1474_v46, 2 }
0x198f   :  { %vm1476_vm2 = vcmp.lt.s32.totalorder %v1474_v46, %v1475_v3  ;;  %v1489_v48 = vmin.f32 %v1487_v45, %v1488_v47 }
0x1990   :  { %v1477_v49 = vsel %vm1476_vm2, %v1474_v46, %v1475_v3 }
0x1991   :  { %v1478_v52 = vrot.slane %v1477_v49, 1  ;;  %v1490_v53 = vrot.slane %v1489_v48, 1 }
0x1993   :  { %vm1479_vm3 = vcmp.lt.s32.totalorder %v1477_v49, %v1478_v52  ;;  %v1491_v54 = vmin.f32 %v1489_v48, %v1490_v53 }
0x1994   :  { %v1480_v56 = vsel %vm1479_vm3, %v1477_v49, %v1478_v52 }
0x1995   :  { %2405 = vpush %v1480_v56 }
0x1996   :  { %2407 = vpush %v1491_v54 }
0x19c6   :  { %s2406_s7 = spop %2405 }
0x19c7   :  { %s1482_s9 = sand.u32 127, %s2406_s7  ;;  %s2408_s12 = spop %2407 }
0x19c8   :  { %v1507_v63 = vstv %s1482_s9  ;;  %s1493_s14 = smax.f32 %s2588_s17, %s2408_s12  ;;  %s1510_s15 = scalar_lea.vmem [#allocation2], %s1482_s9 }
0x19c9   :  { %vm1508_vm5 = vcmp.eq.s32.totalorder %v2673_v25, %v1507_v63  ;;  %v1511_v0 = vld [vmem:[%s1510_s15] sm:$0x1]  ;;  %v1494_v1 = vstv %s1493_s14 }
0x19ca   :  { %vm3110_vm6 = vmor %vm3095_vm12, %vm1508_vm5  ;;  %v1512_v18 = vmin.f32 %v1453_v23, %v1511_v0  ;;  %2535 = vrsqrt.f32 %v1494_v1  ;;  %vm1497_vm7 = vcmp.eq.f32.partialorder %v1494_v1, inf  ;;  %v1500_v14 = vand.u32 2147483648, %v1494_v1 }
0x19cb   :  { %vm1499_vm8 = vcmp.eq.f32.partialorder %v1494_v1, 0.0 }
0x19cc   :  { %v1513_v58 = vsel %vm3110_vm6, 1e+30, %v1512_v18 }
0x19cd   :  { %v1515_v51 = vand.u32 4294967168, %v1513_v58  ;;  %v1543_v19 = vsel %vm437_vm4, %v1513_v58, inf }
0x19cf   :  { %v1516_v12 = vor.u32 %v1515_v51, %v2673_v25 }
0x19d1   :  { %v1517_v11 = vsel %vm437_vm4, %v1516_v12, 2147483647 }
0x19d2   :  { %v1519_v13 = vshra.s32 %v1517_v11, 16  ;;  %v1518_v7 = vand.u32 65535, %v1517_v11 }
0x19d4   :  { %v1521_v50 = vcvt.s32.f32 %v1519_v13  ;;  %v1520_v60 = vcvt.s32.f32 %v1518_v7 }
0x19d6   :  { %1522 = vmin.xlane.f32.xlu1 %v1521_v50 }
0x19d7   :  { %v2536_v4 = vpop.eup %2535 }
0x19d8   :  { %v1496_v6 = vmul.f32 %v2536_v4, %v1494_v1 }
0x19da   :  { %v1498_v22 = vsel %vm1497_vm7, %v1494_v1, %v1496_v6 }
0x19db   :  { %v1501_v9 = vsel %vm1499_vm8, %v1500_v14, %v1498_v22 }
0x19dc   :  { %2409 = vpush %v1501_v9 }
0x1a0d   :  { %s3119_s16 = spop %2409 }
0x1a5f   :  { %v1523_v15 = vpop.xlane.xlu1 %1522 }
0x1a60   :  { %vm1524_vm9 = vcmp.eq.f32.partialorder %v1521_v50, %v1523_v15  ;;  %v1529_v36 = vcvt.f32.s32 %v1523_v15 }
0x1a61   :  { %v1525_v42 = vsel %vm1524_vm9, %v1520_v60, inf }
0x1a62   :  { %1526 = vmin.xlane.f32.xlu1 %v1525_v42  ;;  %v1530_v16 = vshll.u32 %v1529_v36, 16 }
0x1a66   :  { %1544 = vmin.xlane.f32.xlu1 %v1543_v19 }
0x1aeb   :  { %v1527_v8 = vpop.xlane.xlu1 %1526 }
0x1aec   :  { %v1528_v17 = vcvt.f32.s32 %v1527_v8 }
0x1aee   :  { %v1531_v20 = vadd.s32 %v1530_v16, %v1528_v17 }
0x1aef   :  { %v1545_v21 = vpop.xlane.xlu1 %1544 }
0x1af0   :  { %v1532_v5 = vrot.slane %v1531_v20, 4  ;;  %v1546_v55 = vrot.slane %v1545_v21, 4 }
0x1af2   :  { %vm1533_vm10 = vcmp.lt.s32.totalorder %v1531_v20, %v1532_v5  ;;  %v1547_v23 = vmin.f32 %v1545_v21, %v1546_v55 }
0x1af3   :  { %v1534_v24 = vsel %vm1533_vm10, %v1531_v20, %v1532_v5 }
0x1af4   :  { %v1548_v26 = vrot.slane %v1547_v23, 2  ;;  %v1535_v27 = vrot.slane %v1534_v24, 2 }
0x1af6   :  { %vm1536_vm11 = vcmp.lt.s32.totalorder %v1534_v24, %v1535_v27  ;;  %v1549_v61 = vmin.f32 %v1547_v23, %v1548_v26 }
0x1af7   :  { %v1537_v33 = vsel %vm1536_vm11, %v1534_v24, %v1535_v27 }
0x1af8   :  { %v1538_v28 = vrot.slane %v1537_v33, 1  ;;  %v1550_v29 = vrot.slane %v1549_v61, 1 }
0x1afa   :  { %vm1539_vm12 = vcmp.lt.s32.totalorder %v1537_v33, %v1538_v28  ;;  %v1551_v30 = vmin.f32 %v1549_v61, %v1550_v29 }
0x1afb   :  { %v1540_v31 = vsel %vm1539_vm12, %v1537_v33, %v1538_v28 }
0x1afc   :  { %2411 = vpush %v1540_v31 }
0x1afd   :  { %2413 = vpush %v1551_v30 }
0x1b2d   :  { %s2412_s20 = spop %2411 }
0x1b2e   :  { %s1542_s24 = sand.u32 127, %s2412_s20  ;;  %s2414_s26 = spop %2413 }
0x1b2f   :  { %v1567_v35 = vstv %s1542_s24  ;;  %s1553_s27 = smax.f32 %s2588_s17, %s2414_s26  ;;  %s1570_s3 = scalar_lea.vmem [#allocation2], %s1542_s24 }
0x1b30   :  { %vm1568_vm13 = vcmp.eq.s32.totalorder %v2673_v25, %v1567_v35  ;;  %v1571_v57 = vld [vmem:[%s1570_s3] sm:$0x1]  ;;  %v1554_v32 = vstv %s1553_s27 }
0x1b31   :  { %vm3125_vm14 = vmor %vm3110_vm6, %vm1568_vm13  ;;  %v1572_v10 = vmin.f32 %v1513_v58, %v1571_v57  ;;  %2537 = vrsqrt.f32 %v1554_v32  ;;  %vm1557_vm15 = vcmp.eq.f32.partialorder %v1554_v32, inf  ;;  %v1560_v44 = vand.u32 2147483648, %v1554_v32 }
0x1b32   :  { %vm1559_vm1 = vcmp.eq.f32.partialorder %v1554_v32, 0.0 }
0x1b33   :  { %v1573_v37 = vsel %vm3125_vm14, 1e+30, %v1572_v10 }
0x1b34   :  { %v1575_v38 = vand.u32 4294967168, %v1573_v37  ;;  %v1603_v52 = vsel %vm437_vm4, %v1573_v37, inf }
0x1b36   :  { %v1576_v39 = vor.u32 %v1575_v38, %v2673_v25 }
0x1b38   :  { %v1577_v40 = vsel %vm437_vm4, %v1576_v39, 2147483647 }
0x1b39   :  { %v1579_v59 = vshra.s32 %v1577_v40, 16  ;;  %v1578_v47 = vand.u32 65535, %v1577_v40 }
0x1b3b   :  { %v1581_v62 = vcvt.s32.f32 %v1579_v59  ;;  %v1580_v48 = vcvt.s32.f32 %v1578_v47 }
0x1b3d   :  { %1582 = vmin.xlane.f32.xlu0 %v1581_v62 }
0x1b3e   :  { %v2538_v41 = vpop.eup %2537 }
0x1b3f   :  { %v1556_v43 = vmul.f32 %v2538_v41, %v1554_v32 }
0x1b41   :  { %v1558_v45 = vsel %vm1557_vm15, %v1554_v32, %v1556_v43 }
0x1b42   :  { %v1561_v46 = vsel %vm1559_vm1, %v1560_v44, %v1558_v45 }
0x1b43   :  { %2415 = vpush %v1561_v46 }
0x1b74   :  { %s3134_s4 = spop %2415 }
0x1bc6   :  { %v1583_v3 = vpop.xlane.xlu0 %1582 }
0x1bc7   :  { %vm1584_vm2 = vcmp.eq.f32.partialorder %v1581_v62, %v1583_v3  ;;  %v1589_v53 = vcvt.f32.s32 %v1583_v3 }
0x1bc8   :  { %v1585_v49 = vsel %vm1584_vm2, %v1580_v48, inf }
0x1bc9   :  { %1586 = vmin.xlane.f32.xlu0 %v1585_v49  ;;  %v1590_v56 = vshll.u32 %v1589_v53, 16 }
0x1bcd   :  { %1604 = vmin.xlane.f32.xlu0 %v1603_v52 }
0x1c52   :  { %v1587_v54 = vpop.xlane.xlu0 %1586 }
0x1c53   :  { %v1588_v63 = vcvt.f32.s32 %v1587_v54 }
0x1c55   :  { %v1591_v0 = vadd.s32 %v1590_v56, %v1588_v63 }
0x1c56   :  { %v1605_v1 = vpop.xlane.xlu0 %1604 }
0x1c57   :  { %v1592_v2 = vrot.slane %v1591_v0, 4  ;;  %v1606_v18 = vrot.slane %v1605_v1, 4 }
0x1c59   :  { %vm1593_vm3 = vcmp.lt.s32.totalorder %v1591_v0, %v1592_v2  ;;  %v1607_v58 = vmin.f32 %v1605_v1, %v1606_v18 }
0x1c5a   :  { %v1594_v51 = vsel %vm1593_vm3, %v1591_v0, %v1592_v2 }
0x1c5b   :  { %v1608_v12 = vrot.slane %v1607_v58, 2  ;;  %v1595_v11 = vrot.slane %v1594_v51, 2 }
0x1c5d   :  { %vm1596_vm5 = vcmp.lt.s32.totalorder %v1594_v51, %v1595_v11  ;;  %v1609_v13 = vmin.f32 %v1607_v58, %v1608_v12 }
0x1c5e   :  { %v1597_v50 = vsel %vm1596_vm5, %v1594_v51, %v1595_v11 }
0x1c5f   :  { %v1598_v4 = vrot.slane %v1597_v50, 1  ;;  %v1610_v6 = vrot.slane %v1609_v13, 1 }
0x1c61   :  { %vm1599_vm6 = vcmp.lt.s32.totalorder %v1597_v50, %v1598_v4  ;;  %v1611_v14 = vmin.f32 %v1609_v13, %v1610_v6 }
0x1c62   :  { %v1600_v22 = vsel %vm1599_vm6, %v1597_v50, %v1598_v4 }
0x1c63   :  { %2417 = vpush %v1600_v22 }
0x1c64   :  { %2419 = vpush %v1611_v14 }
0x1c94   :  { %s2418_s7 = spop %2417 }
0x1c95   :  { %s1602_s9 = sand.u32 127, %s2418_s7  ;;  %s2420_s12 = spop %2419 }
0x1c96   :  { %v1627_v9 = vstv %s1602_s9  ;;  %s1613_s14 = smax.f32 %s2588_s17, %s2420_s12  ;;  %s1630_s15 = scalar_lea.vmem [#allocation2], %s1602_s9 }
0x1c97   :  { %vm1628_vm7 = vcmp.eq.s32.totalorder %v2673_v25, %v1627_v9  ;;  %v1631_v7 = vld [vmem:[%s1630_s15] sm:$0x1]  ;;  %v1614_v15 = vstv %s1613_s14 }
0x1c98   :  { %vm3140_vm8 = vmor %vm3125_vm14, %vm1628_vm7  ;;  %v1632_v42 = vmin.f32 %v1573_v37, %v1631_v7  ;;  %2539 = vrsqrt.f32 %v1614_v15  ;;  %vm1617_vm9 = vcmp.eq.f32.partialorder %v1614_v15, inf  ;;  %v1620_v55 = vand.u32 2147483648, %v1614_v15 }
0x1c99   :  { %vm1619_vm10 = vcmp.eq.f32.partialorder %v1614_v15, 0.0 }
0x1c9a   :  { %v1633_v19 = vsel %vm3140_vm8, 1e+30, %v1632_v42 }
0x1c9b   :  { %v1635_v36 = vand.u32 4294967168, %v1633_v19  ;;  %v1663_v28 = vsel %vm437_vm4, %v1633_v19, inf }
0x1c9d   :  { %v1636_v8 = vor.u32 %v1635_v36, %v2673_v25 }
0x1c9f   :  { %v1637_v16 = vsel %vm437_vm4, %v1636_v8, 2147483647 }
0x1ca0   :  { %v1639_v17 = vshra.s32 %v1637_v16, 16  ;;  %v1638_v26 = vand.u32 65535, %v1637_v16 }
0x1ca2   :  { %v1641_v20 = vcvt.s32.f32 %v1639_v17  ;;  %v1640_v61 = vcvt.s32.f32 %v1638_v26 }
0x1ca4   :  { %1642 = vmin.xlane.f32.xlu1 %v1641_v20 }
0x1ca5   :  { %v2540_v21 = vpop.eup %2539 }
0x1ca6   :  { %v1616_v5 = vmul.f32 %v2540_v21, %v1614_v15 }
0x1ca8   :  { %v1618_v23 = vsel %vm1617_vm9, %v1614_v15, %v1616_v5 }
0x1ca9   :  { %v1621_v24 = vsel %vm1619_vm10, %v1620_v55, %v1618_v23 }
0x1caa   :  { %2421 = vpush %v1621_v24 }
0x1cdb   :  { %s3149_s20 = spop %2421 }
0x1d2d   :  { %v1643_v27 = vpop.xlane.xlu1 %1642 }
0x1d2e   :  { %vm1644_vm11 = vcmp.eq.f32.partialorder %v1641_v20, %v1643_v27  ;;  %v1649_v29 = vcvt.f32.s32 %v1643_v27 }
0x1d2f   :  { %v1645_v33 = vsel %vm1644_vm11, %v1640_v61, inf }
0x1d30   :  { %1646 = vmin.xlane.f32.xlu1 %v1645_v33  ;;  %v1650_v31 = vshll.u32 %v1649_v29, 16 }
0x1d34   :  { %1664 = vmin.xlane.f32.xlu1 %v1663_v28 }
0x1db9   :  { %v1647_v30 = vpop.xlane.xlu1 %1646 }
0x1dba   :  { %v1648_v35 = vcvt.f32.s32 %v1647_v30 }
0x1dbc   :  { %v1651_v57 = vadd.s32 %v1650_v31, %v1648_v35 }
0x1dbd   :  { %v1665_v32 = vpop.xlane.xlu1 %1664 }
0x1dbe   :  { %v1652_v34 = vrot.slane %v1651_v57, 4  ;;  %v1666_v10 = vrot.slane %v1665_v32, 4 }
0x1dc0   :  { %vm1653_vm12 = vcmp.lt.s32.totalorder %v1651_v57, %v1652_v34  ;;  %v1667_v37 = vmin.f32 %v1665_v32, %v1666_v10 }
0x1dc1   :  { %v1654_v38 = vsel %vm1653_vm12, %v1651_v57, %v1652_v34 }
0x1dc2   :  { %v1668_v39 = vrot.slane %v1667_v37, 2  ;;  %v1655_v40 = vrot.slane %v1654_v38, 2 }
0x1dc4   :  { %vm1656_vm13 = vcmp.lt.s32.totalorder %v1654_v38, %v1655_v40  ;;  %v1669_v59 = vmin.f32 %v1667_v37, %v1668_v39 }
0x1dc5   :  { %v1657_v62 = vsel %vm1656_vm13, %v1654_v38, %v1655_v40 }
0x1dc6   :  { %v1658_v41 = vrot.slane %v1657_v62, 1  ;;  %v1670_v43 = vrot.slane %v1669_v59, 1 }
0x1dc8   :  { %vm1659_vm14 = vcmp.lt.s32.totalorder %v1657_v62, %v1658_v41  ;;  %v1671_v44 = vmin.f32 %v1669_v59, %v1670_v43 }
0x1dc9   :  { %v1660_v45 = vsel %vm1659_vm14, %v1657_v62, %v1658_v41 }
0x1dca   :  { %2423 = vpush %v1660_v45 }
0x1dcb   :  { %2425 = vpush %v1671_v44 }
0x1dfb   :  { %s2424_s24 = spop %2423 }
0x1dfc   :  { %s1662_s26 = sand.u32 127, %s2424_s24  ;;  %s2426_s27 = spop %2425 }
0x1dfd   :  { %v1687_v46 = vstv %s1662_s26  ;;  %s1673_s3 = smax.f32 %s2588_s17, %s2426_s27  ;;  %s1690_s7 = scalar_lea.vmem [#allocation2], %s1662_s26 }
0x1dfe   :  { %vm1688_vm15 = vcmp.eq.s32.totalorder %v2673_v25, %v1687_v46  ;;  %v1691_v47 = vld [vmem:[%s1690_s7] sm:$0x1]  ;;  %v1674_v3 = vstv %s1673_s3 }
0x1dff   :  { %vm3155_vm1 = vmor %vm3140_vm8, %vm1688_vm15  ;;  %v1692_v49 = vmin.f32 %v1633_v19, %v1691_v47  ;;  %2541 = vrsqrt.f32 %v1674_v3  ;;  %vm1677_vm2 = vcmp.eq.f32.partialorder %v1674_v3, inf  ;;  %v1680_v18 = vand.u32 2147483648, %v1674_v3 }
0x1e00   :  { %vm1679_vm3 = vcmp.eq.f32.partialorder %v1674_v3, 0.0 }
0x1e01   :  { %v1693_v52 = vsel %vm3155_vm1, 1e+30, %v1692_v49 }
0x1e02   :  { %v1695_v53 = vand.u32 4294967168, %v1693_v52  ;;  %v1723_v4 = vsel %vm437_vm4, %v1693_v52, inf }
0x1e04   :  { %v1696_v54 = vor.u32 %v1695_v53, %v2673_v25 }
0x1e06   :  { %v1697_v56 = vsel %vm437_vm4, %v1696_v54, 2147483647 }
0x1e07   :  { %v1699_v63 = vshra.s32 %v1697_v56, 16  ;;  %v1698_v12 = vand.u32 65535, %v1697_v56 }
0x1e09   :  { %v1701_v0 = vcvt.s32.f32 %v1699_v63  ;;  %v1700_v13 = vcvt.s32.f32 %v1698_v12 }
0x1e0b   :  { %1702 = vmin.xlane.f32.xlu0 %v1701_v0 }
0x1e0c   :  { %v2542_v1 = vpop.eup %2541 }
0x1e0d   :  { %v1676_v2 = vmul.f32 %v2542_v1, %v1674_v3 }
0x1e0f   :  { %v1678_v58 = vsel %vm1677_vm2, %v1674_v3, %v1676_v2 }
0x1e10   :  { %v1681_v51 = vsel %vm1679_vm3, %v1680_v18, %v1678_v58 }
0x1e11   :  { %2427 = vpush %v1681_v51 }
0x1e42   :  { %s3164_s9 = spop %2427 }
0x1e94   :  { %v1703_v11 = vpop.xlane.xlu0 %1702 }
0x1e95   :  { %vm1704_vm5 = vcmp.eq.f32.partialorder %v1701_v0, %v1703_v11  ;;  %v1709_v6 = vcvt.f32.s32 %v1703_v11 }
0x1e96   :  { %v1705_v50 = vsel %vm1704_vm5, %v1700_v13, inf }
0x1e97   :  { %1706 = vmin.xlane.f32.xlu0 %v1705_v50  ;;  %v1710_v22 = vshll.u32 %v1709_v6, 16 }
0x1e9b   :  { %1724 = vmin.xlane.f32.xlu0 %v1723_v4 }
0x1f20   :  { %v1707_v14 = vpop.xlane.xlu0 %1706 }
0x1f21   :  { %v1708_v9 = vcvt.f32.s32 %v1707_v14 }
0x1f23   :  { %v1711_v7 = vadd.s32 %v1710_v22, %v1708_v9 }
0x1f24   :  { %v1725_v15 = vpop.xlane.xlu0 %1724 }
0x1f25   :  { %v1712_v60 = vrot.slane %v1711_v7, 4  ;;  %v1726_v42 = vrot.slane %v1725_v15, 4 }
0x1f27   :  { %vm1713_vm6 = vcmp.lt.s32.totalorder %v1711_v7, %v1712_v60  ;;  %v1727_v19 = vmin.f32 %v1725_v15, %v1726_v42 }
0x1f28   :  { %v1714_v36 = vsel %vm1713_vm6, %v1711_v7, %v1712_v60 }
0x1f29   :  { %v1728_v8 = vrot.slane %v1727_v19, 2  ;;  %v1715_v16 = vrot.slane %v1714_v36, 2 }
0x1f2b   :  { %vm1716_vm7 = vcmp.lt.s32.totalorder %v1714_v36, %v1715_v16  ;;  %v1729_v17 = vmin.f32 %v1727_v19, %v1728_v8 }
0x1f2c   :  { %v1717_v20 = vsel %vm1716_vm7, %v1714_v36, %v1715_v16 }
0x1f2d   :  { %v1718_v21 = vrot.slane %v1717_v20, 1  ;;  %v1730_v5 = vrot.slane %v1729_v17, 1 }
0x1f2f   :  { %vm1719_vm8 = vcmp.lt.s32.totalorder %v1717_v20, %v1718_v21  ;;  %v1731_v55 = vmin.f32 %v1729_v17, %v1730_v5 }
0x1f30   :  { %v1720_v23 = vsel %vm1719_vm8, %v1717_v20, %v1718_v21 }
0x1f31   :  { %2429 = vpush %v1720_v23 }
0x1f32   :  { %2431 = vpush %v1731_v55 }
0x1f62   :  { %s2430_s12 = spop %2429 }
0x1f63   :  { %s1722_s14 = sand.u32 127, %s2430_s12  ;;  %s2432_s15 = spop %2431 }
0x1f64   :  { %v1747_v24 = vstv %s1722_s14  ;;  %s1733_s24 = smax.f32 %s2588_s17, %s2432_s15  ;;  %s1750_s26 = scalar_lea.vmem [#allocation2], %s1722_s14 }
0x1f65   :  { %vm1748_vm9 = vcmp.eq.s32.totalorder %v2673_v25, %v1747_v24  ;;  %v1751_v26 = vld [vmem:[%s1750_s26] sm:$0x1]  ;;  %v1734_v27 = vstv %s1733_s24 }
0x1f66   :  { %vm3170_vm10 = vmor %vm3155_vm1, %vm1748_vm9  ;;  %v1752_v33 = vmin.f32 %v1693_v52, %v1751_v26  ;;  %2543 = vrsqrt.f32 %v1734_v27  ;;  %vm1737_vm11 = vcmp.eq.f32.partialorder %v1734_v27, inf  ;;  %v1740_v10 = vand.u32 2147483648, %v1734_v27 }
0x1f67   :  { %vm1739_vm12 = vcmp.eq.f32.partialorder %v1734_v27, 0.0 }
0x1f68   :  { %v1753_v28 = vsel %vm3170_vm10, 1e+30, %v1752_v33 }
0x1f69   :  { %v1755_v29 = vand.u32 4294967168, %v1753_v28  ;;  %v1783_v41 = vsel %vm437_vm4, %v1753_v28, inf }
0x1f6b   :  { %v1756_v30 = vor.u32 %v1755_v29, %v2673_v25 }
0x1f6d   :  { %v1757_v31 = vsel %vm437_vm4, %v1756_v30, 2147483647 }
0x1f6e   :  { %v1759_v35 = vshra.s32 %v1757_v31, 16  ;;  %v1758_v39 = vand.u32 65535, %v1757_v31 }
0x1f70   :  { %v1761_v57 = vcvt.s32.f32 %v1759_v35  ;;  %v1760_v59 = vcvt.s32.f32 %v1758_v39 }
0x1f72   :  { %1762 = vmin.xlane.f32.xlu1 %v1761_v57 }
0x1f73   :  { %v2544_v32 = vpop.eup %2543 }
0x1f74   :  { %v1736_v34 = vmul.f32 %v2544_v32, %v1734_v27 }
0x1f76   :  { %v1738_v37 = vsel %vm1737_vm11, %v1734_v27, %v1736_v34 }
0x1f77   :  { %v1741_v38 = vsel %vm1739_vm12, %v1740_v10, %v1738_v37 }
0x1f78   :  { %2433 = vpush %v1741_v38 }
0x1fa9   :  { %s3179_s27 = spop %2433 }
0x1ffb   :  { %v1763_v40 = vpop.xlane.xlu1 %1762 }
0x1ffc   :  { %vm1764_vm13 = vcmp.eq.f32.partialorder %v1761_v57, %v1763_v40  ;;  %v1769_v43 = vcvt.f32.s32 %v1763_v40 }
0x1ffd   :  { %v1765_v62 = vsel %vm1764_vm13, %v1760_v59, inf }
0x1ffe   :  { %1766 = vmin.xlane.f32.xlu1 %v1765_v62  ;;  %v1770_v45 = vshll.u32 %v1769_v43, 16 }
0x2002   :  { %1784 = vmin.xlane.f32.xlu1 %v1783_v41 }
0x2087   :  { %v1767_v44 = vpop.xlane.xlu1 %1766 }
0x2088   :  { %v1768_v46 = vcvt.f32.s32 %v1767_v44 }
0x208a   :  { %v1771_v47 = vadd.s32 %v1770_v45, %v1768_v46 }
0x208b   :  { %v1785_v3 = vpop.xlane.xlu1 %1784 }
0x208c   :  { %v1772_v48 = vrot.slane %v1771_v47, 4  ;;  %v1786_v49 = vrot.slane %v1785_v3, 4 }
0x208e   :  { %vm1773_vm14 = vcmp.lt.s32.totalorder %v1771_v47, %v1772_v48  ;;  %v1787_v52 = vmin.f32 %v1785_v3, %v1786_v49 }
0x208f   :  { %v1774_v53 = vsel %vm1773_vm14, %v1771_v47, %v1772_v48 }
0x2090   :  { %v1788_v54 = vrot.slane %v1787_v52, 2  ;;  %v1775_v56 = vrot.slane %v1774_v53, 2 }
0x2092   :  { %vm1776_vm15 = vcmp.lt.s32.totalorder %v1774_v53, %v1775_v56  ;;  %v1789_v63 = vmin.f32 %v1787_v52, %v1788_v54 }
0x2093   :  { %v1777_v0 = vsel %vm1776_vm15, %v1774_v53, %v1775_v56 }
0x2094   :  { %v1778_v1 = vrot.slane %v1777_v0, 1  ;;  %v1790_v2 = vrot.slane %v1789_v63, 1 }
0x2096   :  { %vm1779_vm1 = vcmp.lt.s32.totalorder %v1777_v0, %v1778_v1  ;;  %v1791_v18 = vmin.f32 %v1789_v63, %v1790_v2 }
0x2097   :  { %v1780_v58 = vsel %vm1779_vm1, %v1777_v0, %v1778_v1 }
0x2098   :  { %2435 = vpush %v1780_v58 }
0x2099   :  { %2437 = vpush %v1791_v18 }
0x20c9   :  { %s2436_s3 = spop %2435 }
0x20ca   :  { %s1782_s7 = sand.u32 127, %s2436_s3  ;;  %s2438_s12 = spop %2437 }
0x20cb   :  { %v1807_v51 = vstv %s1782_s7  ;;  %s1793_s14 = smax.f32 %s2588_s17, %s2438_s12  ;;  %s1810_s15 = scalar_lea.vmem [#allocation2], %s1782_s7 }
0x20cc   :  { %vm1808_vm2 = vcmp.eq.s32.totalorder %v2673_v25, %v1807_v51  ;;  %v1811_v12 = vld [vmem:[%s1810_s15] sm:$0x1]  ;;  %v1794_v11 = vstv %s1793_s14 }
0x20cd   :  { %vm3185_vm3 = vmor %vm3170_vm10, %vm1808_vm2  ;;  %v1812_v50 = vmin.f32 %v1753_v28, %v1811_v12  ;;  %2545 = vrsqrt.f32 %v1794_v11  ;;  %vm1797_vm5 = vcmp.eq.f32.partialorder %v1794_v11, inf  ;;  %v1800_v42 = vand.u32 2147483648, %v1794_v11 }
0x20ce   :  { %vm1799_vm6 = vcmp.eq.f32.partialorder %v1794_v11, 0.0 }
0x20cf   :  { %v1813_v4 = vsel %vm3185_vm3, 1e+30, %v1812_v50 }
0x20d0   :  { %v1815_v6 = vand.u32 4294967168, %v1813_v4  ;;  %v1843_v21 = vsel %vm437_vm4, %v1813_v4, inf }
0x20d2   :  { %v1816_v14 = vor.u32 %v1815_v6, %v2673_v25 }
0x20d4   :  { %v1817_v22 = vsel %vm437_vm4, %v1816_v14, 2147483647 }
0x20d5   :  { %v1819_v9 = vshra.s32 %v1817_v22, 16  ;;  %v1818_v8 = vand.u32 65535, %v1817_v22 }
0x20d7   :  { %v1821_v7 = vcvt.s32.f32 %v1819_v9  ;;  %v1820_v17 = vcvt.s32.f32 %v1818_v8 }
0x20d9   :  { %1822 = vmin.xlane.f32.xlu0 %v1821_v7 }
0x20da   :  { %v2546_v15 = vpop.eup %2545 }
0x20db   :  { %v1796_v60 = vmul.f32 %v2546_v15, %v1794_v11 }
0x20dd   :  { %v1798_v19 = vsel %vm1797_vm5, %v1794_v11, %v1796_v60 }
0x20de   :  { %v1801_v36 = vsel %vm1799_vm6, %v1800_v42, %v1798_v19 }
0x20df   :  { %2439 = vpush %v1801_v36 }
0x2110   :  { %s3194_s24 = spop %2439 }
0x2162   :  { %v1823_v16 = vpop.xlane.xlu0 %1822 }
0x2163   :  { %vm1824_vm7 = vcmp.eq.f32.partialorder %v1821_v7, %v1823_v16  ;;  %v1829_v5 = vcvt.f32.s32 %v1823_v16 }
0x2164   :  { %v1825_v20 = vsel %vm1824_vm7, %v1820_v17, inf }
0x2165   :  { %1826 = vmin.xlane.f32.xlu0 %v1825_v20  ;;  %v1830_v23 = vshll.u32 %v1829_v5, 16 }
0x2169   :  { %1844 = vmin.xlane.f32.xlu0 %v1843_v21 }
0x21ee   :  { %v1827_v55 = vpop.xlane.xlu0 %1826 }
0x21ef   :  { %v1828_v24 = vcvt.f32.s32 %v1827_v55 }
0x21f1   :  { %v1831_v26 = vadd.s32 %v1830_v23, %v1828_v24 }
0x21f2   :  { %v1845_v27 = vpop.xlane.xlu0 %1844 }
0x21f3   :  { %v1832_v61 = vrot.slane %v1831_v26, 4  ;;  %v1846_v33 = vrot.slane %v1845_v27, 4 }
0x21f5   :  { %vm1833_vm8 = vcmp.lt.s32.totalorder %v1831_v26, %v1832_v61  ;;  %v1847_v28 = vmin.f32 %v1845_v27, %v1846_v33 }
0x21f6   :  { %v1834_v29 = vsel %vm1833_vm8, %v1831_v26, %v1832_v61 }
0x21f7   :  { %v1848_v30 = vrot.slane %v1847_v28, 2  ;;  %v1835_v31 = vrot.slane %v1834_v29, 2 }
0x21f9   :  { %vm1836_vm9 = vcmp.lt.s32.totalorder %v1834_v29, %v1835_v31  ;;  %v1849_v35 = vmin.f32 %v1847_v28, %v1848_v30 }
0x21fa   :  { %v1837_v57 = vsel %vm1836_vm9, %v1834_v29, %v1835_v31 }
0x21fb   :  { %v1838_v32 = vrot.slane %v1837_v57, 1  ;;  %v1850_v34 = vrot.slane %v1849_v35, 1 }
0x21fd   :  { %vm1839_vm10 = vcmp.lt.s32.totalorder %v1837_v57, %v1838_v32  ;;  %v1851_v10 = vmin.f32 %v1849_v35, %v1850_v34 }
0x21fe   :  { %v1840_v37 = vsel %vm1839_vm10, %v1837_v57, %v1838_v32 }
0x21ff   :  { %2441 = vpush %v1840_v37 }
0x2200   :  { %2443 = vpush %v1851_v10 }
0x2230   :  { %s2442_s26 = spop %2441 }
0x2231   :  { %s1842_s3 = sand.u32 127, %s2442_s26  ;;  %s2444_s7 = spop %2443 }
0x2232   :  { %v1867_v38 = vstv %s1842_s3  ;;  %s1853_s12 = smax.f32 %s2588_s17, %s2444_s7  ;;  %s1870_s14 = scalar_lea.vmem [#allocation2], %s1842_s3 }
0x2233   :  { %vm1868_vm11 = vcmp.eq.s32.totalorder %v2673_v25, %v1867_v38  ;;  %v1871_v39 = vld [vmem:[%s1870_s14] sm:$0x1]  ;;  %v1854_v40 = vstv %s1853_s12 }
0x2234   :  { %vm3200_vm12 = vmor %vm3185_vm3, %vm1868_vm11  ;;  %v1872_v62 = vmin.f32 %v1813_v4, %v1871_v39  ;;  %2547 = vrsqrt.f32 %v1854_v40  ;;  %vm1857_vm13 = vcmp.eq.f32.partialorder %v1854_v40, inf  ;;  %v1860_v49 = vand.u32 2147483648, %v1854_v40 }
0x2235   :  { %vm1859_vm14 = vcmp.eq.f32.partialorder %v1854_v40, 0.0 }
0x2236   :  { %v1873_v41 = vsel %vm3200_vm12, 1e+30, %v1872_v62 }
0x2237   :  { %v1875_v43 = vand.u32 4294967168, %v1873_v41  ;;  %v1903_v1 = vsel %vm437_vm4, %v1873_v41, inf }
0x2239   :  { %v1876_v44 = vor.u32 %v1875_v43, %v2673_v25 }
0x223b   :  { %v1877_v45 = vsel %vm437_vm4, %v1876_v44, 2147483647 }
0x223c   :  { %v1879_v46 = vshra.s32 %v1877_v45, 16  ;;  %v1878_v54 = vand.u32 65535, %v1877_v45 }
0x223e   :  { %v1881_v47 = vcvt.s32.f32 %v1879_v46  ;;  %v1880_v63 = vcvt.s32.f32 %v1878_v54 }
0x2240   :  { %1882 = vmin.xlane.f32.xlu1 %v1881_v47 }
0x2241   :  { %v2548_v3 = vpop.eup %2547 }
0x2242   :  { %v1856_v48 = vmul.f32 %v2548_v3, %v1854_v40 }
0x2244   :  { %v1858_v52 = vsel %vm1857_vm13, %v1854_v40, %v1856_v48 }
0x2245   :  { %v1861_v53 = vsel %vm1859_vm14, %v1860_v49, %v1858_v52 }
0x2246   :  { %2445 = vpush %v1861_v53 }
0x2277   :  { %s3209_s15 = spop %2445 }
0x22c9   :  { %v1883_v56 = vpop.xlane.xlu1 %1882 }
0x22ca   :  { %vm1884_vm15 = vcmp.eq.f32.partialorder %v1881_v47, %v1883_v56  ;;  %v1889_v2 = vcvt.f32.s32 %v1883_v56 }
0x22cb   :  { %v1885_v0 = vsel %vm1884_vm15, %v1880_v63, inf }
0x22cc   :  { %1886 = vmin.xlane.f32.xlu1 %v1885_v0  ;;  %v1890_v58 = vshll.u32 %v1889_v2, 16 }
0x22d0   :  { %1904 = vmin.xlane.f32.xlu1 %v1903_v1 }
0x2355   :  { %v1887_v18 = vpop.xlane.xlu1 %1886 }
0x2356   :  { %v1888_v51 = vcvt.f32.s32 %v1887_v18 }
0x2358   :  { %v1891_v12 = vadd.s32 %v1890_v58, %v1888_v51 }
0x2359   :  { %v1905_v11 = vpop.xlane.xlu1 %1904 }
0x235a   :  { %v1892_v13 = vrot.slane %v1891_v12, 4  ;;  %v1906_v50 = vrot.slane %v1905_v11, 4 }
0x235c   :  { %vm1893_vm1 = vcmp.lt.s32.totalorder %v1891_v12, %v1892_v13  ;;  %v1907_v4 = vmin.f32 %v1905_v11, %v1906_v50 }
0x235d   :  { %v1894_v6 = vsel %vm1893_vm1, %v1891_v12, %v1892_v13 }
0x235e   :  { %v1908_v14 = vrot.slane %v1907_v4, 2  ;;  %v1895_v22 = vrot.slane %v1894_v6, 2 }
0x2360   :  { %vm1896_vm2 = vcmp.lt.s32.totalorder %v1894_v6, %v1895_v22  ;;  %v1909_v9 = vmin.f32 %v1907_v4, %v1908_v14 }
0x2361   :  { %v1897_v7 = vsel %vm1896_vm2, %v1894_v6, %v1895_v22 }
0x2362   :  { %v1898_v15 = vrot.slane %v1897_v7, 1  ;;  %v1910_v60 = vrot.slane %v1909_v9, 1 }
0x2364   :  { %vm1899_vm3 = vcmp.lt.s32.totalorder %v1897_v7, %v1898_v15  ;;  %v1911_v42 = vmin.f32 %v1909_v9, %v1910_v60 }
0x2365   :  { %v1900_v19 = vsel %vm1899_vm3, %v1897_v7, %v1898_v15 }
0x2366   :  { %2447 = vpush %v1900_v19 }
0x2367   :  { %2449 = vpush %v1911_v42 }
0x2397   :  { %s2448_s26 = spop %2447 }
0x2398   :  { %s1902_s3 = sand.u32 127, %s2448_s26  ;;  %s2450_s7 = spop %2449 }
0x2399   :  { %v1927_v36 = vstv %s1902_s3  ;;  %s1913_s12 = smax.f32 %s2588_s17, %s2450_s7  ;;  %s1930_s14 = scalar_lea.vmem [#allocation2], %s1902_s3 }
0x239a   :  { %vm1928_vm5 = vcmp.eq.s32.totalorder %v2673_v25, %v1927_v36  ;;  %v1931_v8 = vld [vmem:[%s1930_s14] sm:$0x1]  ;;  %v1914_v16 = vstv %s1913_s12 }
0x239b   :  { %vm3215_vm6 = vmor %vm3200_vm12, %vm1928_vm5  ;;  %v1932_v20 = vmin.f32 %v1873_v41, %v1931_v8  ;;  %2549 = vrsqrt.f32 %v1914_v16  ;;  %vm1917_vm7 = vcmp.eq.f32.partialorder %v1914_v16, inf  ;;  %v1920_v33 = vand.u32 2147483648, %v1914_v16 }
0x239c   :  { %vm1919_vm8 = vcmp.eq.f32.partialorder %v1914_v16, 0.0 }
0x239d   :  { %v1933_v21 = vsel %vm3215_vm6, 1e+30, %v1932_v20 }
0x239e   :  { %v1935_v5 = vand.u32 4294967168, %v1933_v21  ;;  %v1963_v32 = vsel %vm437_vm4, %v1933_v21, inf }
0x23a0   :  { %v1936_v55 = vor.u32 %v1935_v5, %v2673_v25 }
0x23a2   :  { %v1937_v23 = vsel %vm437_vm4, %v1936_v55, 2147483647 }
0x23a3   :  { %v1939_v24 = vshra.s32 %v1937_v23, 16  ;;  %v1938_v30 = vand.u32 65535, %v1937_v23 }
0x23a5   :  { %v1941_v26 = vcvt.s32.f32 %v1939_v24  ;;  %v1940_v35 = vcvt.s32.f32 %v1938_v30 }
0x23a7   :  { %1942 = vmin.xlane.f32.xlu0 %v1941_v26 }
0x23a8   :  { %v2550_v27 = vpop.eup %2549 }
0x23a9   :  { %v1916_v61 = vmul.f32 %v2550_v27, %v1914_v16 }
0x23ab   :  { %v1918_v28 = vsel %vm1917_vm7, %v1914_v16, %v1916_v61 }
0x23ac   :  { %v1921_v29 = vsel %vm1919_vm8, %v1920_v33, %v1918_v28 }
0x23ad   :  { %2451 = vpush %v1921_v29 }
0x23de   :  { %s3224_s26 = spop %2451 }
0x23df   :  { %3415 = sst [smem:[#allocation6_spill]] %s3224_s26 }
0x2430   :  { %v1943_v31 = vpop.xlane.xlu0 %1942 }
0x2431   :  { %vm1944_vm9 = vcmp.eq.f32.partialorder %v1941_v26, %v1943_v31  ;;  %v1949_v34 = vcvt.f32.s32 %v1943_v31 }
0x2432   :  { %v1945_v57 = vsel %vm1944_vm9, %v1940_v35, inf }
0x2433   :  { %1946 = vmin.xlane.f32.xlu0 %v1945_v57  ;;  %v1950_v37 = vshll.u32 %v1949_v34, 16 }
0x2437   :  { %1964 = vmin.xlane.f32.xlu0 %v1963_v32 }
0x24bc   :  { %v1947_v10 = vpop.xlane.xlu0 %1946 }
0x24bd   :  { %v1948_v38 = vcvt.f32.s32 %v1947_v10 }
0x24bf   :  { %v1951_v39 = vadd.s32 %v1950_v37, %v1948_v38 }
0x24c0   :  { %v1965_v40 = vpop.xlane.xlu0 %1964 }
0x24c1   :  { %v1952_v59 = vrot.slane %v1951_v39, 4  ;;  %v1966_v62 = vrot.slane %v1965_v40, 4 }
0x24c3   :  { %vm1953_vm10 = vcmp.lt.s32.totalorder %v1951_v39, %v1952_v59  ;;  %v1967_v41 = vmin.f32 %v1965_v40, %v1966_v62 }
0x24c4   :  { %v1954_v43 = vsel %vm1953_vm10, %v1951_v39, %v1952_v59 }
0x24c5   :  { %v1968_v44 = vrot.slane %v1967_v41, 2  ;;  %v1955_v45 = vrot.slane %v1954_v43, 2 }
0x24c7   :  { %vm1956_vm11 = vcmp.lt.s32.totalorder %v1954_v43, %v1955_v45  ;;  %v1969_v46 = vmin.f32 %v1967_v41, %v1968_v44 }
0x24c8   :  { %v1957_v47 = vsel %vm1956_vm11, %v1954_v43, %v1955_v45 }
0x24c9   :  { %v1958_v3 = vrot.slane %v1957_v47, 1  ;;  %v1970_v48 = vrot.slane %v1969_v46, 1 }
0x24cb   :  { %vm1959_vm12 = vcmp.lt.s32.totalorder %v1957_v47, %v1958_v3  ;;  %v1971_v49 = vmin.f32 %v1969_v46, %v1970_v48 }
0x24cc   :  { %v1960_v52 = vsel %vm1959_vm12, %v1957_v47, %v1958_v3 }
0x24cd   :  { %2453 = vpush %v1960_v52 }
0x24ce   :  { %2455 = vpush %v1971_v49 }
0x24fe   :  { %s2454_s3 = spop %2453 }
0x24ff   :  { %s1962_s7 = sand.u32 127, %s2454_s3  ;;  %s2456_s12 = spop %2455 }
0x2500   :  { %v1987_v53 = vstv %s1962_s7  ;;  %s1973_s14 = smax.f32 %s2588_s17, %s2456_s12  ;;  %s1990_s2 = scalar_lea.vmem [#allocation2], %s1962_s7 }
0x2501   :  { %vm1988_vm13 = vcmp.eq.s32.totalorder %v2673_v25, %v1987_v53  ;;  %v1991_v54 = vld [vmem:[%s1990_s2] sm:$0x1]  ;;  %v1974_v56 = vstv %s1973_s14 }
0x2502   :  { %vm3230_vm14 = vmor %vm3215_vm6, %vm1988_vm13  ;;  %v1992_v0 = vmin.f32 %v1933_v21, %v1991_v54  ;;  %2551 = vrsqrt.f32 %v1974_v56  ;;  %vm1977_vm15 = vcmp.eq.f32.partialorder %v1974_v56, inf  ;;  %v1980_v50 = vand.u32 2147483648, %v1974_v56 }
0x2503   :  { %vm1979_vm1 = vcmp.eq.f32.partialorder %v1974_v56, 0.0 }
0x2504   :  { %v1993_v1 = vsel %vm3230_vm14, 1e+30, %v1992_v0 }
0x2505   :  { %v1995_v2 = vand.u32 4294967168, %v1993_v1  ;;  %v2023_v15 = vsel %vm437_vm4, %v1993_v1, inf }
0x2507   :  { %v1996_v18 = vor.u32 %v1995_v2, %v2673_v25 }
0x2509   :  { %v1997_v58 = vsel %vm437_vm4, %v1996_v18, 2147483647 }
0x250a   :  { %v1999_v51 = vshra.s32 %v1997_v58, 16  ;;  %v1998_v14 = vand.u32 65535, %v1997_v58 }
0x250c   :  { %v2001_v12 = vcvt.s32.f32 %v1999_v51  ;;  %v2000_v9 = vcvt.s32.f32 %v1998_v14 }
0x250e   :  { %2002 = vmin.xlane.f32.xlu1 %v2001_v12 }
0x250f   :  { %v2552_v11 = vpop.eup %2551 }
0x2510   :  { %v1976_v13 = vmul.f32 %v2552_v11, %v1974_v56 }
0x2512   :  { %v1978_v4 = vsel %vm1977_vm15, %v1974_v56, %v1976_v13 }
0x2513   :  { %v1981_v6 = vsel %vm1979_vm1, %v1980_v50, %v1978_v4 }
0x2514   :  { %2457 = vpush %v1981_v6 }
0x2545   :  { %s3239_s2 = spop %2457 }
0x2546   :  { %3418 = sst [smem:[#allocation7_spill]] %s3239_s2 }
0x2597   :  { %v2003_v22 = vpop.xlane.xlu1 %2002 }
0x2598   :  { %vm2004_vm2 = vcmp.eq.f32.partialorder %v2001_v12, %v2003_v22  ;;  %v2009_v60 = vcvt.f32.s32 %v2003_v22 }
0x2599   :  { %v2005_v7 = vsel %vm2004_vm2, %v2000_v9, inf }
0x259a   :  { %2006 = vmin.xlane.f32.xlu1 %v2005_v7  ;;  %v2010_v19 = vshll.u32 %v2009_v60, 16 }
0x259e   :  { %2024 = vmin.xlane.f32.xlu1 %v2023_v15 }
0x2623   :  { %v2007_v42 = vpop.xlane.xlu1 %2006 }
0x2624   :  { %v2008_v36 = vcvt.f32.s32 %v2007_v42 }
0x2626   :  { %v2011_v8 = vadd.s32 %v2010_v19, %v2008_v36 }
0x2627   :  { %v2025_v16 = vpop.xlane.xlu1 %2024 }
0x2628   :  { %v2012_v17 = vrot.slane %v2011_v8, 4  ;;  %v2026_v20 = vrot.slane %v2025_v16, 4 }
0x262a   :  { %vm2013_vm3 = vcmp.lt.s32.totalorder %v2011_v8, %v2012_v17  ;;  %v2027_v21 = vmin.f32 %v2025_v16, %v2026_v20 }
0x262b   :  { %v2014_v5 = vsel %vm2013_vm3, %v2011_v8, %v2012_v17 }
0x262c   :  { %v2028_v55 = vrot.slane %v2027_v21, 2  ;;  %v2015_v23 = vrot.slane %v2014_v5, 2 }
0x262e   :  { %vm2016_vm5 = vcmp.lt.s32.totalorder %v2014_v5, %v2015_v23  ;;  %v2029_v24 = vmin.f32 %v2027_v21, %v2028_v55 }
0x262f   :  { %v2017_v26 = vsel %vm2016_vm5, %v2014_v5, %v2015_v23 }
0x2630   :  { %v2018_v27 = vrot.slane %v2017_v26, 1  ;;  %v2030_v61 = vrot.slane %v2029_v24, 1 }
0x2632   :  { %vm2019_vm6 = vcmp.lt.s32.totalorder %v2017_v26, %v2018_v27  ;;  %v2031_v33 = vmin.f32 %v2029_v24, %v2030_v61 }
0x2633   :  { %v2020_v28 = vsel %vm2019_vm6, %v2017_v26, %v2018_v27 }
0x2634   :  { %2459 = vpush %v2020_v28 }
0x2635   :  { %2461 = vpush %v2031_v33 }
0x2665   :  { %s2460_s3 = spop %2459 }
0x2666   :  { %s2022_s7 = sand.u32 127, %s2460_s3  ;;  %s2462_s12 = spop %2461 }
0x2667   :  { %v2047_v29 = vstv %s2022_s7  ;;  %s2033_s14 = smax.f32 %s2588_s17, %s2462_s12  ;;  %s2050_s26 = scalar_lea.vmem [#allocation2], %s2022_s7 }
0x2668   :  { %vm2048_vm7 = vcmp.eq.s32.totalorder %v2673_v25, %v2047_v29  ;;  %v2051_v30 = vld [vmem:[%s2050_s26] sm:$0x1]  ;;  %v2034_v31 = vstv %s2033_s14 }
0x2669   :  { %vm3245_vm8 = vmor %vm3230_vm14, %vm2048_vm7  ;;  %v2052_v57 = vmin.f32 %v1993_v1, %v2051_v30  ;;  %2553 = vrsqrt.f32 %v2034_v31  ;;  %vm2037_vm9 = vcmp.eq.f32.partialorder %v2034_v31, inf  ;;  %v2040_v62 = vand.u32 2147483648, %v2034_v31 }
0x266a   :  { %vm2039_vm10 = vcmp.eq.f32.partialorder %v2034_v31, 0.0 }
0x266b   :  { %v2053_v32 = vsel %vm3245_vm8, 1e+30, %v2052_v57 }
0x266c   :  { %v2055_v34 = vand.u32 4294967168, %v2053_v32  ;;  %v2083_v3 = vsel %vm437_vm4, %v2053_v32, inf }
0x266e   :  { %v2056_v10 = vor.u32 %v2055_v34, %v2673_v25 }
0x2670   :  { %v2057_v37 = vsel %vm437_vm4, %v2056_v10, 2147483647 }
0x2671   :  { %v2059_v38 = vshra.s32 %v2057_v37, 16  ;;  %v2058_v44 = vand.u32 65535, %v2057_v37 }
0x2673   :  { %v2061_v39 = vcvt.s32.f32 %v2059_v38  ;;  %v2060_v46 = vcvt.s32.f32 %v2058_v44 }
0x2675   :  { %2062 = vmin.xlane.f32.xlu0 %v2061_v39 }
0x2676   :  { %v2554_v40 = vpop.eup %2553 }
0x2677   :  { %v2036_v59 = vmul.f32 %v2554_v40, %v2034_v31 }
0x2679   :  { %v2038_v41 = vsel %vm2037_vm9, %v2034_v31, %v2036_v59 }
0x267a   :  { %v2041_v43 = vsel %vm2039_vm10, %v2040_v62, %v2038_v41 }
0x267b   :  { %2463 = vpush %v2041_v43 }
0x26ac   :  { %s3254_s26 = spop %2463 }
0x26ad   :  { %3421 = sst [smem:[#allocation8_spill]] %s3254_s26 }
0x26fe   :  { %v2063_v45 = vpop.xlane.xlu0 %2062 }
0x26ff   :  { %vm2064_vm11 = vcmp.eq.f32.partialorder %v2061_v39, %v2063_v45  ;;  %v2069_v48 = vcvt.f32.s32 %v2063_v45 }
0x2700   :  { %v2065_v47 = vsel %vm2064_vm11, %v2060_v46, inf }
0x2701   :  { %2066 = vmin.xlane.f32.xlu0 %v2065_v47  ;;  %v2070_v52 = vshll.u32 %v2069_v48, 16 }
0x2705   :  { %2084 = vmin.xlane.f32.xlu0 %v2083_v3 }
0x278a   :  { %v2067_v49 = vpop.xlane.xlu0 %2066 }
0x278b   :  { %v2068_v53 = vcvt.f32.s32 %v2067_v49 }
0x278d   :  { %v2071_v54 = vadd.s32 %v2070_v52, %v2068_v53 }
0x278e   :  { %v2085_v56 = vpop.xlane.xlu0 %2084 }
0x278f   :  { %v2072_v63 = vrot.slane %v2071_v54, 4  ;;  %v2086_v0 = vrot.slane %v2085_v56, 4 }
0x2791   :  { %vm2073_vm12 = vcmp.lt.s32.totalorder %v2071_v54, %v2072_v63  ;;  %v2087_v1 = vmin.f32 %v2085_v56, %v2086_v0 }
0x2792   :  { %v2074_v2 = vsel %vm2073_vm12, %v2071_v54, %v2072_v63 }
0x2793   :  { %v2088_v18 = vrot.slane %v2087_v1, 2  ;;  %v2075_v58 = vrot.slane %v2074_v2, 2 }
0x2795   :  { %vm2076_vm13 = vcmp.lt.s32.totalorder %v2074_v2, %v2075_v58  ;;  %v2089_v51 = vmin.f32 %v2087_v1, %v2088_v18 }
0x2796   :  { %v2077_v12 = vsel %vm2076_vm13, %v2074_v2, %v2075_v58 }
0x2797   :  { %v2078_v11 = vrot.slane %v2077_v12, 1  ;;  %v2090_v13 = vrot.slane %v2089_v51, 1 }
0x2799   :  { %vm2079_vm14 = vcmp.lt.s32.totalorder %v2077_v12, %v2078_v11  ;;  %v2091_v50 = vmin.f32 %v2089_v51, %v2090_v13 }
0x279a   :  { %v2080_v4 = vsel %vm2079_vm14, %v2077_v12, %v2078_v11 }
0x279b   :  { %2465 = vpush %v2080_v4 }
0x279c   :  { %2467 = vpush %v2091_v50 }
0x27cc   :  { %s2466_s3 = spop %2465 }
0x27cd   :  { %s2082_s7 = sand.u32 127, %s2466_s3  ;;  %s2468_s12 = spop %2467 }
0x27ce   :  { %v2107_v6 = vstv %s2082_s7  ;;  %s2093_s14 = smax.f32 %s2588_s17, %s2468_s12  ;;  %s2110_s2 = scalar_lea.vmem [#allocation2], %s2082_s7 }
0x27cf   :  { %vm2108_vm15 = vcmp.eq.s32.totalorder %v2673_v25, %v2107_v6  ;;  %v2111_v14 = vld [vmem:[%s2110_s2] sm:$0x1]  ;;  %v2094_v22 = vstv %s2093_s14 }
0x27d0   :  { %vm3260_vm1 = vmor %vm3245_vm8, %vm2108_vm15  ;;  %v2112_v7 = vmin.f32 %v2053_v32, %v2111_v14  ;;  %2555 = vrsqrt.f32 %v2094_v22  ;;  %vm2097_vm2 = vcmp.eq.f32.partialorder %v2094_v22, inf  ;;  %v2100_v20 = vand.u32 2147483648, %v2094_v22 }
0x27d1   :  { %vm2099_vm3 = vcmp.eq.f32.partialorder %v2094_v22, 0.0 }
0x27d2   :  { %v2113_v15 = vsel %vm3260_vm1, 1e+30, %v2112_v7 }
0x27d3   :  { %v2115_v60 = vand.u32 4294967168, %v2113_v15  ;;  %v2143_v27 = vsel %vm437_vm4, %v2113_v15, inf }
0x27d5   :  { %v2116_v42 = vor.u32 %v2115_v60, %v2673_v25 }
0x27d7   :  { %v2117_v19 = vsel %vm437_vm4, %v2116_v42, 2147483647 }
0x27d8   :  { %v2119_v36 = vshra.s32 %v2117_v19, 16  ;;  %v2118_v55 = vand.u32 65535, %v2117_v19 }
0x27da   :  { %v2121_v8 = vcvt.s32.f32 %v2119_v36  ;;  %v2120_v24 = vcvt.s32.f32 %v2118_v55 }
0x27dc   :  { %2122 = vmin.xlane.f32.xlu1 %v2121_v8 }
0x27dd   :  { %v2556_v16 = vpop.eup %2555 }
0x27de   :  { %v2096_v17 = vmul.f32 %v2556_v16, %v2094_v22 }
0x27e0   :  { %v2098_v21 = vsel %vm2097_vm2, %v2094_v22, %v2096_v17 }
0x27e1   :  { %v2101_v5 = vsel %vm2099_vm3, %v2100_v20, %v2098_v21 }
0x27e2   :  { %2469 = vpush %v2101_v5 }
0x2813   :  { %s3269_s2 = spop %2469 }
0x2814   :  { %3424 = sst [smem:[#allocation9_spill]] %s3269_s2 }
0x2865   :  { %v2123_v23 = vpop.xlane.xlu1 %2122 }
0x2866   :  { %vm2124_vm5 = vcmp.eq.f32.partialorder %v2121_v8, %v2123_v23  ;;  %v2129_v61 = vcvt.f32.s32 %v2123_v23 }
0x2867   :  { %v2125_v26 = vsel %vm2124_vm5, %v2120_v24, inf }
0x2868   :  { %2126 = vmin.xlane.f32.xlu1 %v2125_v26  ;;  %v2130_v28 = vshll.u32 %v2129_v61, 16 }
0x286c   :  { %2144 = vmin.xlane.f32.xlu1 %v2143_v27 }
0x28f1   :  { %v2127_v33 = vpop.xlane.xlu1 %2126 }
0x28f2   :  { %v2128_v29 = vcvt.f32.s32 %v2127_v33 }
0x28f4   :  { %v2131_v30 = vadd.s32 %v2130_v28, %v2128_v29 }
0x28f5   :  { %v2145_v31 = vpop.xlane.xlu1 %2144 }
0x28f6   :  { %v2132_v35 = vrot.slane %v2131_v30, 4  ;;  %v2146_v57 = vrot.slane %v2145_v31, 4 }
0x28f8   :  { %vm2133_vm6 = vcmp.lt.s32.totalorder %v2131_v30, %v2132_v35  ;;  %v2147_v32 = vmin.f32 %v2145_v31, %v2146_v57 }
0x28f9   :  { %v2134_v34 = vsel %vm2133_vm6, %v2131_v30, %v2132_v35 }
0x28fa   :  { %v2148_v10 = vrot.slane %v2147_v32, 2  ;;  %v2135_v37 = vrot.slane %v2134_v34, 2 }
0x28fc   :  { %vm2136_vm7 = vcmp.lt.s32.totalorder %v2134_v34, %v2135_v37  ;;  %v2149_v38 = vmin.f32 %v2147_v32, %v2148_v10 }
0x28fd   :  { %v2137_v39 = vsel %vm2136_vm7, %v2134_v34, %v2135_v37  ;;  %vm603_vm7 = vcmp.eq.s32.totalorder %v2673_v25, 2 }
0x28fe   :  { %v2138_v40 = vrot.slane %v2137_v39, 1  ;;  %v2150_v59 = vrot.slane %v2149_v38, 1 }
0x2900   :  { %vm2139_vm8 = vcmp.lt.s32.totalorder %v2137_v39, %v2138_v40  ;;  %v2151_v62 = vmin.f32 %v2149_v38, %v2150_v59  ;;  %v604_v59 = vstv %s2894_s30  ;;  %s3430_s30 = sld [smem:[#allocation9_spill]] }
0x2901   :  { %v2140_v41 = vsel %vm2139_vm8, %v2137_v39, %v2138_v40  ;;  %v544_v39 = vstv %s2879_s25  ;;  %v484_v40 = vstv %s2863_s19  ;;  %vm663_vm8 = vcmp.eq.s32.totalorder %v2673_v25, 3  ;;  %s3428_s19 = sld [smem:[#allocation7_spill]] }
0x2902   :  { %2471 = vpush %v2140_v41  ;;  %v664_v41 = vstv %s2909_s8  ;;  %s3429_s25 = sld [smem:[#allocation8_spill]] }
0x2903   :  { %2473 = vpush %v2151_v62  ;;  %v665_v46 = vsel %vm663_vm8, %v664_v41, 0.0  ;;  %vm1503_vm8 = vcmp.eq.s32.totalorder %v2673_v25, 17  ;;  %v1804_v41 = vstv %s3194_s24 }
0x2933   :  { %s2472_s3 = spop %2471 }
0x2934   :  { %s2142_s7 = sand.u32 127, %s2472_s3  ;;  %s2474_s12 = spop %2473 }
0x2935   :  { %v2167_v43 = vstv %s2142_s7  ;;  %s2153_s14 = smax.f32 %s2588_s17, %s2474_s12  ;;  %s2170_s26 = scalar_lea.vmem [#allocation2], %s2142_s7 }
0x2936   :  { %vm2168_vm9 = vcmp.eq.s32.totalorder %v2673_v25, %v2167_v43  ;;  %v2154_v44 = vstv %s2153_s14  ;;  %v2171_v45 = vld [vmem:[%s2170_s26] sm:$0x1]  ;;  %v485_v43 = vsel %vm430_vm0, %v484_v40, 0.0  ;;  %vm843_vm0 = vcmp.eq.s32.totalorder %v2673_v25, 6 }
0x2937   :  { %vm3275_vm10 = vmor %vm3260_vm1, %vm2168_vm9  ;;  %2557 = vrsqrt.f32 %v2154_v44  ;;  %v2172_v47 = vmin.f32 %v2113_v15, %v2171_v45  ;;  %vm2157_vm11 = vcmp.eq.f32.partialorder %v2154_v44, inf  ;;  %v2160_v1 = vand.u32 2147483648, %v2154_v44 }
0x2938   :  { %vm2159_vm12 = vcmp.eq.f32.partialorder %v2154_v44, 0.0  ;;  %vm723_vm9 = vcmp.eq.s32.totalorder %v2673_v25, 4  ;;  %v1744_v40 = vstv %s3179_s27 }
0x2939   :  { %v2173_v3 = vsel %vm3275_vm10, 1e+30, %v2172_v47  ;;  %v724_v47 = vstv %s2924_s0  ;;  %s2589_s0 = smov [#allocation3]  }
0x293a   :  { %v2203_v48 = vsel %vm437_vm4, %v2173_v3, inf  ;;  %v2175_v49 = vand.u32 4294967168, %v2173_v3 }
0x293b   :  { %2204 = vmin.xlane.f32.xlu1 %v2203_v48 }
0x293c   :  { %v2176_v52 = vor.u32 %v2175_v49, %v2673_v25  ;;  %v784_v49 = vstv %s2939_s21  ;;  %s2265_s21 = sshll.u32 %s2589_s0, 4  ;;  %s2266_s21 = int_to_ptr.vmem [resolvable:$true] %s2265_s21 }
0x293d   :  { %p2568_p1 = scmp.lt.s32.totalorder %s2266_s21, %s2266_s21 }
0x293e   :  { %v2177_v53 = vsel %vm437_vm4, %v2176_v52, 2147483647 }
0x293f   :  { %v2179_v54 = vshra.s32 %v2177_v53, 16  ;;  %v2178_v58 = vand.u32 65535, %v2177_v53 }
0x2941   :  { %v2181_v56 = vcvt.s32.f32 %v2179_v54  ;;  %v2180_v12 = vcvt.s32.f32 %v2178_v58  ;;  %v725_v54 = vsel %vm723_vm9, %v724_v47, 0.0  ;;  %v904_v58 = vstv %s2969_s6  ;;  %s2567_s6 = scalar_lea.vmem %s2266_s21, 32 }
0x2942   :  { %vm1563_vm9 = vcmp.eq.s32.totalorder %v2673_v25, 18 }
0x2943   :  { %2182 = vmin.xlane.f32.xlu0 %v2181_v56 }
0x2944   :  { %v2558_v63 = vpop.eup %2557 }
0x2945   :  { %v2156_v0 = vmul.f32 %v2558_v63, %v2154_v44  ;;  %v844_v63 = vstv %s2954_s28  ;;  %s2563_s28 = scalar_lea.vmem %s2266_s21, 16 }
0x2946   :  { %p2564_p0 = scmp.ne.s32.totalorder %s2266_s21, %s2563_s28  ;;  %p2569_p2 = scmp.lt.s32.totalorder %s2567_s6, %s2563_s28 }
0x2947   :  { %v2158_v2 = vsel %vm2157_vm11, %v2154_v44, %v2156_v0  ;;  %v605_v44 = vsel %vm603_vm7, %v604_v59, 0.0  ;;  %vm1443_vm7 = vcmp.eq.s32.totalorder %v2673_v25, 16 }
0x2948   :  { %v2161_v18 = vsel %vm2159_vm12, %v2160_v1, %v2158_v2  ;;  %p2570_p3 = por %p2569_p2, %p2568_p1 }
0x2949   :  { %2475 = vpush %v2161_v18 }
0x294a   :  { %p2571_p4 = pnand %p2570_p3, %p2564_p0 }
0x297a   :  { %s3284_s26 = spop %2475 }
0x29c4   :  { %v2205_v13 = vpop.xlane.xlu1 %2204 }
0x29c5   :  { %v2206_v50 = vrot.slane %v2205_v13, 4 }
0x29c7   :  { %v2207_v6 = vmin.f32 %v2205_v13, %v2206_v50 }
0x29c9   :  { %v2208_v15 = vrot.slane %v2207_v6, 2 }
0x29cb   :  { %v2209_v42 = vmin.f32 %v2207_v6, %v2208_v15  ;;  %v1144_v15 = vstv %s3029_s10 }
0x29cc   :  { %v2183_v51 = vpop.xlane.xlu0 %2182 }
0x29cd   :  { %vm2184_vm13 = vcmp.eq.f32.partialorder %v2181_v56, %v2183_v51  ;;  %v2189_v4 = vcvt.f32.s32 %v2183_v51  ;;  %v2210_v16 = vrot.slane %v2209_v42, 1  ;;  %v845_v51 = vsel %vm843_vm0, %v844_v63, 0.0 }
0x29ce   :  { %v2185_v11 = vsel %vm2184_vm13, %v2180_v12, inf  ;;  %vm903_vm13 = vcmp.eq.s32.totalorder %v2673_v25, 7  ;;  %vm1743_vm0 = vcmp.eq.s32.totalorder %v2673_v25, 21 }
0x29cf   :  { %2186 = vmin.xlane.f32.xlu0 %v2185_v11  ;;  %v2190_v22 = vshll.u32 %v2189_v4, 16  ;;  %v2211_v21 = vmin.f32 %v2209_v42, %v2210_v16  ;;  %v964_v11 = vstv %s2984_s13  ;;  %v905_v13 = vsel %vm903_vm13, %v904_v58, 0.0 }
0x29d0   :  { %v1024_v4 = vstv %s2999_s22  ;;  %v1264_v16 = vstv %s3059_s1  ;;  %vm1863_vm13 = vcmp.eq.s32.totalorder %v2673_v25, 23  ;;  %v2164_v58 = vstv %s3284_s26 }
0x2a58   :  { %v2187_v14 = vpop.xlane.xlu0 %2186 }
0x2a59   :  { %v2188_v9 = vcvt.f32.s32 %v2187_v14 }
0x2a5b   :  { %v2191_v7 = vadd.s32 %v2190_v22, %v2188_v9  ;;  %v1084_v22 = vstv %s3014_s29 }
0x2a5d   :  { %v2192_v60 = vrot.slane %v2191_v7, 4 }
0x2a5f   :  { %vm2193_vm14 = vcmp.lt.s32.totalorder %v2191_v7, %v2192_v60 }
0x2a60   :  { %v2194_v19 = vsel %vm2193_vm14, %v2191_v7, %v2192_v60  ;;  %vm963_vm14 = vcmp.eq.s32.totalorder %v2673_v25, 8 }
0x2a61   :  { %v2195_v36 = vrot.slane %v2194_v19, 2  ;;  %v965_v6 = vsel %vm963_vm14, %v964_v11, 0.0  ;;  %vm1923_vm14 = vcmp.eq.s32.totalorder %v2673_v25, 24 }
0x2a63   :  { %vm2196_vm15 = vcmp.lt.s32.totalorder %v2194_v19, %v2195_v36 }
0x2a64   :  { %v2197_v8 = vsel %vm2196_vm15, %v2194_v19, %v2195_v36  ;;  %vm1023_vm15 = vcmp.eq.s32.totalorder %v2673_v25, 9  ;;  %v1204_v19 = vstv %s3044_s18 }
0x2a65   :  { %v2198_v17 = vrot.slane %v2197_v8, 1  ;;  %v1025_v9 = vsel %vm1023_vm15, %v1024_v4, 0.0  ;;  %vm1983_vm15 = vcmp.eq.s32.totalorder %v2673_v25, 25 }
0x2a67   :  { %vm2199_vm1 = vcmp.lt.s32.totalorder %v2197_v8, %v2198_v17 }
0x2a68   :  { %v2200_v20 = vsel %vm2199_vm1, %v2197_v8, %v2198_v17  ;;  %vm1083_vm1 = vcmp.eq.s32.totalorder %v2673_v25, 10 }
0x2a69   :  { %2477 = vpush %v2200_v20  ;;  %v1085_v60 = vsel %vm1083_vm1, %v1084_v22, 0.0  ;;  %vm2043_vm1 = vcmp.eq.s32.totalorder %v2673_v25, 26 }
0x2a6a   :  { %2479 = vpush %v2211_v21  ;;  %v1324_v21 = vstv %s3074_s11 }
0x2a9a   :  { %s2478_s3 = spop %2477 }
0x2a9b   :  { %s2202_s7 = sand.u32 127, %s2478_s3  ;;  %s2480_s12 = spop %2479 }
0x2a9c   :  { %v2227_v5 = vstv %s2202_s7  ;;  %s2213_s14 = smax.f32 %s2588_s17, %s2480_s12  ;;  %s2230_s2 = scalar_lea.vmem [#allocation2], %s2202_s7 }
0x2a9d   :  { %vm2228_vm2 = vcmp.eq.s32.totalorder %v2673_v25, %v2227_v5  ;;  %v2214_v55 = vstv %s2213_s14  ;;  %v2231_v23 = vld [vmem:[%s2230_s2] sm:$0x1] }
0x2a9e   :  { %vm2229_vm3 = vmor %vm3275_vm10, %vm2228_vm2  ;;  %2559 = vrsqrt.f32 %v2214_v55  ;;  %v2232_v24 = vmin.f32 %v2173_v3, %v2231_v23  ;;  %vm2217_vm5 = vcmp.eq.f32.partialorder %v2214_v55, inf  ;;  %v2220_v28 = vand.u32 2147483648, %v2214_v55 }
0x2a9f   :  { %vm2219_vm6 = vcmp.eq.f32.partialorder %v2214_v55, 0.0  ;;  %vm783_vm10 = vcmp.eq.s32.totalorder %v2673_v25, 5  ;;  %vm1143_vm2 = vcmp.eq.s32.totalorder %v2673_v25, 11  ;;  %v1384_v23 = vstv %s3089_s23 }
0x2aa0   :  { %v2233_v26 = vsel %vm2229_vm3, 1e+30, %v2232_v24  ;;  %v785_v1 = vsel %vm783_vm10, %v784_v49, 0.0  ;;  %vm1203_vm3 = vcmp.eq.s32.totalorder %v2673_v25, 12  ;;  %v1145_v36 = vsel %vm1143_vm2, %v1144_v15, 0.0 }
0x2aa1   :  { %v2234_v27 = vsel %vm437_vm4, %v2233_v26, inf  ;;  %vm543_vm4 = vcmp.eq.s32.totalorder %v2673_v25, 1  ;;  %v1205_v17 = vsel %vm1203_vm3, %v1204_v19, 0.0  ;;  %vm1623_vm10 = vcmp.eq.s32.totalorder %v2673_v25, 19 }
0x2aa2   :  { %2235 = vmin.xlane.f32.xlu0 %v2234_v27  ;;  %v545_v62 = vsel %vm543_vm4, %v544_v39, 0.0  ;;  %vm1383_vm4 = vcmp.eq.s32.totalorder %v2673_v25, 15  ;;  %v1444_v27 = vstv %s3104_s5  ;;  %vm2103_vm2 = vcmp.eq.s32.totalorder %v2673_v25, 27 }
0x2aa3   :  { %v546_v45 = vadd.f32 %v545_v62, %v485_v43  ;;  %v1745_v43 = vsel %vm1743_vm0, %v1744_v40, 0.0  ;;  %vm2163_vm3 = vcmp.eq.s32.totalorder %v2673_v25, 28 }
0x2aa5   :  { %v606_v48 = vadd.f32 %v605_v44, %v546_v45  ;;  %v1864_v45 = vstv %s3209_s15 }
0x2aa7   :  { %v666_v53 = vadd.f32 %v665_v46, %v606_v48  ;;  %v1865_v48 = vsel %vm1863_vm13, %v1864_v45, 0.0 }
0x2aa9   :  { %v726_v18 = vadd.f32 %v725_v54, %v666_v53 }
0x2aab   :  { %v2560_v61 = vpop.eup %2559  ;;  %v786_v12 = vadd.f32 %v785_v1, %v726_v18  ;;  %v2104_v1 = vstv %s3430_s30 }
0x2aac   :  { %v2216_v33 = vmul.f32 %v2560_v61, %v2214_v55  ;;  %v1385_v61 = vsel %vm1383_vm4, %v1384_v23, 0.0 }
0x2aad   :  { %v846_v50 = vadd.f32 %v845_v51, %v786_v12  ;;  %v2105_v51 = vsel %vm2103_vm2, %v2104_v1, 0.0 }
0x2aae   :  { %v2218_v29 = vsel %vm2217_vm5, %v2214_v55, %v2216_v33  ;;  %vm1263_vm5 = vcmp.eq.s32.totalorder %v2673_v25, 13 }
0x2aaf   :  { %v2221_v30 = vsel %vm2219_vm6, %v2220_v28, %v2218_v29  ;;  %v906_v14 = vadd.f32 %v905_v13, %v846_v50  ;;  %vm1323_vm6 = vcmp.eq.s32.totalorder %v2673_v25, 14  ;;  %v1265_v5 = vsel %vm1263_vm5, %v1264_v16, 0.0 }
0x2ab0   :  { %2481 = vpush %v2221_v30  ;;  %v1325_v24 = vsel %vm1323_vm6, %v1324_v21, 0.0  ;;  %v1504_v28 = vstv %s3119_s16  ;;  %v1445_v29 = vsel %vm1443_vm7, %v1444_v27, 0.0  ;;  %vm2223_vm5 = vcmp.eq.s32.totalorder %v2673_v25, 29 }
0x2ab1   :  { %v966_v7 = vadd.f32 %v965_v6, %v906_v14  ;;  %v2165_v13 = vsel %vm2163_vm3, %v2164_v58, 0.0  ;;  %vm2254_vm6 = vcmp.eq.s32.totalorder %v2673_v25, 30 }
0x2ab3   :  { %v1026_v42 = vadd.f32 %v1025_v9, %v966_v7 }
0x2ab5   :  { %v1086_v8 = vadd.f32 %v1085_v60, %v1026_v42 }
0x2ab7   :  { %v1146_v20 = vadd.f32 %v1145_v36, %v1086_v8 }
0x2ab9   :  { %v1206_v55 = vadd.f32 %v1205_v17, %v1146_v20 }
0x2abb   :  { %v1266_v26 = vadd.f32 %v1265_v5, %v1206_v55 }
0x2abd   :  { %v1326_v33 = vadd.f32 %v1325_v24, %v1266_v26 }
0x2abf   :  { %v1386_v30 = vadd.f32 %v1385_v61, %v1326_v33 }
0x2ae1   :  { %s3291_s2 = spop %2481 }
0x2ae2   :  { %v2224_v11 = vstv %s3291_s2 }
0x2ae3   :  { %v2225_v4 = vsel %vm2223_vm5, %v2224_v11, 0.0 }
0x2b2b   :  { %v2236_v31 = vpop.xlane.xlu0 %2235 }
0x2b2c   :  { %v2237_v35 = vrot.slane %v2236_v31, 4 }
0x2b2e   :  { %v2238_v57 = vmin.f32 %v2236_v31, %v2237_v35  ;;  %v1564_v31 = vstv %s3134_s4  ;;  %v1505_v35 = vsel %vm1503_vm8, %v1504_v28, 0.0 }
0x2b30   :  { %v2239_v32 = vrot.slane %v2238_v57, 2 }
0x2b32   :  { %v2240_v34 = vmin.f32 %v2238_v57, %v2239_v32  ;;  %v1446_v57 = vadd.f32 %v1445_v29, %v1386_v30  ;;  %v1624_v32 = vstv %s3149_s20 }
0x2b34   :  { %v2241_v10 = vrot.slane %v2240_v34, 1 }
0x2b36   :  { %v2242_v37 = vmin.f32 %v2240_v34, %v2241_v10  ;;  %v1565_v34 = vsel %vm1563_vm9, %v1564_v31, 0.0  ;;  %v1506_v10 = vadd.f32 %v1505_v35, %v1446_v57 }
0x2b38   :  { %2483 = vpush %v2242_v37  ;;  %v1684_v37 = vstv %s3164_s9  ;;  %v1566_v39 = vadd.f32 %v1565_v34, %v1506_v10 }
0x2b69   :  { %s2484_s3 = spop %2483 }
0x2b6a   :  { %s2244_s7 = smax.f32 %s2588_s17, %s2484_s3  ;;  %s3427_s17 = sld [smem:[#allocation6_spill]] }
0x2b6b   :  { %v2245_v38 = vstv %s2244_s7 }
0x2b6c   :  { %2561 = vrsqrt.f32 %v2245_v38  ;;  %vm2248_vm11 = vcmp.eq.f32.partialorder %v2245_v38, inf  ;;  %v2251_v56 = vand.u32 2147483648, %v2245_v38  ;;  %vm2250_vm12 = vcmp.eq.f32.partialorder %v2245_v38, 0.0 }
0x2b79   :  { %v2562_v3 = vpop.eup %2561 }
0x2b7a   :  { %v2247_v52 = vmul.f32 %v2562_v3, %v2245_v38  ;;  %v1924_v3 = vstv %s3427_s17 }
0x2b7b   :  { %v1925_v53 = vsel %vm1923_vm14, %v1924_v3, 0.0 }
0x2b7c   :  { %v2249_v0 = vsel %vm2248_vm11, %v2245_v38, %v2247_v52  ;;  %vm1683_vm11 = vcmp.eq.s32.totalorder %v2673_v25, 20  ;;  %v1625_v38 = vsel %vm1623_vm10, %v1624_v32, 0.0  ;;  %v1984_v52 = vstv %s3428_s19 }
0x2b7d   :  { %v2252_v2 = vsel %vm2250_vm12, %v2251_v56, %v2249_v0  ;;  %v1685_v59 = vsel %vm1683_vm11, %v1684_v37, 0.0  ;;  %v1626_v62 = vadd.f32 %v1625_v38, %v1566_v39  ;;  %vm1803_vm12 = vcmp.eq.s32.totalorder %v2673_v25, 22 }
0x2b7e   :  { %2485 = vpush %v2252_v2  ;;  %v1805_v46 = vsel %vm1803_vm12, %v1804_v41, 0.0  ;;  %v2044_v56 = vstv %s3429_s25  ;;  %v1985_v63 = vsel %vm1983_vm15, %v1984_v52, 0.0 }
0x2b7f   :  { %v1686_v44 = vadd.f32 %v1685_v59, %v1626_v62  ;;  %v2045_v2 = vsel %vm2043_vm1, %v2044_v56, 0.0 }
0x2b81   :  { %v1746_v47 = vadd.f32 %v1745_v43, %v1686_v44 }
0x2b83   :  { %v1806_v49 = vadd.f32 %v1805_v46, %v1746_v47 }
0x2b85   :  { %v1866_v54 = vadd.f32 %v1865_v48, %v1806_v49 }
0x2b87   :  { %v1926_v0 = vadd.f32 %v1925_v53, %v1866_v54 }
0x2b89   :  { %v1986_v18 = vadd.f32 %v1985_v63, %v1926_v0 }
0x2b8b   :  { %v2046_v12 = vadd.f32 %v2045_v2, %v1986_v18 }
0x2b8d   :  { %v2106_v50 = vadd.f32 %v2105_v51, %v2046_v12 }
0x2b8f   :  { %v2166_v6 = vadd.f32 %v2165_v13, %v2106_v50 }
0x2b91   :  { %v2226_v14 = vadd.f32 %v2225_v4, %v2166_v6 }
0x2baf   :  { %s2486_s8 = spop %2485 }
0x2bb0   :  { %v2255_v22 = vstv %s2486_s8 }
0x2bb1   :  { %v2256_v9 = vsel %vm2254_vm6, %v2255_v22, 0.0 }
0x2bb2   :  { %v2257_v7 = vadd.f32 %v2256_v9, %v2226_v14 }
0x2bb4   :  { %2258 = vst [vmem:[#allocation3] sm:$0x1] %v2257_v7 }
0x2bb5   :  { %2574 = shalt.err (!%p2571_p4)
}
0x2bb6   :  { %s3431_s29 = sld [smem:[#allocation10_spill]] }
0x2bbc   :  { %2268 = dma.vmem_to_hbm [thread:$0]  %s2266_s21, 16, %s3431_s29, [#allocation4]  }
0x2bbd   :  { %2583 = dma.done.wait [#allocation4], 16  }
0x2bbe   :  { %2584 = vsyncadd [#allocation4], 4294967280 }
0x2bbf   :  { %2272 = vsyncpa [#allocation4], 1 }

</bundles_post_ra>
